<compile_context>
chip_gen: v7x
topology: tpu7x:2x2x1
jax: 0.10.0
libtpu: 0.0.40
codegen_flags: <defaults>
</compile_context>

<pallas_src>
import jax
import jax.numpy as jnp
from jax import lax
from jax.experimental import pallas as pl
from jax.experimental.pallas import tpu as pltpu

EPS = 1e-5            # nn.BatchNorm2d default eps
LANE = 128


def _round_up(x, m):
    return ((x + m - 1) // m) * m


def _default_vmem_limit():
    # Generation-aware scoped-VMEM request: ~85% of physical VMEM
    # (v7x: ~54 MiB of 64; v5e/v6e: capped at 110 MiB of 128).
    try:
        cap = int(pltpu.get_tpu_info().vmem_capacity_bytes)
        return min(int(cap * 0.85), 110 * 1024 * 1024)
    except Exception:
        return 48 * 1024 * 1024   # conservative, safe on every generation


VMEM_LIMIT = _default_vmem_limit()


def _choose_tile_h(H, wp, cinp, coutp):
    """Largest power-of-two H tile whose working set fits the VMEM budget."""
    # TODO(synk): for very large Cin/Cout (weights alone near the VMEM limit)
    # add a K-tiling grid axis over the weight contraction dim.
    w_bytes = 2 * 9 * cinp * coutp * 2            # double-buffered bf16 weights
    budget = max(VMEM_LIMIT - w_bytes, 4 * 1024 * 1024) // 6
    th = 128
    while th > 8:
        in_b = (th + 2) * (wp + 2) * cinp * 2     # bf16 halo input tile
        out_b = th * wp * coutp * 4               # f32 output tile
        if in_b + out_b <= budget:
            break
        th //= 2
    return max(8, min(th, _round_up(H, 8)))


# ----------------------------------------------------------------------------
# Pallas kernel: 3x3 "same" conv over one (batch, H-tile) block.
#   x_ref : (1, TH+2, Wp+2, Cin_p)  bf16  zero-padded halo tile
#   w_ref : (9, Cin_p, Cout_p)      bf16  (ky*3+kx ordering)
#   b_ref : (1, Cout_p)             f32
#   y_ref : (1, TH, Wp, Cout_p)     f32   conv output (+bias)
#   sum_ref / ssq_ref : (1, 1, 1, Cout_p) f32  per-tile BN partials
# ----------------------------------------------------------------------------
def _make_conv_kernel(th, wp, h_valid, w_valid, hp):
    mask_needed = (w_valid != wp) or (h_valid != hp)

    def kernel(x_ref, w_ref, b_ref, y_ref, sum_ref, ssq_ref):
        cinp = x_ref.shape[-1]
        coutp = y_ref.shape[-1]
        # 9 MXU dots (K = Cin_p).  The kx/ky shifts are in-VMEM slices of the
        # halo tile (no HBM im2col slab).  bf16 operands, f32 accumulation.
        first = True
        for ky in range(3):
            for kx in range(3):
                patch = x_ref[:, ky:ky + th, kx:kx + wp, :].reshape(th * wp, cinp)
                d = jnp.dot(patch, w_ref[ky * 3 + kx],
                            preferred_element_type=jnp.float32)
                d = d.reshape(1, th, wp, coutp)
                if first:
                    y_ref[...] = d          # first tap: plain store (no init pass)
                    first = False
                else:
                    y_ref[...] += d
        y = y_ref[...] + b_ref[...]         # bias in the epilogue
        y_ref[...] = y

        # per-(batch, h-tile) BN partials; combined (Chan) in JAX so both grid
        # axes stay "parallel".  Mask padded rows/cols only if padding exists.
        if mask_needed:
            t = pl.program_id(1)
            rr = lax.broadcasted_iota(jnp.int32, (1, th, wp, 1), 1) + t * th
            ww = lax.broadcasted_iota(jnp.int32, (1, th, wp, 1), 2)
            y = y * ((rr < h_valid) & (ww < w_valid)).astype(jnp.float32)
        sum_ref[...] = jnp.sum(y, axis=(1, 2), keepdims=True)
        ssq_ref[...] = jnp.sum(y * y, axis=(1, 2), keepdims=True)

    return kernel


def _build_tiles(x, th, wp, cinp):
    """(N, H, W, C) -> (N*nH, TH+2, Wp+2, Cin_p) bf16 overlapping halo tiles."""
    N, H, W, C = x.shape
    nH = -(-H // th)
    hp = nH * th
    xp = jnp.pad(x, ((0, 0), (1, hp - H + 1), (1, wp - W + 1), (0, cinp - C)))
    xp = xp.astype(jnp.bfloat16)
    tiles = jnp.stack([lax.slice_in_dim(xp, t * th, t * th + th + 2, axis=1)
                       for t in range(nH)], axis=1)
    return tiles.reshape(N * nH, th + 2, wp + 2, cinp), nH, hp


def conv3x3_bn_partials(x, w_slab, bias, th):
    """3x3 'same' conv + bias over the valid NHWC input `x`, H-tiled with a
    1-row halo.  Returns padded output (N, Hp, Wp, Cout_p) f32 and per-tile
    BN partial sum / sum-of-squares (N, nH, 1, Cout_p)."""
    N, H, W, _ = x.shape
    cinp, coutp = w_slab.shape[1], w_slab.shape[2]
    wp = _round_up(W, 8)
    tiles, nH, hp = _build_tiles(x, th, wp, cinp)

    y, psum, pssq = pl.pallas_call(
        _make_conv_kernel(th, wp, H, W, hp),
        out_shape=(
            jax.ShapeDtypeStruct((N, hp, wp, coutp), jnp.float32),
            jax.ShapeDtypeStruct((N, nH, 1, coutp), jnp.float32),
            jax.ShapeDtypeStruct((N, nH, 1, coutp), jnp.float32),
        ),
        grid_spec=pltpu.PrefetchScalarGridSpec(
            num_scalar_prefetch=0,
            grid=(N, nH),
            in_specs=[
                pl.BlockSpec((1, th + 2, wp + 2, cinp),
                             lambda n, t: (n * nH + t, 0, 0, 0)),
                pl.BlockSpec((9, cinp, coutp), lambda n, t: (0, 0, 0)),
                pl.BlockSpec((1, coutp), lambda n, t: (0, 0)),
            ],
            out_specs=(
                pl.BlockSpec((1, th, wp, coutp), lambda n, t: (n, t, 0, 0)),
                pl.BlockSpec((1, 1, 1, coutp), lambda n, t: (n, t, 0, 0)),
                pl.BlockSpec((1, 1, 1, coutp), lambda n, t: (n, t, 0, 0)),
            ),
        ),
        compiler_params=pltpu.CompilerParams(
            dimension_semantics=("parallel", "parallel"),
            vmem_limit_bytes=VMEM_LIMIT),
    )(tiles, w_slab, bias.reshape(1, coutp))
    return y, psum, pssq, nH, hp, wp


# ----------------------------------------------------------------------------
# Pallas kernel: per-channel scale/shift (folded BatchNorm) + ReLU, tiled.
# ----------------------------------------------------------------------------
def _bn_relu_kernel(y_ref, sc_ref, sh_ref, o_ref):
    o_ref[...] = jnp.maximum(y_ref[...] * sc_ref[...] + sh_ref[...],
                             0.0).astype(o_ref.dtype)


def bn_relu(y, scale, shift, th, out_dtype):
    N, hp, wp, C = y.shape
    nH = hp // th
    return pl.pallas_call(
        _bn_relu_kernel,
        out_shape=jax.ShapeDtypeStruct((N, hp, wp, C), out_dtype),
        grid_spec=pltpu.PrefetchScalarGridSpec(
            num_scalar_prefetch=0,
            grid=(N, nH),
            in_specs=[
                pl.BlockSpec((1, th, wp, C), lambda n, t: (n, t, 0, 0)),
                pl.BlockSpec((1, C), lambda n, t: (0, 0)),
                pl.BlockSpec((1, C), lambda n, t: (0, 0)),
            ],
            out_specs=pl.BlockSpec((1, th, wp, C), lambda n, t: (n, t, 0, 0)),
        ),
        compiler_params=pltpu.CompilerParams(
            dimension_semantics=("parallel", "parallel"),
            vmem_limit_bytes=VMEM_LIMIT),
    )(y, scale.reshape(1, C), shift.reshape(1, C))


# ----------------------------------------------------------------------------
# JAX glue
# ----------------------------------------------------------------------------
def _lerp_matrix(n_in, n_out):
    """(n_out, n_in) linear-interpolation matrix, align_corners=True."""
    if n_in == 1:
        return jnp.ones((n_out, 1), jnp.float32)
    src = jnp.arange(n_out, dtype=jnp.float32) * ((n_in - 1) / (n_out - 1))
    i0 = jnp.clip(jnp.floor(src), 0.0, n_in - 2).astype(jnp.int32)
    frac = src - i0.astype(jnp.float32)
    cols = jnp.arange(n_in, dtype=jnp.int32)[None, :]
    return (jnp.where(cols == i0[:, None], 1.0 - frac[:, None], 0.0)
            + jnp.where(cols == (i0 + 1)[:, None], frac[:, None], 0.0))


def _upsample2x_bilinear_align_corners(x):   # NHWC, matmul form (no gathers)
    N, H, W, C = x.shape
    mh = _lerp_matrix(H, 2 * H)
    mw = _lerp_matrix(W, 2 * W)
    x = jnp.einsum('ph,nhwc->npwc', mh, x)
    x = jnp.einsum('qw,npwc->npqc', mw, x)
    return x


def _tile_counts(H, th, nH, W):
    return jnp.asarray([float(min(th, H - t * th) * W) for t in range(nH)],
                       jnp.float32)


def _bn_affine(psum, pssq, counts, gamma, beta):
    """BatchNorm (train mode) scale/shift from per-tile partials with a
    Chan-style parallel-variance combine (numerically safer than a single
    global E[x^2] - E[x]^2)."""
    N = psum.shape[0]
    s = psum[:, :, 0, :]                      # (N, nH, C)
    q = pssq[:, :, 0, :]
    c = counts[None, :, None]                 # (1, nH, 1)
    total = N * jnp.sum(counts)
    mean_t = s / c
    m2_t = jnp.maximum(q - s * mean_t, 0.0)   # per-tile centered 2nd moment
    mean = jnp.sum(s, axis=(0, 1)) / total
    m2 = (jnp.sum(m2_t, axis=(0, 1))
          + jnp.sum(c * (mean_t - mean) ** 2, axis=(0, 1)))
    var = m2 / total                          # biased, like nn.BatchNorm2d
    scale = gamma * lax.rsqrt(var + EPS)
    shift = beta - mean * scale
    return scale, shift


def up_forward(x1_nchw, x2_nchw, params, *, out_channels):
    """Forward of `Up` (bilinear=True). Inputs/outputs are NCHW like PyTorch."""
    p = params
    x1 = jnp.transpose(x1_nchw, (0, 2, 3, 1)).astype(jnp.float32)   # -> NHWC
    x2 = jnp.transpose(x2_nchw, (0, 2, 3, 1)).astype(jnp.float32)   # -> NHWC

    x1 = _upsample2x_bilinear_align_corners(x1)
    dY = x2.shape[1] - x1.shape[1]
    dX = x2.shape[2] - x1.shape[2]
    x1 = jnp.pad(x1, ((0, 0), (dY // 2, dY - dY // 2),
                      (dX // 2, dX - dX // 2), (0, 0)))

    # torch.cat([x2, x1], dim=1): channel concat in NHWC, padded once to lanes.
    x = jnp.concatenate([x2, x1], axis=-1)
    N, H, W, _ = x.shape
    wp = _round_up(W, 8)

    cinp, coutp = p["w1"].shape[1], p["w1"].shape[2]

    # conv1 (+bias) and BN1 batch statistics
    th1 = _choose_tile_h(H, wp, cinp, coutp)
    y1, s1, q1, nH1, _, _ = conv3x3_bn_partials(x, p["w1"], p["b1"], th1)
    sc1, sh1 = _bn_affine(s1, q1, _tile_counts(H, th1, nH1, W),
                          p["g1"], p["bt1"])
    a1 = bn_relu(y1, sc1, sh1, th1, jnp.bfloat16)[:, :H, :W, :]

    # conv2 (+bias) and BN2 batch statistics
    th2 = _choose_tile_h(H, wp, coutp, coutp)
    y2, s2, q2, nH2, _, _ = conv3x3_bn_partials(a1, p["w2"], p["b2"], th2)
    sc2, sh2 = _bn_affine(s2, q2, _tile_counts(H, th2, nH2, W),
                          p["g2"], p["bt2"])
    out = bn_relu(y2, sc2, sh2, th2, jnp.float32)

    out = out[:, :H, :W, :out_channels]       # drop spatial + lane padding
    return jnp.transpose(out, (0, 3, 1, 2))   # -> NCHW


# ----------------------------------------------------------------------------
# Parameters (raw PyTorch-equivalent params + lane-padded bf16 slab form)
# ----------------------------------------------------------------------------
def init_params(key, in_channels, out_channels):
    k1, k2, k3, k4 = jax.random.split(key, 4)
    return {
        # HWIO weights (PyTorch stores OIHW; layout converted here)
        "w1": 0.1 * jax.random.normal(k1, (3, 3, in_channels, out_channels), jnp.float32),
        "b1": 0.1 * jax.random.normal(k2, (out_channels,), jnp.float32),
        "g1": jnp.ones((out_channels,), jnp.float32),    # BN gamma (default init)
        "bt1": jnp.zeros((out_channels,), jnp.float32),  # BN beta
        "w2": 0.1 * jax.random.normal(k3, (3, 3, out_channels, out_channels), jnp.float32),
        "b2": 0.1 * jax.random.normal(k4, (out_channels,), jnp.float32),
        "g2": jnp.ones((out_channels,), jnp.float32),
        "bt2": jnp.zeros((out_channels,), jnp.float32),
    }


def prepare_params(raw, in_channels, out_channels, lane=LANE):
    """Pad channels to lane multiples and reshape HWIO weights into
    (9, Cin_p, Cout_p) bf16 tap order matching the kernel's ky/kx loop."""
    cinp = _round_up(in_channels, lane)
    coutp = _round_up(out_channels, lane)

    def wprep(w, cin_p):
        ci, co = w.shape[2], w.shape[3]
        wpad = jnp.pad(w, ((0, 0), (0, 0), (0, cin_p - ci), (0, coutp - co)))
        return wpad.reshape(9, cin_p, coutp).astype(jnp.bfloat16)

    def vec(v):
        return jnp.pad(v, (0, coutp - v.shape[0])).astype(jnp.float32)

    return {
        "w1": wprep(raw["w1"], cinp),
        "b1": vec(raw["b1"]),
        "g1": vec(raw["g1"]),
        "bt1": vec(raw["bt1"]),
        "w2": wprep(raw["w2"], coutp),
        "b2": vec(raw["b2"]),
        "g2": vec(raw["g2"]),
        "bt2": vec(raw["bt2"]),
    }


if __name__ == "__main__":
    key = jax.random.PRNGKey(0)
    k1, k2, kp = jax.random.split(key, 3)

    in_channels, out_channels = 8, 4
    # x1: coarse features (in_channels//2 ch, half spatial); x2: skip connection.
    x1 = jax.random.normal(k1, (2, in_channels // 2, 8, 8), jnp.float32)     # NCHW
    x2 = jax.random.normal(k2, (2, in_channels // 2, 16, 16), jnp.float32)   # NCHW

    raw = init_params(kp, in_channels, out_channels)
    params = prepare_params(raw, in_channels, out_channels)

    fwd = jax.jit(up_forward, static_argnames=("out_channels",))
    out = fwd(x1, x2, params, out_channels=out_channels)
    out = jax.block_until_ready(out)
    assert out.shape == (2, out_channels, 16, 16), out.shape
    assert bool(jnp.all(jnp.isfinite(out)))
    print("KERNEL_OK")
</pallas_src>

<mosaic_0001>
module attributes {stable_mosaic.version = 11 : i64} {
  func.func @kernel(%arg0: i32, %arg1: i32, %arg2: memref<1x18x18x128xbf16, #tpu.memory_space<vmem>>, %arg3: memref<9x128x128xbf16, #tpu.memory_space<vmem>>, %arg4: memref<1x128xf32, #tpu.memory_space<vmem>>, %arg5: memref<1x16x16x128xf32, #tpu.memory_space<vmem>>, %arg6: memref<1x1x1x128xf32, #tpu.memory_space<vmem>>, %arg7: memref<1x1x1x128xf32, #tpu.memory_space<vmem>>) attributes {dimension_semantics = [#tpu.dimension_semantics<parallel>, #tpu.dimension_semantics<parallel>], iteration_bounds = array<i64: 2, 1>, scalar_prefetch = 0 : i64, scratch_operands = 0 : i64, tpu.core_type = #tpu.core_type<tc>, window_params = [{transform_indices = @transform_0, window_bounds = array<i64: 1, 18, 18, 128>}, {pipeline_mode = #tpu.pipeline_mode<synchronous>, transform_indices = @transform_1, window_bounds = array<i64: 9, 128, 128>}, {pipeline_mode = #tpu.pipeline_mode<synchronous>, transform_indices = @transform_2, window_bounds = array<i64: 1, 128>}, {transform_indices = @transform_3, window_bounds = array<i64: 1, 16, 16, 128>}, {transform_indices = @transform_4, window_bounds = array<i64: 1, 1, 1, 128>}, {transform_indices = @transform_5, window_bounds = array<i64: 1, 1, 1, 128>}]} {
    %c0 = arith.constant 0 : index
    %c0_0 = arith.constant 0 : index
    %c0_1 = arith.constant 0 : index
    %c0_2 = arith.constant 0 : index
    %0 = vector.load %arg2[%c0, %c0_0, %c0_1, %c0_2] : memref<1x18x18x128xbf16, #tpu.memory_space<vmem>>, vector<1x16x16x128xbf16>
    %1 = vector.shape_cast %0 : vector<1x16x16x128xbf16> to vector<256x128xbf16>
    %c0_3 = arith.constant 0 : index
    %c0_4 = arith.constant 0 : index
    %c0_5 = arith.constant 0 : index
    %2 = vector.load %arg3[%c0_3, %c0_4, %c0_5] : memref<9x128x128xbf16, #tpu.memory_space<vmem>>, vector<1x128x128xbf16>
    %3 = vector.shape_cast %2 : vector<1x128x128xbf16> to vector<128x128xbf16>
    %cst = arith.constant dense<0.000000e+00> : vector<256x128xf32>
    %4 = tpu.matmul %1, %3, %cst {dimension_numbers = #tpu.dot_dimension_numbers<[1], [0], [0], [1], [0, 0, 1, 1], [], []>} : vector<256x128xbf16>, vector<128x128xbf16>, vector<256x128xf32> -> vector<256x128xf32>
    %5 = vector.shape_cast %4 : vector<256x128xf32> to vector<1x16x16x128xf32>
    %c0_6 = arith.constant 0 : index
    %c0_7 = arith.constant 0 : index
    %c0_8 = arith.constant 0 : index
    %c0_9 = arith.constant 0 : index
    %6 = vector.load %arg5[%c0_6, %c0_7, %c0_8, %c0_9] : memref<1x16x16x128xf32, #tpu.memory_space<vmem>>, vector<1x16x16x128xf32>
    tpu.vector_store %arg5[%c0_6, %c0_7, %c0_8, %c0_9], %5 {strides = array<i32>} : memref<1x16x16x128xf32, #tpu.memory_space<vmem>>, vector<1x16x16x128xf32>,
    %c0_10 = arith.constant 0 : index
    %c0_11 = arith.constant 0 : index
    %c1 = arith.constant 1 : index
    %c0_12 = arith.constant 0 : index
    %7 = vector.load %arg2[%c0_10, %c0_11, %c1, %c0_12] : memref<1x18x18x128xbf16, #tpu.memory_space<vmem>>, vector<1x16x16x128xbf16>
    %8 = vector.shape_cast %7 : vector<1x16x16x128xbf16> to vector<256x128xbf16>
    %c1_13 = arith.constant 1 : index
    %c0_14 = arith.constant 0 : index
    %c0_15 = arith.constant 0 : index
    %9 = vector.load %arg3[%c1_13, %c0_14, %c0_15] : memref<9x128x128xbf16, #tpu.memory_space<vmem>>, vector<1x128x128xbf16>
    %10 = vector.shape_cast %9 : vector<1x128x128xbf16> to vector<128x128xbf16>
    %cst_16 = arith.constant dense<0.000000e+00> : vector<256x128xf32>
    %11 = tpu.matmul %8, %10, %cst_16 {dimension_numbers = #tpu.dot_dimension_numbers<[1], [0], [0], [1], [0, 0, 1, 1], [], []>} : vector<256x128xbf16>, vector<128x128xbf16>, vector<256x128xf32> -> vector<256x128xf32>
    %12 = vector.shape_cast %11 : vector<256x128xf32> to vector<1x16x16x128xf32>
    %c0_17 = arith.constant 0 : index
    %c0_18 = arith.constant 0 : index
    %c0_19 = arith.constant 0 : index
    %c0_20 = arith.constant 0 : index
    %13 = vector.load %arg5[%c0_17, %c0_18, %c0_19, %c0_20] : memref<1x16x16x128xf32, #tpu.memory_space<vmem>>, vector<1x16x16x128xf32>
    %14 = arith.addf %13, %12 : vector<1x16x16x128xf32>
    %c0_21 = arith.constant 0 : index
    %c0_22 = arith.constant 0 : index
    %c0_23 = arith.constant 0 : index
    %c0_24 = arith.constant 0 : index
    %15 = vector.load %arg5[%c0_21, %c0_22, %c0_23, %c0_24] : memref<1x16x16x128xf32, #tpu.memory_space<vmem>>, vector<1x16x16x128xf32>
    tpu.vector_store %arg5[%c0_21, %c0_22, %c0_23, %c0_24], %14 {strides = array<i32>} : memref<1x16x16x128xf32, #tpu.memory_space<vmem>>, vector<1x16x16x128xf32>,
    %c0_25 = arith.constant 0 : index
    %c0_26 = arith.constant 0 : index
    %c2 = arith.constant 2 : index
    %c0_27 = arith.constant 0 : index
    %16 = vector.load %arg2[%c0_25, %c0_26, %c2, %c0_27] : memref<1x18x18x128xbf16, #tpu.memory_space<vmem>>, vector<1x16x16x128xbf16>
    %17 = vector.shape_cast %16 : vector<1x16x16x128xbf16> to vector<256x128xbf16>
    %c2_28 = arith.constant 2 : index
    %c0_29 = arith.constant 0 : index
    %c0_30 = arith.constant 0 : index
    %18 = vector.load %arg3[%c2_28, %c0_29, %c0_30] : memref<9x128x128xbf16, #tpu.memory_space<vmem>>, vector<1x128x128xbf16>
    %19 = vector.shape_cast %18 : vector<1x128x128xbf16> to vector<128x128xbf16>
    %cst_31 = arith.constant dense<0.000000e+00> : vector<256x128xf32>
    %20 = tpu.matmul %17, %19, %cst_31 {dimension_numbers = #tpu.dot_dimension_numbers<[1], [0], [0], [1], [0, 0, 1, 1], [], []>} : vector<256x128xbf16>, vector<128x128xbf16>, vector<256x128xf32> -> vector<256x128xf32>
    %21 = vector.shape_cast %20 : vector<256x128xf32> to vector<1x16x16x128xf32>
    %c0_32 = arith.constant 0 : index
    %c0_33 = arith.constant 0 : index
    %c0_34 = arith.constant 0 : index
    %c0_35 = arith.constant 0 : index
    %22 = vector.load %arg5[%c0_32, %c0_33, %c0_34, %c0_35] : memref<1x16x16x128xf32, #tpu.memory_space<vmem>>, vector<1x16x16x128xf32>
    %23 = arith.addf %22, %21 : vector<1x16x16x128xf32>
    %c0_36 = arith.constant 0 : index
    %c0_37 = arith.constant 0 : index
    %c0_38 = arith.constant 0 : index
    %c0_39 = arith.constant 0 : index
    %24 = vector.load %arg5[%c0_36, %c0_37, %c0_38, %c0_39] : memref<1x16x16x128xf32, #tpu.memory_space<vmem>>, vector<1x16x16x128xf32>
    tpu.vector_store %arg5[%c0_36, %c0_37, %c0_38, %c0_39], %23 {strides = array<i32>} : memref<1x16x16x128xf32, #tpu.memory_space<vmem>>, vector<1x16x16x128xf32>,
    %c0_40 = arith.constant 0 : index
    %c1_41 = arith.constant 1 : index
    %c0_42 = arith.constant 0 : index
    %c0_43 = arith.constant 0 : index
    %25 = vector.load %arg2[%c0_40, %c1_41, %c0_42, %c0_43] : memref<1x18x18x128xbf16, #tpu.memory_space<vmem>>, vector<1x16x16x128xbf16>
    %26 = vector.shape_cast %25 : vector<1x16x16x128xbf16> to vector<256x128xbf16>
    %c3 = arith.constant 3 : index
    %c0_44 = arith.constant 0 : index
    %c0_45 = arith.constant 0 : index
    %27 = vector.load %arg3[%c3, %c0_44, %c0_45] : memref<9x128x128xbf16, #tpu.memory_space<vmem>>, vector<1x128x128xbf16>
    %28 = vector.shape_cast %27 : vector<1x128x128xbf16> to vector<128x128xbf16>
    %cst_46 = arith.constant dense<0.000000e+00> : vector<256x128xf32>
    %29 = tpu.matmul %26, %28, %cst_46 {dimension_numbers = #tpu.dot_dimension_numbers<[1], [0], [0], [1], [0, 0, 1, 1], [], []>} : vector<256x128xbf16>, vector<128x128xbf16>, vector<256x128xf32> -> vector<256x128xf32>
    %30 = vector.shape_cast %29 : vector<256x128xf32> to vector<1x16x16x128xf32>
    %c0_47 = arith.constant 0 : index
    %c0_48 = arith.constant 0 : index
    %c0_49 = arith.constant 0 : index
    %c0_50 = arith.constant 0 : index
    %31 = vector.load %arg5[%c0_47, %c0_48, %c0_49, %c0_50] : memref<1x16x16x128xf32, #tpu.memory_space<vmem>>, vector<1x16x16x128xf32>
    %32 = arith.addf %31, %30 : vector<1x16x16x128xf32>
    %c0_51 = arith.constant 0 : index
    %c0_52 = arith.constant 0 : index
    %c0_53 = arith.constant 0 : index
    %c0_54 = arith.constant 0 : index
    %33 = vector.load %arg5[%c0_51, %c0_52, %c0_53, %c0_54] : memref<1x16x16x128xf32, #tpu.memory_space<vmem>>, vector<1x16x16x128xf32>
    tpu.vector_store %arg5[%c0_51, %c0_52, %c0_53, %c0_54], %32 {strides = array<i32>} : memref<1x16x16x128xf32, #tpu.memory_space<vmem>>, vector<1x16x16x128xf32>,
    %c0_55 = arith.constant 0 : index
    %c1_56 = arith.constant 1 : index
    %c1_57 = arith.constant 1 : index
    %c0_58 = arith.constant 0 : index
    %34 = vector.load %arg2[%c0_55, %c1_56, %c1_57, %c0_58] : memref<1x18x18x128xbf16, #tpu.memory_space<vmem>>, vector<1x16x16x128xbf16>
    %35 = vector.shape_cast %34 : vector<1x16x16x128xbf16> to vector<256x128xbf16>
    %c4 = arith.constant 4 : index
    %c0_59 = arith.constant 0 : index
    %c0_60 = arith.constant 0 : index
    %36 = vector.load %arg3[%c4, %c0_59, %c0_60] : memref<9x128x128xbf16, #tpu.memory_space<vmem>>, vector<1x128x128xbf16>
    %37 = vector.shape_cast %36 : vector<1x128x128xbf16> to vector<128x128xbf16>
    %cst_61 = arith.constant dense<0.000000e+00> : vector<256x128xf32>
    %38 = tpu.matmul %35, %37, %cst_61 {dimension_numbers = #tpu.dot_dimension_numbers<[1], [0], [0], [1], [0, 0, 1, 1], [], []>} : vector<256x128xbf16>, vector<128x128xbf16>, vector<256x128xf32> -> vector<256x128xf32>
    %39 = vector.shape_cast %38 : vector<256x128xf32> to vector<1x16x16x128xf32>
    %c0_62 = arith.constant 0 : index
    %c0_63 = arith.constant 0 : index
    %c0_64 = arith.constant 0 : index
    %c0_65 = arith.constant 0 : index
    %40 = vector.load %arg5[%c0_62, %c0_63, %c0_64, %c0_65] : memref<1x16x16x128xf32, #tpu.memory_space<vmem>>, vector<1x16x16x128xf32>
    %41 = arith.addf %40, %39 : vector<1x16x16x128xf32>
    %c0_66 = arith.constant 0 : index
    %c0_67 = arith.constant 0 : index
    %c0_68 = arith.constant 0 : index
    %c0_69 = arith.constant 0 : index
    %42 = vector.load %arg5[%c0_66, %c0_67, %c0_68, %c0_69] : memref<1x16x16x128xf32, #tpu.memory_space<vmem>>, vector<1x16x16x128xf32>
    tpu.vector_store %arg5[%c0_66, %c0_67, %c0_68, %c0_69], %41 {strides = array<i32>} : memref<1x16x16x128xf32, #tpu.memory_space<vmem>>, vector<1x16x16x128xf32>,
    %c0_70 = arith.constant 0 : index
    %c1_71 = arith.constant 1 : index
    %c2_72 = arith.constant 2 : index
    %c0_73 = arith.constant 0 : index
    %43 = vector.load %arg2[%c0_70, %c1_71, %c2_72, %c0_73] : memref<1x18x18x128xbf16, #tpu.memory_space<vmem>>, vector<1x16x16x128xbf16>
    %44 = vector.shape_cast %43 : vector<1x16x16x128xbf16> to vector<256x128xbf16>
    %c5 = arith.constant 5 : index
    %c0_74 = arith.constant 0 : index
    %c0_75 = arith.constant 0 : index
    %45 = vector.load %arg3[%c5, %c0_74, %c0_75] : memref<9x128x128xbf16, #tpu.memory_space<vmem>>, vector<1x128x128xbf16>
    %46 = vector.shape_cast %45 : vector<1x128x128xbf16> to vector<128x128xbf16>
    %cst_76 = arith.constant dense<0.000000e+00> : vector<256x128xf32>
    %47 = tpu.matmul %44, %46, %cst_76 {dimension_numbers = #tpu.dot_dimension_numbers<[1], [0], [0], [1], [0, 0, 1, 1], [], []>} : vector<256x128xbf16>, vector<128x128xbf16>, vector<256x128xf32> -> vector<256x128xf32>
    %48 = vector.shape_cast %47 : vector<256x128xf32> to vector<1x16x16x128xf32>
    %c0_77 = arith.constant 0 : index
    %c0_78 = arith.constant 0 : index
    %c0_79 = arith.constant 0 : index
    %c0_80 = arith.constant 0 : index
    %49 = vector.load %arg5[%c0_77, %c0_78, %c0_79, %c0_80] : memref<1x16x16x128xf32, #tpu.memory_space<vmem>>, vector<1x16x16x128xf32>
    %50 = arith.addf %49, %48 : vector<1x16x16x128xf32>
    %c0_81 = arith.constant 0 : index
    %c0_82 = arith.constant 0 : index
    %c0_83 = arith.constant 0 : index
    %c0_84 = arith.constant 0 : index
    %51 = vector.load %arg5[%c0_81, %c0_82, %c0_83, %c0_84] : memref<1x16x16x128xf32, #tpu.memory_space<vmem>>, vector<1x16x16x128xf32>
    tpu.vector_store %arg5[%c0_81, %c0_82, %c0_83, %c0_84], %50 {strides = array<i32>} : memref<1x16x16x128xf32, #tpu.memory_space<vmem>>, vector<1x16x16x128xf32>,
    %c0_85 = arith.constant 0 : index
    %c2_86 = arith.constant 2 : index
    %c0_87 = arith.constant 0 : index
    %c0_88 = arith.constant 0 : index
    %52 = vector.load %arg2[%c0_85, %c2_86, %c0_87, %c0_88] : memref<1x18x18x128xbf16, #tpu.memory_space<vmem>>, vector<1x16x16x128xbf16>
    %53 = vector.shape_cast %52 : vector<1x16x16x128xbf16> to vector<256x128xbf16>
    %c6 = arith.constant 6 : index
    %c0_89 = arith.constant 0 : index
    %c0_90 = arith.constant 0 : index
    %54 = vector.load %arg3[%c6, %c0_89, %c0_90] : memref<9x128x128xbf16, #tpu.memory_space<vmem>>, vector<1x128x128xbf16>
    %55 = vector.shape_cast %54 : vector<1x128x128xbf16> to vector<128x128xbf16>
    %cst_91 = arith.constant dense<0.000000e+00> : vector<256x128xf32>
    %56 = tpu.matmul %53, %55, %cst_91 {dimension_numbers = #tpu.dot_dimension_numbers<[1], [0], [0], [1], [0, 0, 1, 1], [], []>} : vector<256x128xbf16>, vector<128x128xbf16>, vector<256x128xf32> -> vector<256x128xf32>
    %57 = vector.shape_cast %56 : vector<256x128xf32> to vector<1x16x16x128xf32>
    %c0_92 = arith.constant 0 : index
    %c0_93 = arith.constant 0 : index
    %c0_94 = arith.constant 0 : index
    %c0_95 = arith.constant 0 : index
    %58 = vector.load %arg5[%c0_92, %c0_93, %c0_94, %c0_95] : memref<1x16x16x128xf32, #tpu.memory_space<vmem>>, vector<1x16x16x128xf32>
    %59 = arith.addf %58, %57 : vector<1x16x16x128xf32>
    %c0_96 = arith.constant 0 : index
    %c0_97 = arith.constant 0 : index
    %c0_98 = arith.constant 0 : index
    %c0_99 = arith.constant 0 : index
    %60 = vector.load %arg5[%c0_96, %c0_97, %c0_98, %c0_99] : memref<1x16x16x128xf32, #tpu.memory_space<vmem>>, vector<1x16x16x128xf32>
    tpu.vector_store %arg5[%c0_96, %c0_97, %c0_98, %c0_99], %59 {strides = array<i32>} : memref<1x16x16x128xf32, #tpu.memory_space<vmem>>, vector<1x16x16x128xf32>,
    %c0_100 = arith.constant 0 : index
    %c2_101 = arith.constant 2 : index
    %c1_102 = arith.constant 1 : index
    %c0_103 = arith.constant 0 : index
    %61 = vector.load %arg2[%c0_100, %c2_101, %c1_102, %c0_103] : memref<1x18x18x128xbf16, #tpu.memory_space<vmem>>, vector<1x16x16x128xbf16>
    %62 = vector.shape_cast %61 : vector<1x16x16x128xbf16> to vector<256x128xbf16>
    %c7 = arith.constant 7 : index
    %c0_104 = arith.constant 0 : index
    %c0_105 = arith.constant 0 : index
    %63 = vector.load %arg3[%c7, %c0_104, %c0_105] : memref<9x128x128xbf16, #tpu.memory_space<vmem>>, vector<1x128x128xbf16>
    %64 = vector.shape_cast %63 : vector<1x128x128xbf16> to vector<128x128xbf16>
    %cst_106 = arith.constant dense<0.000000e+00> : vector<256x128xf32>
    %65 = tpu.matmul %62, %64, %cst_106 {dimension_numbers = #tpu.dot_dimension_numbers<[1], [0], [0], [1], [0, 0, 1, 1], [], []>} : vector<256x128xbf16>, vector<128x128xbf16>, vector<256x128xf32> -> vector<256x128xf32>
    %66 = vector.shape_cast %65 : vector<256x128xf32> to vector<1x16x16x128xf32>
    %c0_107 = arith.constant 0 : index
    %c0_108 = arith.constant 0 : index
    %c0_109 = arith.constant 0 : index
    %c0_110 = arith.constant 0 : index
    %67 = vector.load %arg5[%c0_107, %c0_108, %c0_109, %c0_110] : memref<1x16x16x128xf32, #tpu.memory_space<vmem>>, vector<1x16x16x128xf32>
    %68 = arith.addf %67, %66 : vector<1x16x16x128xf32>
    %c0_111 = arith.constant 0 : index
    %c0_112 = arith.constant 0 : index
    %c0_113 = arith.constant 0 : index
    %c0_114 = arith.constant 0 : index
    %69 = vector.load %arg5[%c0_111, %c0_112, %c0_113, %c0_114] : memref<1x16x16x128xf32, #tpu.memory_space<vmem>>, vector<1x16x16x128xf32>
    tpu.vector_store %arg5[%c0_111, %c0_112, %c0_113, %c0_114], %68 {strides = array<i32>} : memref<1x16x16x128xf32, #tpu.memory_space<vmem>>, vector<1x16x16x128xf32>,
    %c0_115 = arith.constant 0 : index
    %c2_116 = arith.constant 2 : index
    %c2_117 = arith.constant 2 : index
    %c0_118 = arith.constant 0 : index
    %70 = vector.load %arg2[%c0_115, %c2_116, %c2_117, %c0_118] : memref<1x18x18x128xbf16, #tpu.memory_space<vmem>>, vector<1x16x16x128xbf16>
    %71 = vector.shape_cast %70 : vector<1x16x16x128xbf16> to vector<256x128xbf16>
    %c8 = arith.constant 8 : index
    %c0_119 = arith.constant 0 : index
    %c0_120 = arith.constant 0 : index
    %72 = vector.load %arg3[%c8, %c0_119, %c0_120] : memref<9x128x128xbf16, #tpu.memory_space<vmem>>, vector<1x128x128xbf16>
    %73 = vector.shape_cast %72 : vector<1x128x128xbf16> to vector<128x128xbf16>
    %cst_121 = arith.constant dense<0.000000e+00> : vector<256x128xf32>
    %74 = tpu.matmul %71, %73, %cst_121 {dimension_numbers = #tpu.dot_dimension_numbers<[1], [0], [0], [1], [0, 0, 1, 1], [], []>} : vector<256x128xbf16>, vector<128x128xbf16>, vector<256x128xf32> -> vector<256x128xf32>
    %75 = vector.shape_cast %74 : vector<256x128xf32> to vector<1x16x16x128xf32>
    %c0_122 = arith.constant 0 : index
    %c0_123 = arith.constant 0 : index
    %c0_124 = arith.constant 0 : index
    %c0_125 = arith.constant 0 : index
    %76 = vector.load %arg5[%c0_122, %c0_123, %c0_124, %c0_125] : memref<1x16x16x128xf32, #tpu.memory_space<vmem>>, vector<1x16x16x128xf32>
    %77 = arith.addf %76, %75 : vector<1x16x16x128xf32>
    %c0_126 = arith.constant 0 : index
    %c0_127 = arith.constant 0 : index
    %c0_128 = arith.constant 0 : index
    %c0_129 = arith.constant 0 : index
    %78 = vector.load %arg5[%c0_126, %c0_127, %c0_128, %c0_129] : memref<1x16x16x128xf32, #tpu.memory_space<vmem>>, vector<1x16x16x128xf32>
    tpu.vector_store %arg5[%c0_126, %c0_127, %c0_128, %c0_129], %77 {strides = array<i32>} : memref<1x16x16x128xf32, #tpu.memory_space<vmem>>, vector<1x16x16x128xf32>,
    %c0_130 = arith.constant 0 : index
    %c0_131 = arith.constant 0 : index
    %c0_132 = arith.constant 0 : index
    %c0_133 = arith.constant 0 : index
    %79 = vector.load %arg5[%c0_130, %c0_131, %c0_132, %c0_133] : memref<1x16x16x128xf32, #tpu.memory_space<vmem>>, vector<1x16x16x128xf32>
    %c0_134 = arith.constant 0 : index
    %c0_135 = arith.constant 0 : index
    %80 = vector.load %arg4[%c0_134, %c0_135] : memref<1x128xf32, #tpu.memory_space<vmem>>, vector<1x128xf32>
    %81 = vector.shape_cast %80 : vector<1x128xf32> to vector<1x1x1x128xf32>
    %82 = vector.broadcast %81 : vector<1x1x1x128xf32> to vector<1x16x16x128xf32>
    %83 = arith.addf %79, %82 : vector<1x16x16x128xf32>
    %c0_136 = arith.constant 0 : index
    %c0_137 = arith.constant 0 : index
    %c0_138 = arith.constant 0 : index
    %c0_139 = arith.constant 0 : index
    %84 = vector.load %arg5[%c0_136, %c0_137, %c0_138, %c0_139] : memref<1x16x16x128xf32, #tpu.memory_space<vmem>>, vector<1x16x16x128xf32>
    tpu.vector_store %arg5[%c0_136, %c0_137, %c0_138, %c0_139], %83 {strides = array<i32>} : memref<1x16x16x128xf32, #tpu.memory_space<vmem>>, vector<1x16x16x128xf32>,
    %cst_140 = arith.constant dense<0.000000e+00> : vector<1x128xf32>
    %85 = vector.multi_reduction <add>, %83, %cst_140 [1, 2] : vector<1x16x16x128xf32> to vector<1x128xf32>
    %86 = vector.shape_cast %85 : vector<1x128xf32> to vector<1x1x1x128xf32>
    %c0_141 = arith.constant 0 : index
    %c0_142 = arith.constant 0 : index
    %c0_143 = arith.constant 0 : index
    %c0_144 = arith.constant 0 : index
    %87 = vector.load %arg6[%c0_141, %c0_142, %c0_143, %c0_144] : memref<1x1x1x128xf32, #tpu.memory_space<vmem>>, vector<1x1x1x128xf32>
    tpu.vector_store %arg6[%c0_141, %c0_142, %c0_143, %c0_144], %86 {strides = array<i32>} : memref<1x1x1x128xf32, #tpu.memory_space<vmem>>, vector<1x1x1x128xf32>,
    %88 = arith.mulf %83, %83 : vector<1x16x16x128xf32>
    %cst_145 = arith.constant dense<0.000000e+00> : vector<1x128xf32>
    %89 = vector.multi_reduction <add>, %88, %cst_145 [1, 2] : vector<1x16x16x128xf32> to vector<1x128xf32>
    %90 = vector.shape_cast %89 : vector<1x128xf32> to vector<1x1x1x128xf32>
    %c0_146 = arith.constant 0 : index
    %c0_147 = arith.constant 0 : index
    %c0_148 = arith.constant 0 : index
    %c0_149 = arith.constant 0 : index
    %91 = vector.load %arg7[%c0_146, %c0_147, %c0_148, %c0_149] : memref<1x1x1x128xf32, #tpu.memory_space<vmem>>, vector<1x1x1x128xf32>
    tpu.vector_store %arg7[%c0_146, %c0_147, %c0_148, %c0_149], %90 {strides = array<i32>} : memref<1x1x1x128xf32, #tpu.memory_space<vmem>>, vector<1x1x1x128xf32>,
    return
  }
  func.func @transform_0(%arg0: i32, %arg1: i32) -> (i32, i32, i32, i32) {
    %c1_i32 = arith.constant 1 : i32
    %0 = arith.muli %arg0, %c1_i32 : i32
    %1 = arith.addi %0, %arg1 : i32
    %c0_i32 = arith.constant 0 : i32
    %c0_i32_0 = arith.constant 0 : i32
    %c0_i32_1 = arith.constant 0 : i32
    %c0_i32_2 = arith.constant 0 : i32
    return %1, %c0_i32, %c0_i32_0, %c0_i32_1 : i32, i32, i32, i32
  }
  func.func @transform_1(%arg0: i32, %arg1: i32) -> (i32, i32, i32) {
    %c0_i32 = arith.constant 0 : i32
    %c0_i32_0 = arith.constant 0 : i32
    %c0_i32_1 = arith.constant 0 : i32
    %c0_i32_2 = arith.constant 0 : i32
    return %c0_i32, %c0_i32_0, %c0_i32_1 : i32, i32, i32
  }
  func.func @transform_2(%arg0: i32, %arg1: i32) -> (i32, i32) {
    %c0_i32 = arith.constant 0 : i32
    %c0_i32_0 = arith.constant 0 : i32
    %c0_i32_1 = arith.constant 0 : i32
    return %c0_i32, %c0_i32_0 : i32, i32
  }
  func.func @transform_3(%arg0: i32, %arg1: i32) -> (i32, i32, i32, i32) {
    %c0_i32 = arith.constant 0 : i32
    %c0_i32_0 = arith.constant 0 : i32
    %c0_i32_1 = arith.constant 0 : i32
    return %arg0, %arg1, %c0_i32, %c0_i32_0 : i32, i32, i32, i32
  }
  func.func @transform_4(%arg0: i32, %arg1: i32) -> (i32, i32, i32, i32) {
    %c0_i32 = arith.constant 0 : i32
    %c0_i32_0 = arith.constant 0 : i32
    %c0_i32_1 = arith.constant 0 : i32
    return %arg0, %arg1, %c0_i32, %c0_i32_0 : i32, i32, i32, i32
  }
  func.func @transform_5(%arg0: i32, %arg1: i32) -> (i32, i32, i32, i32) {
    %c0_i32 = arith.constant 0 : i32
    %c0_i32_0 = arith.constant 0 : i32
    %c0_i32_1 = arith.constant 0 : i32
    return %arg0, %arg1, %c0_i32, %c0_i32_0 : i32, i32, i32, i32
  }
}

module attributes {stable_mosaic.version = 11 : i64} {
  func.func @_bn_relu_kernel(%arg0: i32, %arg1: i32, %arg2: memref<1x16x16x128xf32, #tpu.memory_space<vmem>>, %arg3: memref<1x128xf32, #tpu.memory_space<vmem>>, %arg4: memref<1x128xf32, #tpu.memory_space<vmem>>, %arg5: memref<1x16x16x128xbf16, #tpu.memory_space<vmem>>) attributes {dimension_semantics = [#tpu.dimension_semantics<parallel>, #tpu.dimension_semantics<parallel>], iteration_bounds = array<i64: 2, 1>, scalar_prefetch = 0 : i64, scratch_operands = 0 : i64, tpu.core_type = #tpu.core_type<tc>, window_params = [{transform_indices = @transform_0, window_bounds = array<i64: 1, 16, 16, 128>}, {pipeline_mode = #tpu.pipeline_mode<synchronous>, transform_indices = @transform_1, window_bounds = array<i64: 1, 128>}, {pipeline_mode = #tpu.pipeline_mode<synchronous>, transform_indices = @transform_2, window_bounds = array<i64: 1, 128>}, {transform_indices = @transform_3, window_bounds = array<i64: 1, 16, 16, 128>}]} {
    %c0 = arith.constant 0 : index
    %c0_0 = arith.constant 0 : index
    %c0_1 = arith.constant 0 : index
    %c0_2 = arith.constant 0 : index
    %0 = vector.load %arg2[%c0, %c0_0, %c0_1, %c0_2] : memref<1x16x16x128xf32, #tpu.memory_space<vmem>>, vector<1x16x16x128xf32>
    %c0_3 = arith.constant 0 : index
    %c0_4 = arith.constant 0 : index
    %1 = vector.load %arg3[%c0_3, %c0_4] : memref<1x128xf32, #tpu.memory_space<vmem>>, vector<1x128xf32>
    %2 = vector.shape_cast %1 : vector<1x128xf32> to vector<1x1x1x128xf32>
    %3 = vector.broadcast %2 : vector<1x1x1x128xf32> to vector<1x16x16x128xf32>
    %4 = arith.mulf %0, %3 : vector<1x16x16x128xf32>
    %c0_5 = arith.constant 0 : index
    %c0_6 = arith.constant 0 : index
    %5 = vector.load %arg4[%c0_5, %c0_6] : memref<1x128xf32, #tpu.memory_space<vmem>>, vector<1x128xf32>
    %6 = vector.shape_cast %5 : vector<1x128xf32> to vector<1x1x1x128xf32>
    %7 = vector.broadcast %6 : vector<1x1x1x128xf32> to vector<1x16x16x128xf32>
    %8 = arith.addf %4, %7 : vector<1x16x16x128xf32>
    %cst = arith.constant 0.000000e+00 : f32
    %9 = vector.broadcast %cst : f32 to vector<1x16x16x128xf32>
    %10 = arith.maximumf %8, %9 : vector<1x16x16x128xf32>
    %11 = arith.truncf %10 : vector<1x16x16x128xf32> to vector<1x16x16x128xbf16>
    %c0_7 = arith.constant 0 : index
    %c0_8 = arith.constant 0 : index
    %c0_9 = arith.constant 0 : index
    %c0_10 = arith.constant 0 : index
    %12 = vector.load %arg5[%c0_7, %c0_8, %c0_9, %c0_10] : memref<1x16x16x128xbf16, #tpu.memory_space<vmem>>, vector<1x16x16x128xbf16>
    tpu.vector_store %arg5[%c0_7, %c0_8, %c0_9, %c0_10], %11 {strides = array<i32>} : memref<1x16x16x128xbf16, #tpu.memory_space<vmem>>, vector<1x16x16x128xbf16>,
    return
  }
  func.func @transform_0(%arg0: i32, %arg1: i32) -> (i32, i32, i32, i32) {
    %c0_i32 = arith.constant 0 : i32
    %c0_i32_0 = arith.constant 0 : i32
    %c0_i32_1 = arith.constant 0 : i32
    return %arg0, %arg1, %c0_i32, %c0_i32_0 : i32, i32, i32, i32
  }
  func.func @transform_1(%arg0: i32, %arg1: i32) -> (i32, i32) {
    %c0_i32 = arith.constant 0 : i32
    %c0_i32_0 = arith.constant 0 : i32
    %c0_i32_1 = arith.constant 0 : i32
    return %c0_i32, %c0_i32_0 : i32, i32
  }
  func.func @transform_2(%arg0: i32, %arg1: i32) -> (i32, i32) {
    %c0_i32 = arith.constant 0 : i32
    %c0_i32_0 = arith.constant 0 : i32
    %c0_i32_1 = arith.constant 0 : i32
    return %c0_i32, %c0_i32_0 : i32, i32
  }
  func.func @transform_3(%arg0: i32, %arg1: i32) -> (i32, i32, i32, i32) {
    %c0_i32 = arith.constant 0 : i32
    %c0_i32_0 = arith.constant 0 : i32
    %c0_i32_1 = arith.constant 0 : i32
    return %arg0, %arg1, %c0_i32, %c0_i32_0 : i32, i32, i32, i32
  }
}

module attributes {stable_mosaic.version = 11 : i64} {
  func.func @_bn_relu_kernel(%arg0: i32, %arg1: i32, %arg2: memref<1x16x16x128xf32, #tpu.memory_space<vmem>>, %arg3: memref<1x128xf32, #tpu.memory_space<vmem>>, %arg4: memref<1x128xf32, #tpu.memory_space<vmem>>, %arg5: memref<1x16x16x128xf32, #tpu.memory_space<vmem>>) attributes {dimension_semantics = [#tpu.dimension_semantics<parallel>, #tpu.dimension_semantics<parallel>], iteration_bounds = array<i64: 2, 1>, scalar_prefetch = 0 : i64, scratch_operands = 0 : i64, tpu.core_type = #tpu.core_type<tc>, window_params = [{transform_indices = @transform_0, window_bounds = array<i64: 1, 16, 16, 128>}, {pipeline_mode = #tpu.pipeline_mode<synchronous>, transform_indices = @transform_1, window_bounds = array<i64: 1, 128>}, {pipeline_mode = #tpu.pipeline_mode<synchronous>, transform_indices = @transform_2, window_bounds = array<i64: 1, 128>}, {transform_indices = @transform_3, window_bounds = array<i64: 1, 16, 16, 128>}]} {
    %c0 = arith.constant 0 : index
    %c0_0 = arith.constant 0 : index
    %c0_1 = arith.constant 0 : index
    %c0_2 = arith.constant 0 : index
    %0 = vector.load %arg2[%c0, %c0_0, %c0_1, %c0_2] : memref<1x16x16x128xf32, #tpu.memory_space<vmem>>, vector<1x16x16x128xf32>
    %c0_3 = arith.constant 0 : index
    %c0_4 = arith.constant 0 : index
    %1 = vector.load %arg3[%c0_3, %c0_4] : memref<1x128xf32, #tpu.memory_space<vmem>>, vector<1x128xf32>
    %2 = vector.shape_cast %1 : vector<1x128xf32> to vector<1x1x1x128xf32>
    %3 = vector.broadcast %2 : vector<1x1x1x128xf32> to vector<1x16x16x128xf32>
    %4 = arith.mulf %0, %3 : vector<1x16x16x128xf32>
    %c0_5 = arith.constant 0 : index
    %c0_6 = arith.constant 0 : index
    %5 = vector.load %arg4[%c0_5, %c0_6] : memref<1x128xf32, #tpu.memory_space<vmem>>, vector<1x128xf32>
    %6 = vector.shape_cast %5 : vector<1x128xf32> to vector<1x1x1x128xf32>
    %7 = vector.broadcast %6 : vector<1x1x1x128xf32> to vector<1x16x16x128xf32>
    %8 = arith.addf %4, %7 : vector<1x16x16x128xf32>
    %cst = arith.constant 0.000000e+00 : f32
    %9 = vector.broadcast %cst : f32 to vector<1x16x16x128xf32>
    %10 = arith.maximumf %8, %9 : vector<1x16x16x128xf32>
    %c0_7 = arith.constant 0 : index
    %c0_8 = arith.constant 0 : index
    %c0_9 = arith.constant 0 : index
    %c0_10 = arith.constant 0 : index
    %11 = vector.load %arg5[%c0_7, %c0_8, %c0_9, %c0_10] : memref<1x16x16x128xf32, #tpu.memory_space<vmem>>, vector<1x16x16x128xf32>
    tpu.vector_store %arg5[%c0_7, %c0_8, %c0_9, %c0_10], %10 {strides = array<i32>} : memref<1x16x16x128xf32, #tpu.memory_space<vmem>>, vector<1x16x16x128xf32>,
    return
  }
  func.func @transform_0(%arg0: i32, %arg1: i32) -> (i32, i32, i32, i32) {
    %c0_i32 = arith.constant 0 : i32
    %c0_i32_0 = arith.constant 0 : i32
    %c0_i32_1 = arith.constant 0 : i32
    return %arg0, %arg1, %c0_i32, %c0_i32_0 : i32, i32, i32, i32
  }
  func.func @transform_1(%arg0: i32, %arg1: i32) -> (i32, i32) {
    %c0_i32 = arith.constant 0 : i32
    %c0_i32_0 = arith.constant 0 : i32
    %c0_i32_1 = arith.constant 0 : i32
    return %c0_i32, %c0_i32_0 : i32, i32
  }
  func.func @transform_2(%arg0: i32, %arg1: i32) -> (i32, i32) {
    %c0_i32 = arith.constant 0 : i32
    %c0_i32_0 = arith.constant 0 : i32
    %c0_i32_1 = arith.constant 0 : i32
    return %c0_i32, %c0_i32_0 : i32, i32
  }
  func.func @transform_3(%arg0: i32, %arg1: i32) -> (i32, i32, i32, i32) {
    %c0_i32 = arith.constant 0 : i32
    %c0_i32_0 = arith.constant 0 : i32
    %c0_i32_1 = arith.constant 0 : i32
    return %arg0, %arg1, %c0_i32, %c0_i32_0 : i32, i32, i32, i32
  }
}

</mosaic_0001>

<bundles_post_ra>
// kernel: up_forward.5
= control target key start
LH: loop header
LB: loop body
LE: loop exit
PB: predicated region body
PF: predicated region fallthrough
CT: control target
= control target key end

     0   :  { %s855_s12 = smov 0   ;;  %s857_s13 = smov 0   ;;  %s1018_s0 = inlined_call_operand.vmem [shape: f32[2,16,16,128], index: 0, kind: input, shape index: {}]   ;;  %s1019_s1 = inlined_call_operand.vmem [shape: f32[1,128], index: 1, kind: input, shape index: {}]   ;;  %s1020_s2 = inlined_call_operand.vmem [shape: f32[1,128], index: 2, kind: input, shape index: {}]   ;;  %s1021_s3 = inlined_call_operand.vmem [shape: bf16[2,16,16,128], index: 3, kind: output, shape index: {}]  }
   0x1   :  { %s859_s14 = smov 0  }
   0x2 LB: > { %s25_s15 = sadd.s32 1, %s829_s13  ;;  %p617_p0 = scmp.ge.s32.totalorder %s833_s14, 1  ;;  %s833_s14 = sphi %s859_s14, %s13_s14   ;;  %s829_s13 = sphi %s857_s13, %s1023_s13   ;;  %s825_s12 = sphi %s855_s12, %s1022_s12  }
   0x3   : > { %p27_p1 = scmp.ge.s32.totalorder %s25_s15, 2  ;;  %p159_p2 = scmp.lt.s32.totalorder %s833_s14, 3 }
   0x5   : > { %s1025_s15 = smov (%p27_p1, %s25_s15), 0  ;;  %p160_p3 = pnand %p617_p0, %p159_p2 }
   0x6   : > { %p194_p4 = scmp.lt.s32.totalorder (!%p160_p3), %s825_s12, 1  ;;  %v879_v0 = vld [vmem:[%s1019_s1] ss:$0 sm:$0xff] (!%p160_p3) }
   0x7   : > { %163 = sbr.rel (%p160_p3) target bundleno = 52 (0x34), region = 32  ;;  %v889_v1 = vld [vmem:[%s1020_s2] ss:$0 sm:$0xff] (!%p160_p3) }
   0xe   : > { %s1027_s12 = smov (!%p194_p4, %s825_s12), 1 }
   0xf   : > { %s658_s16 = sshll.u32 %s1027_s12, 8  ;;  %s659_s24 = sshll.u32 %s1027_s12, 7 }
  0x10   : > { %s884_s21 = scalar_lea.vmem %s1018_s0, %s658_s16  ;;  %s921_s27 = scalar_lea.vmem %s1021_s3, %s659_s24 }
  0x11   : > { %v215_v2 = vld [vmem:[%s884_s21] sm:$0xff]  ;;  %v216_v3 = vld [vmem:[%s884_s21 + $0x8] sm:$0xff]  ;;  %v217_v4 = vld [vmem:[%s884_s21 + $0x10] sm:$0xff] }
  0x12   : > { %v254_v5 = vmul.f32 %v879_v0, %v215_v2  ;;  %v255_v6 = vmul.f32 %v879_v0, %v216_v3  ;;  %v218_v7 = vld [vmem:[%s884_s21 + $0x18] sm:$0xff]  ;;  %v256_v8 = vmul.f32 %v879_v0, %v217_v4  ;;  %v219_v9 = vld [vmem:[%s884_s21 + $0x20] sm:$0xff]  ;;  %v220_v10 = vld [vmem:[%s884_s21 + $0x28] sm:$0xff] }
  0x13   : > { %v257_v11 = vmul.f32 %v879_v0, %v218_v7  ;;  %v258_v12 = vmul.f32 %v879_v0, %v219_v9  ;;  %v259_v13 = vmul.f32 %v879_v0, %v220_v10  ;;  %v221_v14 = vld [vmem:[%s884_s21 + $0x30] sm:$0xff]  ;;  %v222_v15 = vld [vmem:[%s884_s21 + $0x38] sm:$0xff]  ;;  %v223_v24 = vld [vmem:[%s884_s21 + $0x40] sm:$0xff] }
  0x14   : > { %v293_v16 = vadd.f32 %v889_v1, %v254_v5  ;;  %v294_v17 = vadd.f32 %v889_v1, %v255_v6  ;;  %v295_v18 = vadd.f32 %v889_v1, %v256_v8  ;;  %v260_v19 = vmul.f32 %v879_v0, %v221_v14  ;;  %v224_v25 = vld [vmem:[%s884_s21 + $0x48] sm:$0xff]  ;;  %v225_v30 = vld [vmem:[%s884_s21 + $0x50] sm:$0xff]  ;;  %v226_v35 = vld [vmem:[%s884_s21 + $0x58] sm:$0xff] }
  0x15   : > { %v296_v20 = vadd.f32 %v889_v1, %v257_v11  ;;  %v297_v21 = vadd.f32 %v889_v1, %v258_v12  ;;  %v298_v22 = vadd.f32 %v889_v1, %v259_v13  ;;  %v261_v23 = vmul.f32 %v879_v0, %v222_v15  ;;  %v227_v36 = vld [vmem:[%s884_s21 + $0x60] sm:$0xff]  ;;  %v228_v41 = vld [vmem:[%s884_s21 + $0x68] sm:$0xff]  ;;  %v229_v42 = vld [vmem:[%s884_s21 + $0x70] sm:$0xff] }
  0x16   : > { %v325_v26 = vmax.f32 %v293_v16, 0.0  ;;  %v326_v27 = vmax.f32 %v294_v17, 0.0  ;;  %v327_v28 = vmax.f32 %v295_v18, 0.0  ;;  %v299_v29 = vadd.f32 %v889_v1, %v260_v19  ;;  %v230_v51 = vld [vmem:[%s884_s21 + $0x78] sm:$0xff]  ;;  %v231_v56 = vld [vmem:[%s884_s21 + $0x80] sm:$0xff]  ;;  %v232_v61 = vld [vmem:[%s884_s21 + $0x88] sm:$0xff] }
  0x17   : > { %v328_v31 = vmax.f32 %v296_v20, 0.0  ;;  %v329_v32 = vmax.f32 %v297_v21, 0.0  ;;  %v330_v33 = vmax.f32 %v298_v22, 0.0  ;;  %v300_v34 = vadd.f32 %v889_v1, %v261_v23  ;;  %v233_v4 = vld [vmem:[%s884_s21 + $0x90] sm:$0xff]  ;;  %v234_v5 = vld [vmem:[%s884_s21 + $0x98] sm:$0xff]  ;;  %v235_v10 = vld [vmem:[%s884_s21 + $0xa0] sm:$0xff] }
  0x18   : > { %v695_v37 = vpack.c.bf16 %v326_v27, %v325_v26  ;;  %v331_v38 = vmax.f32 %v299_v29, 0.0  ;;  %v262_v39 = vmul.f32 %v879_v0, %v223_v24  ;;  %v263_v40 = vmul.f32 %v879_v0, %v224_v25  ;;  %v236_v15 = vld [vmem:[%s884_s21 + $0xa8] sm:$0xff]  ;;  %v237_v20 = vld [vmem:[%s884_s21 + $0xb0] sm:$0xff]  ;;  %v238_v25 = vld [vmem:[%s884_s21 + $0xb8] sm:$0xff] }
  0x19   : > { %v700_v43 = vpack.c.bf16 %v328_v31, %v327_v28  ;;  %v705_v44 = vpack.c.bf16 %v330_v33, %v329_v32  ;;  %v332_v45 = vmax.f32 %v300_v34, 0.0  ;;  %v264_v46 = vmul.f32 %v879_v0, %v225_v30  ;;  %v239_v30 = vld [vmem:[%s884_s21 + $0xc0] sm:$0xff] }
  0x1a   : > { %696 = vst [vmem:[%s921_s27] sm:$0xff] %v695_v37   ;;  %v301_v47 = vadd.f32 %v889_v1, %v262_v39  ;;  %v302_v48 = vadd.f32 %v889_v1, %v263_v40  ;;  %v265_v49 = vmul.f32 %v879_v0, %v226_v35  ;;  %v266_v50 = vmul.f32 %v879_v0, %v227_v36  ;;  %v240_v35 = vld [vmem:[%s884_s21 + $0xc8] sm:$0xff]  ;;  %v241_v40 = vld [vmem:[%s884_s21 + $0xd0] sm:$0xff] }
  0x1b   : > { %772 = vst [vmem:[%s921_s27 + $0x8] sm:$0xff] %v700_v43   ;;  %773 = vst [vmem:[%s921_s27 + $0x10] sm:$0xff] %v705_v44   ;;  %v710_v52 = vpack.c.bf16 %v332_v45, %v331_v38  ;;  %v303_v53 = vadd.f32 %v889_v1, %v264_v46  ;;  %v267_v54 = vmul.f32 %v879_v0, %v228_v41  ;;  %v242_v41 = vld [vmem:[%s884_s21 + $0xd8] sm:$0xff]  ;;  %v243_v46 = vld [vmem:[%s884_s21 + $0xe0] sm:$0xff] }
  0x1c   : > { %v268_v55 = vmul.f32 %v879_v0, %v229_v42  ;;  %v333_v57 = vmax.f32 %v301_v47, 0.0  ;;  %v334_v58 = vmax.f32 %v302_v48, 0.0  ;;  %v304_v59 = vadd.f32 %v889_v1, %v265_v49 }
  0x1d   : > { %v305_v60 = vadd.f32 %v889_v1, %v266_v50  ;;  %774 = vst [vmem:[%s921_s27 + $0x18] sm:$0xff] %v710_v52   ;;  %v335_v62 = vmax.f32 %v303_v53, 0.0  ;;  %v306_v63 = vadd.f32 %v889_v1, %v267_v54  ;;  %v269_v2 = vmul.f32 %v879_v0, %v230_v51  ;;  %v244_v51 = vld [vmem:[%s884_s21 + $0xe8] sm:$0xff] }
  0x1e   : > { %v307_v3 = vadd.f32 %v889_v1, %v268_v55  ;;  %v715_v6 = vpack.c.bf16 %v334_v58, %v333_v57  ;;  %v336_v7 = vmax.f32 %v304_v59, 0.0  ;;  %v270_v9 = vmul.f32 %v879_v0, %v231_v56  ;;  %v245_v56 = vld [vmem:[%s884_s21 + $0xf0] sm:$0xff] }
  0x1f   : > { %v337_v8 = vmax.f32 %v305_v60, 0.0  ;;  %v338_v11 = vmax.f32 %v306_v63, 0.0  ;;  %v308_v12 = vadd.f32 %v889_v1, %v269_v2  ;;  %v271_v14 = vmul.f32 %v879_v0, %v232_v61  ;;  %v246_v61 = vld [vmem:[%s884_s21 + $0xf8] sm:$0xff] }
  0x20   : > { %v339_v13 = vmax.f32 %v307_v3, 0.0  ;;  %775 = vst [vmem:[%s921_s27 + $0x20] sm:$0xff] %v715_v6   ;;  %v720_v16 = vpack.c.bf16 %v336_v7, %v335_v62  ;;  %v309_v17 = vadd.f32 %v889_v1, %v270_v9  ;;  %v272_v18 = vmul.f32 %v879_v0, %v233_v4 }
  0x21   : > { %v273_v19 = vmul.f32 %v879_v0, %v234_v5  ;;  %v725_v21 = vpack.c.bf16 %v338_v11, %v337_v8  ;;  %v340_v22 = vmax.f32 %v308_v12, 0.0  ;;  %v310_v23 = vadd.f32 %v889_v1, %v271_v14 }
  0x22   : > { %v274_v24 = vmul.f32 %v879_v0, %v235_v10  ;;  %776 = vst [vmem:[%s921_s27 + $0x28] sm:$0xff] %v720_v16   ;;  %v341_v26 = vmax.f32 %v309_v17, 0.0  ;;  %v311_v27 = vadd.f32 %v889_v1, %v272_v18  ;;  %v275_v29 = vmul.f32 %v879_v0, %v236_v15 }
  0x23   : > { %v312_v28 = vadd.f32 %v889_v1, %v273_v19  ;;  %777 = vst [vmem:[%s921_s27 + $0x30] sm:$0xff] %v725_v21   ;;  %v730_v31 = vpack.c.bf16 %v340_v22, %v339_v13  ;;  %v342_v32 = vmax.f32 %v310_v23, 0.0  ;;  %v276_v34 = vmul.f32 %v879_v0, %v237_v20 }
  0x24   : > { %v313_v33 = vadd.f32 %v889_v1, %v274_v24  ;;  %v343_v36 = vmax.f32 %v311_v27, 0.0  ;;  %v314_v38 = vadd.f32 %v889_v1, %v275_v29  ;;  %v277_v39 = vmul.f32 %v879_v0, %v238_v25 }
  0x25   : > { %v344_v37 = vmax.f32 %v312_v28, 0.0  ;;  %778 = vst [vmem:[%s921_s27 + $0x38] sm:$0xff] %v730_v31   ;;  %v735_v42 = vpack.c.bf16 %v342_v32, %v341_v26  ;;  %v315_v44 = vadd.f32 %v889_v1, %v276_v34  ;;  %v278_v45 = vmul.f32 %v879_v0, %v239_v30 }
  0x26   : > { %v345_v43 = vmax.f32 %v313_v33, 0.0  ;;  %v346_v48 = vmax.f32 %v314_v38, 0.0  ;;  %v316_v49 = vadd.f32 %v889_v1, %v277_v39  ;;  %v279_v50 = vmul.f32 %v879_v0, %v240_v35 }
  0x27   : > { %v740_v47 = vpack.c.bf16 %v344_v37, %v343_v36  ;;  %779 = vst [vmem:[%s921_s27 + $0x40] sm:$0xff] %v735_v42   ;;  %v347_v52 = vmax.f32 %v315_v44, 0.0  ;;  %v317_v53 = vadd.f32 %v889_v1, %v278_v45  ;;  %v280_v54 = vmul.f32 %v879_v0, %v241_v40 }
  0x28   : > { %v281_v55 = vmul.f32 %v879_v0, %v242_v41  ;;  %v745_v57 = vpack.c.bf16 %v346_v48, %v345_v43  ;;  %v348_v58 = vmax.f32 %v316_v49, 0.0  ;;  %v318_v59 = vadd.f32 %v889_v1, %v279_v50 }
  0x29   : > { %780 = vst [vmem:[%s921_s27 + $0x48] sm:$0xff] %v740_v47   ;;  %v282_v60 = vmul.f32 %v879_v0, %v243_v46  ;;  %v349_v62 = vmax.f32 %v317_v53, 0.0  ;;  %v319_v63 = vadd.f32 %v889_v1, %v280_v54  ;;  %v283_v3 = vmul.f32 %v879_v0, %v244_v51 }
  0x2a   : > { %v320_v2 = vadd.f32 %v889_v1, %v281_v55  ;;  %781 = vst [vmem:[%s921_s27 + $0x50] sm:$0xff] %v745_v57   ;;  %v750_v4 = vpack.c.bf16 %v348_v58, %v347_v52  ;;  %v350_v5 = vmax.f32 %v318_v59, 0.0  ;;  %v284_v7 = vmul.f32 %v879_v0, %v245_v56 }
  0x2b   : > { %v321_v6 = vadd.f32 %v889_v1, %v282_v60  ;;  %v351_v8 = vmax.f32 %v319_v63, 0.0  ;;  %v322_v10 = vadd.f32 %v889_v1, %v283_v3  ;;  %v285_v11 = vmul.f32 %v879_v0, %v246_v61 }
  0x2c   : > { %v352_v9 = vmax.f32 %v320_v2, 0.0  ;;  %782 = vst [vmem:[%s921_s27 + $0x58] sm:$0xff] %v750_v4   ;;  %v755_v12 = vpack.c.bf16 %v350_v5, %v349_v62  ;;  %v323_v14 = vadd.f32 %v889_v1, %v284_v7 }
  0x2d   : > { %v353_v13 = vmax.f32 %v321_v6, 0.0  ;;  %v354_v16 = vmax.f32 %v322_v10, 0.0  ;;  %v324_v17 = vadd.f32 %v889_v1, %v285_v11 }
  0x2e   : > { %v760_v15 = vpack.c.bf16 %v352_v9, %v351_v8  ;;  %783 = vst [vmem:[%s921_s27 + $0x60] sm:$0xff] %v755_v12   ;;  %v355_v18 = vmax.f32 %v323_v14, 0.0 }
  0x2f   : > { %v765_v19 = vpack.c.bf16 %v354_v16, %v353_v13  ;;  %v356_v20 = vmax.f32 %v324_v17, 0.0 }
  0x30   : > { %784 = vst [vmem:[%s921_s27 + $0x68] sm:$0xff] %v760_v15  }
  0x31   : > { %785 = vst [vmem:[%s921_s27 + $0x70] sm:$0xff] %v765_v19   ;;  %v770_v21 = vpack.c.bf16 %v356_v20, %v355_v18 }
  0x33   : > { %786 = vst [vmem:[%s921_s27 + $0x78] sm:$0xff] %v770_v21  }
  0x34 PF: > { %s13_s14 = sadd.s32 1, %s833_s14   ;;  %s1022_s12 = smov %s829_s13 }
  0x35   : > { %p10_p5 = scmp.ge.s32.totalorder %s13_s14, 4   ;;  %s1023_s13 = smov %s1025_s15 }
  0x37   :  { %12 = sbr.rel (!%p10_p5) target bundleno = 2 (0x2), region = 62 }

// kernel: up_forward.7
= control target key start
LH: loop header
LB: loop body
LE: loop exit
PB: predicated region body
PF: predicated region fallthrough
CT: control target
= control target key end

     0   :  { %s568_s12 = smov 0   ;;  %s570_s13 = smov 0   ;;  %s743_s0 = inlined_call_operand.vmem [shape: f32[2,16,16,128], index: 0, kind: input, shape index: {}]   ;;  %s744_s1 = inlined_call_operand.vmem [shape: f32[1,128], index: 1, kind: input, shape index: {}]   ;;  %s745_s2 = inlined_call_operand.vmem [shape: f32[1,128], index: 2, kind: input, shape index: {}]   ;;  %s746_s3 = inlined_call_operand.vmem [shape: f32[2,16,16,128], index: 3, kind: output, shape index: {}]  }
   0x1   :  { %s572_s14 = smov 0  }
   0x2 LB: > { %s25_s15 = sadd.s32 1, %s542_s13  ;;  %p489_p0 = scmp.ge.s32.totalorder %s546_s14, 1  ;;  %s546_s14 = sphi %s572_s14, %s13_s14   ;;  %s542_s13 = sphi %s570_s13, %s748_s13   ;;  %s538_s12 = sphi %s568_s12, %s747_s12  }
   0x3   : > { %p27_p1 = scmp.ge.s32.totalorder %s25_s15, 2  ;;  %p159_p2 = scmp.lt.s32.totalorder %s546_s14, 3 }
   0x5   : > { %s750_s15 = smov (%p27_p1, %s25_s15), 0  ;;  %p160_p3 = pnand %p489_p0, %p159_p2 }
   0x6   : > { %p194_p4 = scmp.lt.s32.totalorder (!%p160_p3), %s538_s12, 1  ;;  %v589_v0 = vld [vmem:[%s744_s1] ss:$0 sm:$0xff] (!%p160_p3) }
   0x7   : > { %163 = sbr.rel (%p160_p3) target bundleno = 47 (0x2f), region = 32  ;;  %v599_v1 = vld [vmem:[%s745_s2] ss:$0 sm:$0xff] (!%p160_p3) }
   0xe   : > { %s752_s12 = smov (!%p194_p4, %s538_s12), 1 }
   0xf   : > { %s498_s16 = sshll.u32 %s752_s12, 8 }
  0x10   : > { %s594_s21 = scalar_lea.vmem %s743_s0, %s498_s16  ;;  %s622_s26 = scalar_lea.vmem %s746_s3, %s498_s16 }
  0x11   : > { %v215_v2 = vld [vmem:[%s594_s21] sm:$0xff]  ;;  %v216_v3 = vld [vmem:[%s594_s21 + $0x8] sm:$0xff]  ;;  %v217_v4 = vld [vmem:[%s594_s21 + $0x10] sm:$0xff] }
  0x12   : > { %v254_v5 = vmul.f32 %v589_v0, %v215_v2  ;;  %v255_v6 = vmul.f32 %v589_v0, %v216_v3  ;;  %v256_v7 = vmul.f32 %v589_v0, %v217_v4  ;;  %v218_v8 = vld [vmem:[%s594_s21 + $0x18] sm:$0xff]  ;;  %v219_v9 = vld [vmem:[%s594_s21 + $0x20] sm:$0xff]  ;;  %v220_v10 = vld [vmem:[%s594_s21 + $0x28] sm:$0xff] }
  0x13   : > { %v257_v11 = vmul.f32 %v589_v0, %v218_v8  ;;  %v258_v12 = vmul.f32 %v589_v0, %v219_v9  ;;  %v259_v13 = vmul.f32 %v589_v0, %v220_v10  ;;  %v221_v14 = vld [vmem:[%s594_s21 + $0x30] sm:$0xff]  ;;  %v222_v15 = vld [vmem:[%s594_s21 + $0x38] sm:$0xff]  ;;  %v223_v24 = vld [vmem:[%s594_s21 + $0x40] sm:$0xff] }
  0x14   : > { %v293_v16 = vadd.f32 %v599_v1, %v254_v5  ;;  %v294_v17 = vadd.f32 %v599_v1, %v255_v6  ;;  %v295_v18 = vadd.f32 %v599_v1, %v256_v7  ;;  %v260_v19 = vmul.f32 %v589_v0, %v221_v14  ;;  %v224_v25 = vld [vmem:[%s594_s21 + $0x48] sm:$0xff]  ;;  %v225_v26 = vld [vmem:[%s594_s21 + $0x50] sm:$0xff]  ;;  %v226_v31 = vld [vmem:[%s594_s21 + $0x58] sm:$0xff] }
  0x15   : > { %v296_v20 = vadd.f32 %v599_v1, %v257_v11  ;;  %v297_v21 = vadd.f32 %v599_v1, %v258_v12  ;;  %v298_v22 = vadd.f32 %v599_v1, %v259_v13  ;;  %v261_v23 = vmul.f32 %v589_v0, %v222_v15  ;;  %v227_v32 = vld [vmem:[%s594_s21 + $0x60] sm:$0xff]  ;;  %v228_v33 = vld [vmem:[%s594_s21 + $0x68] sm:$0xff]  ;;  %v229_v38 = vld [vmem:[%s594_s21 + $0x70] sm:$0xff] }
  0x16   : > { %v325_v27 = vmax.f32 %v293_v16, 0.0  ;;  %v326_v28 = vmax.f32 %v294_v17, 0.0  ;;  %v327_v29 = vmax.f32 %v295_v18, 0.0  ;;  %v299_v30 = vadd.f32 %v599_v1, %v260_v19  ;;  %v230_v43 = vld [vmem:[%s594_s21 + $0x78] sm:$0xff]  ;;  %v231_v56 = vld [vmem:[%s594_s21 + $0x80] sm:$0xff]  ;;  %v232_v57 = vld [vmem:[%s594_s21 + $0x88] sm:$0xff] }
  0x17   : > { %v328_v34 = vmax.f32 %v296_v20, 0.0  ;;  %v329_v35 = vmax.f32 %v297_v21, 0.0  ;;  %v330_v36 = vmax.f32 %v298_v22, 0.0  ;;  %v300_v37 = vadd.f32 %v599_v1, %v261_v23  ;;  %v233_v58 = vld [vmem:[%s594_s21 + $0x90] sm:$0xff]  ;;  %v234_v63 = vld [vmem:[%s594_s21 + $0x98] sm:$0xff]  ;;  %v235_v2 = vld [vmem:[%s594_s21 + $0xa0] sm:$0xff] }
  0x18   : > { %357 = vst [vmem:[%s622_s26] sm:$0xff] %v325_v27  ;;  %358 = vst [vmem:[%s622_s26 + $0x8] sm:$0xff] %v326_v28  ;;  %v331_v39 = vmax.f32 %v299_v30, 0.0  ;;  %v262_v40 = vmul.f32 %v589_v0, %v223_v24  ;;  %v263_v41 = vmul.f32 %v589_v0, %v224_v25  ;;  %v264_v42 = vmul.f32 %v589_v0, %v225_v26  ;;  %v236_v3 = vld [vmem:[%s594_s21 + $0xa8] sm:$0xff]  ;;  %v237_v8 = vld [vmem:[%s594_s21 + $0xb0] sm:$0xff] }
  0x19   : > { %359 = vst [vmem:[%s622_s26 + $0x10] sm:$0xff] %v327_v29  ;;  %360 = vst [vmem:[%s622_s26 + $0x18] sm:$0xff] %v328_v34  ;;  %v332_v44 = vmax.f32 %v300_v37, 0.0  ;;  %v265_v45 = vmul.f32 %v589_v0, %v226_v31  ;;  %v266_v46 = vmul.f32 %v589_v0, %v227_v32  ;;  %v267_v47 = vmul.f32 %v589_v0, %v228_v33  ;;  %v238_v13 = vld [vmem:[%s594_s21 + $0xb8] sm:$0xff]  ;;  %v239_v26 = vld [vmem:[%s594_s21 + $0xc0] sm:$0xff] }
  0x1a   : > { %361 = vst [vmem:[%s622_s26 + $0x20] sm:$0xff] %v329_v35  ;;  %362 = vst [vmem:[%s622_s26 + $0x28] sm:$0xff] %v330_v36  ;;  %v301_v48 = vadd.f32 %v599_v1, %v262_v40  ;;  %v302_v49 = vadd.f32 %v599_v1, %v263_v41  ;;  %v303_v50 = vadd.f32 %v599_v1, %v264_v42  ;;  %v240_v27 = vld [vmem:[%s594_s21 + $0xc8] sm:$0xff]  ;;  %v241_v28 = vld [vmem:[%s594_s21 + $0xd0] sm:$0xff] }
  0x1b   : > { %363 = vst [vmem:[%s622_s26 + $0x30] sm:$0xff] %v331_v39  ;;  %v268_v51 = vmul.f32 %v589_v0, %v229_v38  ;;  %364 = vst [vmem:[%s622_s26 + $0x38] sm:$0xff] %v332_v44  ;;  %v304_v52 = vadd.f32 %v599_v1, %v265_v45  ;;  %v305_v53 = vadd.f32 %v599_v1, %v266_v46  ;;  %v242_v33 = vld [vmem:[%s594_s21 + $0xd8] sm:$0xff]  ;;  %v243_v34 = vld [vmem:[%s594_s21 + $0xe0] sm:$0xff] }
  0x1c   : > { %v306_v54 = vadd.f32 %v599_v1, %v267_v47  ;;  %v269_v55 = vmul.f32 %v589_v0, %v230_v43  ;;  %v333_v59 = vmax.f32 %v301_v48, 0.0  ;;  %v334_v60 = vmax.f32 %v302_v49, 0.0  ;;  %v244_v35 = vld [vmem:[%s594_s21 + $0xe8] sm:$0xff]  ;;  %v245_v40 = vld [vmem:[%s594_s21 + $0xf0] sm:$0xff]  ;;  %v246_v45 = vld [vmem:[%s594_s21 + $0xf8] sm:$0xff] }
  0x1d   : > { %v335_v61 = vmax.f32 %v303_v50, 0.0  ;;  %v307_v62 = vadd.f32 %v599_v1, %v268_v51  ;;  %v336_v4 = vmax.f32 %v304_v52, 0.0  ;;  %v337_v5 = vmax.f32 %v305_v53, 0.0 }
  0x1e   : > { %v338_v6 = vmax.f32 %v306_v54, 0.0  ;;  %v308_v7 = vadd.f32 %v599_v1, %v269_v55  ;;  %365 = vst [vmem:[%s622_s26 + $0x40] sm:$0xff] %v333_v59  ;;  %366 = vst [vmem:[%s622_s26 + $0x48] sm:$0xff] %v334_v60  ;;  %v270_v10 = vmul.f32 %v589_v0, %v231_v56  ;;  %v271_v11 = vmul.f32 %v589_v0, %v232_v57 }
  0x1f   : > { %367 = vst [vmem:[%s622_s26 + $0x50] sm:$0xff] %v335_v61  ;;  %v339_v9 = vmax.f32 %v307_v62, 0.0  ;;  %v272_v12 = vmul.f32 %v589_v0, %v233_v58  ;;  %368 = vst [vmem:[%s622_s26 + $0x58] sm:$0xff] %v336_v4  ;;  %v273_v15 = vmul.f32 %v589_v0, %v234_v63  ;;  %v274_v16 = vmul.f32 %v589_v0, %v235_v2 }
  0x20   : > { %369 = vst [vmem:[%s622_s26 + $0x60] sm:$0xff] %v337_v5  ;;  %370 = vst [vmem:[%s622_s26 + $0x68] sm:$0xff] %v338_v6  ;;  %v340_v14 = vmax.f32 %v308_v7, 0.0  ;;  %v275_v17 = vmul.f32 %v589_v0, %v236_v3  ;;  %v309_v18 = vadd.f32 %v599_v1, %v270_v10  ;;  %v310_v19 = vadd.f32 %v599_v1, %v271_v11 }
  0x21   : > { %371 = vst [vmem:[%s622_s26 + $0x70] sm:$0xff] %v339_v9  ;;  %v311_v20 = vadd.f32 %v599_v1, %v272_v12  ;;  %v276_v21 = vmul.f32 %v589_v0, %v237_v8  ;;  %v312_v22 = vadd.f32 %v599_v1, %v273_v15  ;;  %v313_v23 = vadd.f32 %v599_v1, %v274_v16 }
  0x22   : > { %372 = vst [vmem:[%s622_s26 + $0x78] sm:$0xff] %v340_v14  ;;  %v314_v24 = vadd.f32 %v599_v1, %v275_v17  ;;  %v277_v25 = vmul.f32 %v589_v0, %v238_v13  ;;  %v341_v29 = vmax.f32 %v309_v18, 0.0  ;;  %v342_v30 = vmax.f32 %v310_v19, 0.0 }
  0x23   : > { %v343_v31 = vmax.f32 %v311_v20, 0.0  ;;  %v315_v32 = vadd.f32 %v599_v1, %v276_v21  ;;  %v344_v36 = vmax.f32 %v312_v22, 0.0  ;;  %v345_v37 = vmax.f32 %v313_v23, 0.0 }
  0x24   : > { %v346_v38 = vmax.f32 %v314_v24, 0.0  ;;  %v316_v39 = vadd.f32 %v599_v1, %v277_v25  ;;  %373 = vst [vmem:[%s622_s26 + $0x80] sm:$0xff] %v341_v29  ;;  %374 = vst [vmem:[%s622_s26 + $0x88] sm:$0xff] %v342_v30  ;;  %v278_v42 = vmul.f32 %v589_v0, %v239_v26  ;;  %v279_v43 = vmul.f32 %v589_v0, %v240_v27 }
  0x25   : > { %375 = vst [vmem:[%s622_s26 + $0x90] sm:$0xff] %v343_v31  ;;  %v347_v41 = vmax.f32 %v315_v32, 0.0  ;;  %v280_v44 = vmul.f32 %v589_v0, %v241_v28  ;;  %376 = vst [vmem:[%s622_s26 + $0x98] sm:$0xff] %v344_v36  ;;  %v281_v47 = vmul.f32 %v589_v0, %v242_v33  ;;  %v282_v48 = vmul.f32 %v589_v0, %v243_v34 }
  0x26   : > { %377 = vst [vmem:[%s622_s26 + $0xa0] sm:$0xff] %v345_v37  ;;  %378 = vst [vmem:[%s622_s26 + $0xa8] sm:$0xff] %v346_v38  ;;  %v348_v46 = vmax.f32 %v316_v39, 0.0  ;;  %v283_v49 = vmul.f32 %v589_v0, %v244_v35  ;;  %v317_v50 = vadd.f32 %v599_v1, %v278_v42  ;;  %v318_v51 = vadd.f32 %v599_v1, %v279_v43 }
  0x27   : > { %379 = vst [vmem:[%s622_s26 + $0xb0] sm:$0xff] %v347_v41  ;;  %v319_v52 = vadd.f32 %v599_v1, %v280_v44  ;;  %v284_v53 = vmul.f32 %v589_v0, %v245_v40  ;;  %v320_v54 = vadd.f32 %v599_v1, %v281_v47  ;;  %v321_v55 = vadd.f32 %v599_v1, %v282_v48 }
  0x28   : > { %380 = vst [vmem:[%s622_s26 + $0xb8] sm:$0xff] %v348_v46  ;;  %v322_v56 = vadd.f32 %v599_v1, %v283_v49  ;;  %v285_v57 = vmul.f32 %v589_v0, %v246_v45  ;;  %v349_v58 = vmax.f32 %v317_v50, 0.0  ;;  %v350_v59 = vmax.f32 %v318_v51, 0.0 }
  0x29   : > { %v351_v60 = vmax.f32 %v319_v52, 0.0  ;;  %v323_v61 = vadd.f32 %v599_v1, %v284_v53  ;;  %v352_v62 = vmax.f32 %v320_v54, 0.0  ;;  %v353_v63 = vmax.f32 %v321_v55, 0.0 }
  0x2a   : > { %v354_v2 = vmax.f32 %v322_v56, 0.0  ;;  %v324_v3 = vadd.f32 %v599_v1, %v285_v57  ;;  %381 = vst [vmem:[%s622_s26 + $0xc0] sm:$0xff] %v349_v58  ;;  %382 = vst [vmem:[%s622_s26 + $0xc8] sm:$0xff] %v350_v59 }
  0x2b   : > { %383 = vst [vmem:[%s622_s26 + $0xd0] sm:$0xff] %v351_v60  ;;  %v355_v4 = vmax.f32 %v323_v61, 0.0  ;;  %384 = vst [vmem:[%s622_s26 + $0xd8] sm:$0xff] %v352_v62 }
  0x2c   : > { %385 = vst [vmem:[%s622_s26 + $0xe0] sm:$0xff] %v353_v63  ;;  %386 = vst [vmem:[%s622_s26 + $0xe8] sm:$0xff] %v354_v2  ;;  %v356_v0 = vmax.f32 %v324_v3, 0.0 }
  0x2d   : > { %387 = vst [vmem:[%s622_s26 + $0xf0] sm:$0xff] %v355_v4 }
  0x2e   : > { %388 = vst [vmem:[%s622_s26 + $0xf8] sm:$0xff] %v356_v0 }
  0x2f PF: > { %s13_s14 = sadd.s32 1, %s546_s14   ;;  %s747_s12 = smov %s542_s13 }
  0x30   : > { %p10_p5 = scmp.ge.s32.totalorder %s13_s14, 4   ;;  %s748_s13 = smov %s750_s15 }
  0x32   :  { %12 = sbr.rel (!%p10_p5) target bundleno = 2 (0x2), region = 62 }

// kernel: up_forward.4
= control target key start
LH: loop header
LB: loop body
LE: loop exit
PB: predicated region body
PF: predicated region fallthrough
CT: control target
= control target key end

     0   :  { %s8039_s18 = smov 0   ;;  %s8041_s19 = smov 0   ;;  %s9248_s0 = inlined_call_operand.vmem [shape: bf16[2,18,18,128], index: 0, kind: input, shape index: {}]   ;;  %s9249_s1 = inlined_call_operand.vmem [shape: bf16[9,128,128], index: 1, kind: input, shape index: {}]   ;;  %s9250_s2 = inlined_call_operand.vmem [shape: f32[1,128], index: 2, kind: input, shape index: {}]   ;;  %s9251_s3 = inlined_call_operand.vmem [shape: f32[2,16,16,128], index: 3, kind: output, shape index: {0}]   ;;  %s9252_s4 = inlined_call_operand.vmem [shape: f32[2,1,1,128], index: 4, kind: output, shape index: {1}]   ;;  %s9253_s5 = inlined_call_operand.vmem [shape: f32[2,1,1,128], index: 5, kind: output, shape index: {2}]  }
   0x1   :  { %s8043_s20 = smov 0  }
   0x2 LB: > { %s28_s21 = sadd.s32 1, %s8003_s19  ;;  %p6192_p0 = scmp.ge.s32.totalorder %s8007_s20, 1  ;;  %s8007_s20 = sphi %s8043_s20, %s16_s20   ;;  %s8003_s19 = sphi %s8041_s19, %s9259_s19   ;;  %s7999_s18 = sphi %s8039_s18, %s9258_s18  }
   0x3   : > { %p30_p1 = scmp.ge.s32.totalorder %s28_s21, 2  ;;  %p214_p2 = scmp.lt.s32.totalorder %s8007_s20, 3 }
   0x5   : > { %s9261_s21 = smov (%p30_p1, %s28_s21), 0  ;;  %p215_p3 = pnand %p6192_p0, %p214_p2 }
   0x6   : > { %v7857_v0 = vld [vmem:[%s9249_s1] sm:$0xff] (!%p215_p3)   ;;  %v7859_v2 = vld [vmem:[%s9249_s1 + $0x8] sm:$0xff] (!%p215_p3)   ;;  %p261_p4 = scmp.lt.s32.totalorder (!%p215_p3), %s7999_s18, 1  ;;  %v7861_v4 = vld [vmem:[%s9249_s1 + $0x10] sm:$0xff] (!%p215_p3)   ;;  %vm724_vm0 = vsmask.f32 (!%p215_p3), 3328 }
   0x7   : > { %218 = sbr.rel (%p215_p3) target bundleno = 574 (0x23e), region = 32  ;;  %v7858_v1 = vld [vmem:[%s9249_s1 + $0x100] sm:$0xff] (!%p215_p3)   ;;  %7064 = vmatprep.subr.bf16.mxu1 (!%p215_p3), %v7857_v0  ;;  %v7860_v3 = vld [vmem:[%s9249_s1 + $0x108] sm:$0xff] (!%p215_p3)   ;;  %v7862_v5 = vld [vmem:[%s9249_s1 + $0x110] sm:$0xff] (!%p215_p3)   ;;  %vm725_vm1 = vsmask.f32 (!%p215_p3), 7440 }
   0x8   : > { %7256 = vmatprep.subr.bf16.mxu0 (!%p215_p3), %v7858_v1  ;;  %7065 = vmatpush3.bf16.msra.mxu1 (!%p215_p3), %v7857_v0  ;;  %v7863_v6 = vld [vmem:[%s9249_s1 + $0x18] sm:$0xff] (!%p215_p3)   ;;  %v7865_v8 = vld [vmem:[%s9249_s1 + $0x20] sm:$0xff] (!%p215_p3)   ;;  %v7867_v10 = vld [vmem:[%s9249_s1 + $0x28] sm:$0xff] (!%p215_p3)   ;;  %vm1593_vm3 = vcmask (!%p215_p3), 1042432   ;;  %vm1594_vm4 = vcmask (!%p215_p3), 1046532  }
   0x9   : > { %7257 = vmatpush3.bf16.msra.mxu0 (!%p215_p3), %v7858_v1  ;;  %7066 = vmatprep.subr.bf16.mxu1 (!%p215_p3), %v7859_v2  ;;  %v7864_v7 = vld [vmem:[%s9249_s1 + $0x118] sm:$0xff] (!%p215_p3)   ;;  %v7866_v9 = vld [vmem:[%s9249_s1 + $0x120] sm:$0xff] (!%p215_p3)   ;;  %v7868_v11 = vld [vmem:[%s9249_s1 + $0x128] sm:$0xff] (!%p215_p3)  }
   0xa   : > { %7258 = vmatprep.subr.bf16.mxu0 (!%p215_p3), %v7860_v3  ;;  %v7869_v18 = vld [vmem:[%s9249_s1 + $0x30] sm:$0xff] (!%p215_p3)   ;;  %v7871_v32 = vld [vmem:[%s9249_s1 + $0x38] sm:$0xff] (!%p215_p3)   ;;  %vm8119_vm2 = vmor (!%p215_p3), %vm724_vm0, %vm725_vm1 }
   0xb   : > { %v7870_v24 = vld [vmem:[%s9249_s1 + $0x130] sm:$0xff] (!%p215_p3)   ;;  %v7872_v38 = vld [vmem:[%s9249_s1 + $0x138] sm:$0xff] (!%p215_p3)   ;;  %v7875_v47 = vld [vmem:[%s9249_s1 + $0x40] sm:$0xff] (!%p215_p3)  }
   0xc   : > { %7067 = vmatpush3.bf16.msra.mxu1 (!%p215_p3), %v7859_v2  ;;  %v7876_v52 = vld [vmem:[%s9249_s1 + $0x140] sm:$0xff] (!%p215_p3)   ;;  %vm8219_vm5 = vmor (!%p215_p3), %vm1593_vm3, %vm1594_vm4 }
   0xd   : > { %7259 = vmatpush3.bf16.msra.mxu0 (!%p215_p3), %v7860_v3  ;;  %7068 = vmatprep.subr.bf16.mxu1 (!%p215_p3), %v7861_v4 }
   0xe   : > { %s9263_s18 = smov (!%p261_p4, %s7999_s18), 1  ;;  %7260 = vmatprep.subr.bf16.mxu0 %v7862_v5 }
   0xf   : > { %s7832_s13 = smul.u32 216, %s9263_s18  ;;  %s283_s7 = scalar_lea.vmem %s9252_s4, %s9263_s18 }
  0x10   : > { %7069 = vmatpush3.bf16.msra.mxu1 %v7861_v4  ;;  %s289_s10 = scalar_lea.vmem %s9253_s5, %s9263_s18 }
  0x11   : > { %7261 = vmatpush3.bf16.msra.mxu0 %v7862_v5  ;;  %7070 = vmatprep.subr.bf16.mxu1 %v7863_v6  ;;  %s8096_s26 = scalar_lea.vmem %s9248_s0, %s7832_s13 }
  0x12   : > { %7262 = vmatprep.subr.bf16.mxu0 %v7864_v7  ;;  %v7873_v12 = vld [vmem:[%s8096_s26] sm:$0xff]   ;;  %v6388_v13 = vld [vmem:[%s8096_s26 + $0xc] sm:$0xf]  ;;  %v6389_v14 = vld [vmem:[%s8096_s26 + $0x10] sm:$0xf] }
  0x13   : > { %7080 = vmatprep.mubr.bf16.mxu1 %v7873_v12  ;;  %v6390_v15 = vld [vmem:[%s8096_s26 + $0x14] sm:$0x1]  ;;  %v2594_v16 = vshrl.u32 %v6388_v13, 16  ;;  %v2597_v17 = vshll.u32 %v6388_v13, 16  ;;  %v2603_v19 = vshll.u32 %v6389_v14, 16  ;;  %v2607_v20 = vshrl.u32 %v6389_v14, 16 }
  0x14   : > { %7071 = vmatpush3.bf16.msra.mxu1 %v7863_v6  ;;  %v2613_v21 = vshll.u32 %v6390_v15, 16  ;;  %v6391_v29 = vld [vmem:[%s8096_s26 + $0x18] sm:$0xf]  ;;  %v6392_v30 = vld [vmem:[%s8096_s26 + $0x1c] sm:$0xf]  ;;  %v7874_v55 = vld [vmem:[%s8096_s26 + $0xc] sm:$0xff]  }
  0x15   : > { %7263 = vmatpush3.bf16.msra.mxu0 %v7864_v7  ;;  %7072 = vmatprep.subr.bf16.mxu1 %v7865_v8  ;;  %v2596_v22 = vrot.slane %v2594_v16, 4  ;;  %v2599_v23 = vrot.slane %v2597_v17, 5  ;;  %v2605_v25 = vrot.slane %v2603_v19, 5  ;;  %v2609_v26 = vrot.slane %v2607_v20, 4  ;;  %v6393_v31 = vld [vmem:[%s8096_s26 + $0x20] sm:$0x1] }
  0x16   : > { %7264 = vmatprep.subr.bf16.mxu0 %v7866_v9  ;;  %v2615_v27 = vrot.slane %v2613_v21, 5  ;;  %v2618_v35 = vshrl.u32 %v6391_v29, 16  ;;  %v2621_v36 = vshll.u32 %v6391_v29, 16  ;;  %v2627_v37 = vshll.u32 %v6392_v30, 16  ;;  %v6394_v53 = vld [vmem:[%s8096_s26 + $0x24] sm:$0xf] }
  0x17   : > { %v2600_v28 = vor.u32 %v2599_v23, %v2596_v22  ;;  %v2610_v34 = vor.u32 %v2609_v26, %v2605_v25  ;;  %v2631_v40 = vshrl.u32 %v6392_v30, 16  ;;  %v2637_v41 = vshll.u32 %v6393_v31, 16  ;;  %v6395_v57 = vld [vmem:[%s8096_s26 + $0x28] sm:$0xf]  ;;  %v6396_v58 = vld [vmem:[%s8096_s26 + $0x2c] sm:$0x1] }
  0x18   : > { %7073 = vmatpush3.bf16.msra.mxu1 %v7865_v8  ;;  %v2620_v43 = vrot.slane %v2618_v35, 4  ;;  %v2623_v44 = vrot.slane %v2621_v36, 5  ;;  %v2629_v45 = vrot.slane %v2627_v37, 5  ;;  %v2642_v59 = vshrl.u32 %v6394_v53, 16  ;;  %v7878_v2 = vld [vmem:[%s8096_s26 + $0x18] sm:$0xff]   ;;  %v7877_v6 = vld [vmem:[%s9249_s1 + $0x148] sm:$0xff]  }
  0x19   : > { %7265 = vmatpush3.bf16.msra.mxu0 %v7866_v9  ;;  %7074 = vmatprep.subr.bf16.mxu1 %v7867_v10  ;;  %v2601_v39 = vrot.slane %v2600_v28, 4  ;;  %v2611_v42 = vrot.slane %v2610_v34, 4  ;;  %v2633_v48 = vrot.slane %v2631_v40, 4  ;;  %v2639_v51 = vrot.slane %v2637_v41, 5  ;;  %v6397_v13 = vld [vmem:[%s8096_s26 + $0x30] sm:$0xf] }
  0x1a   : > { %7266 = vmatprep.subr.bf16.mxu0 %v7868_v11  ;;  %v2624_v50 = vor.u32 %v2623_v44, %v2620_v43  ;;  %v2645_v60 = vshll.u32 %v6394_v53, 16  ;;  %v2651_v62 = vshll.u32 %v6395_v57, 16  ;;  %v2655_v63 = vshrl.u32 %v6395_v57, 16  ;;  %v6398_v14 = vld [vmem:[%s8096_s26 + $0x34] sm:$0xf]  ;;  %v7879_v28 = vld [vmem:[%s8096_s26 + $0x24] sm:$0xff]  }
  0x1b   : > { %v2606_v46 = vsel %vm8119_vm2, %v2601_v39, %v2605_v25  ;;  %v2616_v49 = vsel %vm8119_vm2, %v2611_v42, %v2615_v27  ;;  %v2634_v56 = vor.u32 %v2633_v48, %v2629_v45  ;;  %v2661_v0 = vshll.u32 %v6396_v58, 16  ;;  %v6399_v17 = vld [vmem:[%s8096_s26 + $0x38] sm:$0x1]  ;;  %v7881_v31 = vld [vmem:[%s9249_s1 + $0x150] sm:$0xff]   ;;  %v6400_v39 = vld [vmem:[%s8096_s26 + $0x3c] sm:$0xf] }
  0x1c   : > { %7075 = vmatpush3.bf16.msra.mxu1 %v7867_v10  ;;  %v6452_v54 = vcombine.low %v2606_v46, %v2616_v49  ;;  %v2625_v61 = vrot.slane %v2624_v50, 4  ;;  %v2644_v3 = vrot.slane %v2642_v59, 4  ;;  %v2647_v4 = vrot.slane %v2645_v60, 5  ;;  %v7880_v10 = vld [vmem:[%s9249_s1 + $0x48] sm:$0xff]   ;;  %v7883_v36 = vld [vmem:[%s8096_s26 + $0x30] sm:$0xff]  }
  0x1d   : > { %7267 = vmatpush3.bf16.msra.mxu0 %v7868_v11  ;;  %7076 = vmatprep.subr.bf16.mxu1 %v7869_v18  ;;  %v2635_v1 = vrot.slane %v2634_v56, 4  ;;  %v2653_v7 = vrot.slane %v2651_v62, 5  ;;  %v2657_v8 = vrot.slane %v2655_v63, 4  ;;  %v2663_v9 = vrot.slane %v2661_v0, 5  ;;  %v6401_v40 = vld [vmem:[%s8096_s26 + $0x40] sm:$0xf] }
  0x1e   : > { %7268 = vmatprep.subr.bf16.mxu0 %v7870_v24  ;;  %7272 = vmatprep.mubr.bf16.mxu0 %v6452_v54  ;;  %v2630_v5 = vsel %vm8119_vm2, %v2625_v61, %v2629_v45  ;;  %v2648_v12 = vor.u32 %v2647_v4, %v2644_v3  ;;  %v2669_v19 = vshll.u32 %v6397_v13, 16  ;;  %v2675_v21 = vshll.u32 %v6398_v14, 16  ;;  %v6402_v41 = vld [vmem:[%s8096_s26 + $0x44] sm:$0x1]  ;;  %v7885_v54 = vld [vmem:[%s9249_s1 + $0x50] sm:$0xff]  }
  0x1f   : > { %v2640_v11 = vsel %vm8119_vm2, %v2635_v1, %v2639_v51  ;;  %v2658_v16 = vor.u32 %v2657_v8, %v2653_v7  ;;  %v2679_v22 = vshrl.u32 %v6398_v14, 16  ;;  %v2685_v23 = vshll.u32 %v6399_v17, 16  ;;  %v6403_v58 = vld [vmem:[%s8096_s26 + $0x48] sm:$0xf]  ;;  %v6404_v61 = vld [vmem:[%s8096_s26 + $0x4c] sm:$0xf] }
  0x20   : > { %7077 = vmatpush3.bf16.msra.mxu1 %v7869_v18  ;;  %v6453_v15 = vcombine.low %v2630_v5, %v2640_v11  ;;  %v2666_v18 = vshrl.u32 %v6397_v13, 16  ;;  %v2649_v20 = vrot.slane %v2648_v12, 4  ;;  %v2671_v26 = vrot.slane %v2669_v19, 5  ;;  %v6405_v62 = vld [vmem:[%s8096_s26 + $0x50] sm:$0x1]  ;;  %v7886_v8 = vld [vmem:[%s9249_s1 + $0x160] sm:$0xff]  }
  0x21   : > { %7269 = vmatpush3.bf16.msra.mxu0 %v7870_v24  ;;  %7078 = vmatprep.subr.bf16.mxu1 %v7871_v32  ;;  %v2659_v24 = vrot.slane %v2658_v16, 4  ;;  %v2677_v29 = vrot.slane %v2675_v21, 5  ;;  %v2681_v30 = vrot.slane %v2679_v22, 4  ;;  %v2687_v35 = vrot.slane %v2685_v23, 5  ;;  %v6406_v19 = vld [vmem:[%s8096_s26 + $0x54] sm:$0xf] }
  0x22   : > { %7270 = vmatprep.subr.bf16.mxu0 %v7872_v38  ;;  %v2668_v25 = vrot.slane %v2666_v18, 4  ;;  %v2654_v27 = vsel %vm8119_vm2, %v2649_v20, %v2653_v7  ;;  %v2690_v43 = vshrl.u32 %v6400_v39, 16  ;;  %v2693_v44 = vshll.u32 %v6400_v39, 16  ;;  %v7888_v18 = vld [vmem:[%s8096_s26 + $0x48] sm:$0xff]   ;;  %v6407_v20 = vld [vmem:[%s8096_s26 + $0x58] sm:$0xf] }
  0x23   : > { %v2699_v45 = vshll.u32 %v6401_v40, 16  ;;  %v2703_v48 = vshrl.u32 %v6401_v40, 16  ;;  %v2709_v49 = vshll.u32 %v6402_v41, 16  ;;  %v2714_v63 = vshrl.u32 %v6403_v58, 16  ;;  %v7887_v23 = vld [vmem:[%s9249_s1 + $0x168] sm:$0xff]   ;;  %v7889_v39 = vld [vmem:[%s8096_s26 + $0x54] sm:$0xff]  }
  0x24   : > { %7079 = vmatpush3.bf16.msra.mxu1 %v7871_v32  ;;  %v2664_v32 = vsel %vm8119_vm2, %v2659_v24, %v2663_v9  ;;  %v2672_v34 = vor.u32 %v2671_v26, %v2668_v25  ;;  %v2692_v51 = vrot.slane %v2690_v43, 4  ;;  %v2717_v0 = vshll.u32 %v6403_v58, 16  ;;  %v6408_v24 = vld [vmem:[%s8096_s26 + $0x5c] sm:$0x1]  ;;  %v6409_v43 = vld [vmem:[%s8096_s26 + $0x60] sm:$0xf] }
  0x25   : > { %7271 = vmatpush3.bf16.msra.mxu0 %v7872_v38  ;;  %7112 = vmatprep.subr.bf16.mxu1 %v7875_v47  ;;  %v6454_v37 = vcombine.low %v2654_v27, %v2664_v32  ;;  %v2682_v38 = vor.u32 %v2681_v30, %v2677_v29  ;;  %v2701_v53 = vrot.slane %v2699_v45, 5  ;;  %v2705_v56 = vrot.slane %v2703_v48, 4  ;;  %v7890_v40 = vld [vmem:[%s9249_s1 + $0x58] sm:$0xff]   ;;  %v6411_v45 = vld [vmem:[%s8096_s26 + $0x68] sm:$0x1] }
  0x26   : > { %7304 = vmatprep.subr.bf16.mxu0 %v7876_v52  ;;  %v2673_v42 = vrot.slane %v2672_v34, 4  ;;  %v2711_v57 = vrot.slane %v2709_v49, 5  ;;  %v2727_v3 = vshrl.u32 %v6404_v61, 16  ;;  %v2733_v4 = vshll.u32 %v6405_v62, 16 }
  0x27   : > { %7081 = vmatmul.mubr.bf16.vlgmr.msra.gmra.mrb[0].mxu1 %v7874_v55  ;;  %v2683_v46 = vrot.slane %v2682_v38, 4  ;;  %v2706_v1 = vor.u32 %v2705_v56, %v2701_v53  ;;  %v2719_v7 = vrot.slane %v2717_v0, 5  ;;  %v2738_v25 = vshrl.u32 %v6406_v19, 16  ;;  %v6476_v0 = vld [vmem:[%s8096_s26 + $0xc] sm:$0xe] }
  0x28   : > { %7273 = vmatmul.mubr.bf16.vlgmr.msra.gmra.mrb[0].mxu0 %v6453_v15  ;;  %7113 = vmatpush3.bf16.msra.mxu1 %v7875_v47  ;;  %v7882_v47 = vld [vmem:[%s9249_s1 + $0x158] sm:$0xff]   ;;  %v2678_v50 = vsel %vm8119_vm2, %v2673_v42, %v2677_v29  ;;  %v2729_v12 = vrot.slane %v2727_v3, 4  ;;  %v2735_v17 = vrot.slane %v2733_v4, 5  ;;  %v2741_v26 = vshll.u32 %v6406_v19, 16 }
  0x29   : > { %7305 = vmatpush3.bf16.msra.mxu0 %v7876_v52  ;;  %7084 = vmatprep.mubr.bf16.mxu1 %v7878_v2  ;;  %v2695_v52 = vrot.slane %v2693_v44, 5  ;;  %v2688_v55 = vsel %vm8119_vm2, %v2683_v46, %v2687_v35  ;;  %v2723_v2 = vshll.u32 %v6404_v61, 16  ;;  %v2707_v9 = vrot.slane %v2706_v1, 4  ;;  %v6410_v44 = vld [vmem:[%s8096_s26 + $0x64] sm:$0xf] }
  0x2a   : > { %7306 = vmatprep.subr.bf16.mxu0 %v7877_v6  ;;  %7114 = vmatprep.subr.bf16.mxu1 %v7880_v10  ;;  %v6455_v59 = vcombine.low %v2678_v50, %v2688_v55  ;;  %v2751_v29 = vshrl.u32 %v6407_v20, 16  ;;  %v2757_v30 = vshll.u32 %v6408_v24, 16  ;;  %v2740_v32 = vrot.slane %v2738_v25, 4  ;;  %v7891_v50 = vld [vmem:[%s9249_s1 + $0x170] sm:$0xff]  }
  0x2b   : > { %7276 = vmatprep.mubr.bf16.mxu0 %v6454_v37  ;;  %v2696_v60 = vor.u32 %v2695_v52, %v2692_v51  ;;  %v2725_v11 = vrot.slane %v2723_v2, 5  ;;  %v2712_v15 = vsel %vm8119_vm2, %v2707_v9, %v2711_v57  ;;  %v2743_v34 = vrot.slane %v2741_v26, 5 }
  0x2c   : > { %7115 = vmatpush3.bf16.msra.mxu1 %v7880_v10  ;;  %v7884_v10 = vld [vmem:[%s8096_s26 + $0x3c] sm:$0xff]   ;;  %v2753_v37 = vrot.slane %v2751_v29, 4  ;;  %v2759_v38 = vrot.slane %v2757_v30, 5  ;;  %v2765_v48 = vshll.u32 %v6409_v43, 16  ;;  %v2771_v49 = vshll.u32 %v6410_v44, 16 }
  0x2d   : > { %7307 = vmatpush3.bf16.msra.mxu0 %v7877_v6  ;;  %7116 = vmatprep.subr.bf16.mxu1 %v7885_v54  ;;  %v2697_v5 = vrot.slane %v2696_v60, 4  ;;  %v2716_v6 = vrot.slane %v2714_v63, 4  ;;  %v2730_v16 = vor.u32 %v2729_v12, %v2725_v11  ;;  %v2744_v42 = vor.u32 %v2743_v34, %v2740_v32  ;;  %v7892_v60 = vld [vmem:[%s9249_s1 + $0x178] sm:$0xff]   ;;  %v7893_v63 = vld [vmem:[%s8096_s26 + $0x60] sm:$0xff]   ;;  %v6483_v30 = vld [vmem:[%s8096_s26 + $0x28] sm:$0xf] }
  0x2e   : > { %7308 = vmatprep.subr.bf16.mxu0 %v7881_v31  ;;  %v2775_v52 = vshrl.u32 %v6410_v44, 16  ;;  %v2767_v56 = vrot.slane %v2765_v48, 5  ;;  %v2773_v57 = vrot.slane %v2771_v49, 5  ;;  %v6482_v29 = vld [vmem:[%s8096_s26 + $0x24] sm:$0xe] }
  0x2f   : > { %7085 = vmatmul.mubr.bf16.gmra.mrb[4].mxu1 %v7879_v28  ;;  %v2702_v13 = vsel %vm8119_vm2, %v2697_v5, %v2701_v53  ;;  %v2720_v14 = vor.u32 %v2719_v7, %v2716_v6  ;;  %v2731_v27 = vrot.slane %v2730_v16, 4  ;;  %v2747_v28 = vshll.u32 %v6407_v20, 16  ;;  %v6477_v5 = vld [vmem:[%s8096_s26 + $0x10] sm:$0xf]  ;;  %v6478_v6 = vld [vmem:[%s8096_s26 + $0x14] sm:$0x1] }
  0x30   : > { %7088 = vmatprep.mubr.bf16.mxu1 %v7883_v36  ;;  %7117 = vmatpush3.bf16.msra.mxu1 %v7885_v54  ;;  %v6456_v21 = vcombine.low %v2702_v13, %v2712_v15  ;;  %v2745_v51 = vrot.slane %v2744_v42, 4  ;;  %v2781_v53 = vshll.u32 %v6411_v45, 16  ;;  %v6524_v7 = vrot.slane %v6476_v0, 9  ;;  %v7894_v13 = vld [vmem:[%s8096_s26 + $0x6c] sm:$0xff]   ;;  %v6480_v20 = vld [vmem:[%s8096_s26 + $0x1c] sm:$0xf] }
  0x31   : > { %7309 = vmatpush3.bf16.msra.mxu0 %v7881_v31  ;;  %v2721_v22 = vrot.slane %v2720_v14, 4  ;;  %v2736_v35 = vsel %vm8119_vm2, %v2731_v27, %v2735_v17  ;;  %v2749_v36 = vrot.slane %v2747_v28, 5  ;;  %7118 = vmatprep.subr.bf16.mxu1 %v7890_v40  ;;  %v3461_v9 = vrot.slane %v6477_v5, 5  ;;  %v6479_v17 = vld [vmem:[%s8096_s26 + $0x18] sm:$0xe]  ;;  %v7897_v42 = vld [vmem:[%s8096_s26 + $0x84] sm:$0xff]  }
  0x32   : > { %7277 = vmatmul.mubr.bf16.gmra.mrb[4].mxu0 %v6455_v59  ;;  %7310 = vmatprep.subr.bf16.mxu0 %v7882_v47  ;;  %v2777_v59 = vrot.slane %v2775_v52, 4  ;;  %v2783_v3 = vrot.slane %v2781_v53, 5  ;;  %v3468_v26 = vrot.slane %v6480_v20, 5  ;;  %v6526_v34 = vrot.slane %v6482_v29, 9  ;;  %v6486_v44 = vld [vmem:[%s8096_s26 + $0x34] sm:$0xf] }
  0x33   : > { %7280 = vmatprep.mubr.bf16.mxu0 %v6456_v21  ;;  %v2726_v31 = vsel %vm8119_vm2, %v2721_v22, %v2725_v11  ;;  %v2754_v46 = vor.u32 %v2753_v37, %v2749_v36  ;;  %v2750_v58 = vsel %vm8119_vm2, %v2745_v51, %v2749_v36  ;;  %v7895_v11 = vld [vmem:[%s9249_s1 + $0x60] sm:$0xff]   ;;  %v3462_v15 = vsel %vm8219_vm5, %v6524_v7, %v3461_v9  ;;  %v6487_v45 = vld [vmem:[%s8096_s26 + $0x38] sm:$0x1]  ;;  %v7900_v52 = vld [vmem:[%s8096_s26 + $0x90] sm:$0xff]  }
  0x34   : > { %v6457_v41 = vcombine.low %v2726_v31, %v2736_v35  ;;  %7119 = vmatpush3.bf16.msra.mxu1 %v7890_v40  ;;  %v2778_v2 = vor.u32 %v2777_v59, %v2773_v57  ;;  %v3463_v16 = vrot.slane %v3461_v9, 4  ;;  %v6481_v21 = vld [vmem:[%s8096_s26 + $0x20] sm:$0x1]  ;;  %v6525_v22 = vrot.slane %v6479_v17, 9  ;;  %v6484_v31 = vld [vmem:[%s8096_s26 + $0x2c] sm:$0x1] }
  0x35   : > { %7311 = vmatpush3.bf16.msra.mxu0 %v7882_v47  ;;  %v2762_v47 = vshrl.u32 %v6409_v43, 16  ;;  %v2755_v54 = vrot.slane %v2754_v46, 4  ;;  %7120 = vmatprep.subr.bf16.mxu1 %v7895_v11  ;;  %v3471_v27 = vrot.slane %v6481_v21, 5  ;;  %v3470_v32 = vrot.slane %v3468_v26, 4  ;;  %v7899_v36 = vld [vmem:[%s9249_s1 + $0x180] sm:$0xff]  }
  0x36   : > { %7312 = vmatprep.subr.bf16.mxu0 %v7886_v8  ;;  %v2779_v12 = vrot.slane %v2778_v2, 4  ;;  %v3475_v35 = vrot.slane %v6483_v30, 5  ;;  %v3469_v37 = vsel %vm8219_vm5, %v6525_v22, %v3468_v26  ;;  %v6485_v43 = vld [vmem:[%s8096_s26 + $0x30] sm:$0xe]  ;;  %v3485_v51 = vrot.slane %v6487_v45, 5  ;;  %v7901_v5 = vld [vmem:[%s8096_s26 + $0x9c] sm:$0xff]  }
  0x37   : > { %7089 = vmatmul.mubr.bf16.gmra.mrb[8].mxu1 %v7884_v10  ;;  %v2764_v55 = vrot.slane %v2762_v47, 4  ;;  %v2760_v61 = vsel %vm8119_vm2, %v2755_v54, %v2759_v38  ;;  %v3464_v10 = vrot.slane %v6478_v6, 5  ;;  %v3478_v38 = vrot.slane %v6484_v31, 5  ;;  %v7902_v47 = vld [vmem:[%s9249_s1 + $0x70] sm:$0xff]   ;;  %v6488_v54 = vld [vmem:[%s8096_s26 + $0x3c] sm:$0xe] }
  0x38   : > { %7092 = vmatprep.mubr.bf16.mxu1 %v7888_v18  ;;  %v6458_v1 = vcombine.low %v2750_v58, %v2760_v61  ;;  %v7896_v18 = vld [vmem:[%s8096_s26 + $0x78] sm:$0xff]   ;;  %v2784_v19 = vsel %vm8119_vm2, %v2779_v12, %v2783_v3  ;;  %7121 = vmatpush3.bf16.msra.mxu1 %v7895_v11  ;;  %v3476_v40 = vsel %vm8219_vm5, %v6526_v34, %v3475_v35  ;;  %v6527_v46 = vrot.slane %v6485_v43, 9  ;;  %v6491_v61 = vld [vmem:[%s8096_s26 + $0x48] sm:$0xe]  ;;  %v6493_v2 = vld [vmem:[%s8096_s26 + $0x50] sm:$0x1] }
  0x39   : > { %7313 = vmatpush3.bf16.msra.mxu0 %v7886_v8  ;;  %v2768_v62 = vor.u32 %v2767_v56, %v2764_v55  ;;  %v3465_v25 = vsel %vm8219_vm5, %v3463_v16, %v3464_v10  ;;  %v6489_v56 = vld [vmem:[%s8096_s26 + $0x40] sm:$0xf]  ;;  %v6528_v58 = vrot.slane %v6488_v54, 9  ;;  %v6529_v6 = vrot.slane %v6491_v61, 9  ;;  %v7903_v10 = vld [vmem:[%s9249_s1 + $0x188] sm:$0xff]   ;;  %v7907_v30 = vld [vmem:[%s9249_s1 + $0x190] sm:$0xff]  }
  0x3a   : > { %7314 = vmatprep.subr.bf16.mxu0 %v7887_v23  ;;  %7281 = vmatmul.mubr.bf16.gmra.mrb[8].mxu0 %v6457_v41  ;;  %v6556_v28 = vcombine.low %v3462_v15, %v3465_v25  ;;  %v3477_v41 = vrot.slane %v3475_v35, 4  ;;  %v3489_v59 = vrot.slane %v6489_v56, 5  ;;  %v3499_v9 = vrot.slane %v6493_v2, 5  ;;  %v6495_v15 = vld [vmem:[%s8096_s26 + $0x58] sm:$0xf] }
  0x3b   : > { %v2769_v8 = vrot.slane %v2768_v62, 4  ;;  %7284 = vmatprep.mubr.bf16.mxu0 %v6458_v1  ;;  %v6492_v1 = vld [vmem:[%s8096_s26 + $0x4c] sm:$0xf]  ;;  %v6496_v17 = vld [vmem:[%s8096_s26 + $0x5c] sm:$0x1] }
  0x3c   : > { %v3479_v49 = vsel %vm8219_vm5, %v3477_v41, %v3478_v38  ;;  %v3491_v0 = vrot.slane %v3489_v59, 4  ;;  %v3490_v3 = vsel %vm8219_vm5, %v6528_v58, %v3489_v59  ;;  %v3496_v7 = vrot.slane %v6492_v1, 5  ;;  %v7906_v25 = vld [vmem:[%s9249_s1 + $0x78] sm:$0xff]   ;;  %v6497_v26 = vld [vmem:[%s8096_s26 + $0x60] sm:$0xe] }
  0x3d   : > { %7315 = vmatpush3.bf16.msra.mxu0 %v7887_v23  ;;  %v2774_v14 = vsel %vm8119_vm2, %v2769_v8, %v2773_v57  ;;  %v7898_v23 = vld [vmem:[%s9249_s1 + $0x68] sm:$0xff]   ;;  %v6558_v53 = vcombine.low %v3476_v40, %v3479_v49  ;;  %v6490_v57 = vld [vmem:[%s8096_s26 + $0x44] sm:$0x1]  ;;  %v3506_v20 = vrot.slane %v6496_v17, 5  ;;  %v6531_v29 = vrot.slane %v6497_v26, 9 }
  0x3e   : > { %7316 = vmatprep.subr.bf16.mxu0 %v7891_v50  ;;  %v6459_v24 = vcombine.low %v2774_v14, %v2784_v19  ;;  %7122 = vmatprep.subr.bf16.mxu1 %v7898_v23  ;;  %v3498_v12 = vrot.slane %v3496_v7, 4  ;;  %v6494_v14 = vld [vmem:[%s8096_s26 + $0x54] sm:$0xe]  ;;  %v3503_v19 = vrot.slane %v6495_v15, 5  ;;  %v3497_v21 = vsel %vm8219_vm5, %v6529_v6, %v3496_v7  ;;  %v676_v38 = vld [vmem:[%s8096_s26] sm:$0xf] }
  0x3f   : > { %7093 = vmatmul.mubr.bf16.gmra.mrb[12].mxu1 %v7889_v39  ;;  %v3472_v39 = vsel %vm8219_vm5, %v3470_v32, %v3471_v27  ;;  %v6498_v27 = vld [vmem:[%s8096_s26 + $0x64] sm:$0xf]  ;;  %v678_v40 = vld [vmem:[%s8096_s26 + $0x8] sm:$0x1]  ;;  %v728_v43 = vshrl.u32 %v676_v38, 16 }
  0x40   : > { %7096 = vmatprep.mubr.bf16.mxu1 %v7893_v63  ;;  %7123 = vmatpush3.bf16.msra.mxu1 %v7898_v23  ;;  %v6557_v48 = vcombine.low %v3469_v37, %v3472_v39  ;;  %v3500_v22 = vsel %vm8219_vm5, %v3498_v12, %v3499_v9  ;;  %v3510_v32 = vrot.slane %v6498_v27, 5  ;;  %v7905_v37 = vld [vmem:[%s8096_s26 + $0xb4] sm:$0xff]   ;;  %v677_v39 = vld [vmem:[%s8096_s26 + $0x4] sm:$0xf]  ;;  %v6500_v45 = vld [vmem:[%s8096_s26 + $0x6c] sm:$0xe] }
  0x41   : > { %7317 = vmatpush3.bf16.msra.mxu0 %v7891_v50  ;;  %v3482_v50 = vrot.slane %v6486_v44, 5  ;;  %7124 = vmatprep.subr.bf16.mxu1 %v7902_v47  ;;  %v6561_v35 = vcombine.low %v3497_v21, %v3500_v22  ;;  %v731_v44 = vshll.u32 %v676_v38, 16  ;;  %v747_v49 = vshll.u32 %v678_v40, 16  ;;  %v679_v61 = vld [vmem:[%s8096_s26 + $0xc] sm:$0xf]  ;;  %v7911_v9 = vld [vmem:[%s9249_s1 + $0x1a0] sm:$0xff]  }
  0x42   : > { %7318 = vmatprep.subr.bf16.mxu0 %v7892_v60  ;;  %7285 = vmatmul.mubr.bf16.gmra.mrb[12].mxu0 %v6459_v24  ;;  %v3505_v24 = vrot.slane %v3503_v19, 4  ;;  %v8311_v41 = vsel %vm8219_vm5, %v6531_v29, %v3510_v32  ;;  %v680_v2 = vld [vmem:[%s8096_s26 + $0x10] sm:$0xf]  ;;  %v752_v6 = vshrl.u32 %v679_v61, 16  ;;  %v755_v7 = vshll.u32 %v679_v61, 16 }
  0x43   : > { %7320 = vmatprep.mubr.bf16.mxu0 %v6556_v28  ;;  %v3484_v55 = vrot.slane %v3482_v50, 4  ;;  %v3483_v62 = vsel %vm8219_vm5, %v6527_v46, %v3482_v50  ;;  %v6499_v28 = vld [vmem:[%s8096_s26 + $0x68] sm:$0x1]  ;;  %v8317_v46 = vld [vmem:[%s9249_s1 + $0x80] sm:$0xff]   ;;  %v6501_v50 = vld [vmem:[%s8096_s26 + $0x70] sm:$0xf] }
  0x44   : > { %7125 = vmatpush3.bf16.msra.mxu1 %v7902_v47  ;;  %v3507_v31 = vsel %vm8219_vm5, %v3505_v24, %v3506_v20  ;;  %v3513_v34 = vrot.slane %v6499_v28, 5  ;;  %v737_v47 = vshll.u32 %v677_v39, 16  ;;  %v733_v54 = vrot.slane %v731_v44, 5  ;;  %v6504_v24 = vld [vmem:[%s8096_s26 + $0x7c] sm:$0xf] }
  0x45   : > { %7319 = vmatpush3.bf16.msra.mxu0 %v7892_v60  ;;  %v3492_v60 = vrot.slane %v6490_v57, 5  ;;  %v3486_v63 = vsel %vm8219_vm5, %v3484_v55, %v3485_v51  ;;  %7126 = vmatprep.subr.bf16.mxu1 %v7906_v25  ;;  %v6532_v51 = vrot.slane %v6500_v45, 9  ;;  %v6502_v55 = vld [vmem:[%s8096_s26 + $0x74] sm:$0x1]  ;;  %v3517_v56 = vrot.slane %v6501_v50, 5  ;;  %v7909_v57 = vld [vmem:[%s9249_s1 + $0x198] sm:$0xff]  }
  0x46   : > { %7352 = vmatprep.subr.bf16.mxu0 %v7899_v36  ;;  %v6559_v11 = vcombine.low %v3483_v62, %v3486_v63  ;;  %v739_v58 = vrot.slane %v737_v47, 5  ;;  %v3520_v1 = vrot.slane %v6502_v55, 5  ;;  %v765_v12 = vshrl.u32 %v680_v2, 16  ;;  %v6505_v27 = vld [vmem:[%s8096_s26 + $0x80] sm:$0x1] }
  0x47   : > { %7097 = vmatmul.mubr.bf16.gmra.mrb[16].mxu1 %v7894_v13  ;;  %v3493_v8 = vsel %vm8219_vm5, %v3491_v0, %v3492_v60  ;;  %v7904_v13 = vld [vmem:[%s8096_s26 + $0xa8] sm:$0xff]   ;;  %v749_v60 = vrot.slane %v747_v49, 5  ;;  %v3519_v0 = vrot.slane %v3517_v56, 4  ;;  %v757_v17 = vrot.slane %v755_v7, 5  ;;  %v683_v40 = vld [vmem:[%s8096_s26 + $0x1c] sm:$0xf] }
  0x48   : > { %7100 = vmatprep.mubr.bf16.mxu1 %v7896_v18  ;;  %v6560_v16 = vcombine.low %v3490_v3, %v3493_v8  ;;  %v6530_v18 = vrot.slane %v6494_v14, 9  ;;  %7127 = vmatpush3.bf16.msra.mxu1 %v7906_v25  ;;  %v681_v3 = vld [vmem:[%s8096_s26 + $0x14] sm:$0x1]  ;;  %v761_v8 = vshll.u32 %v680_v2, 16  ;;  %v767_v22 = vrot.slane %v765_v12, 4  ;;  %v7916_v2 = vld [vmem:[%s9249_s1 + $0x1b8] sm:$0xff]  }
  0x49   : > { %7160 = vmatprep.subr.bf16.mxu1 %v8317_v46  ;;  %v3521_v15 = vsel %vm8219_vm5, %v3519_v0, %v3520_v1  ;;  %v3524_v29 = vrot.slane %v6504_v24, 5  ;;  %v785_v45 = vshll.u32 %v683_v40, 16  ;;  %v6506_v47 = vld [vmem:[%s8096_s26 + $0x84] sm:$0xe]  ;;  %v789_v50 = vshrl.u32 %v683_v40, 16 }
  0x4a   : > { %7321 = vmatmul.mubr.bf16.vlgmr.msra.gmra.mrb[0].mxu0 %v6557_v48  ;;  %v3504_v23 = vsel %vm8219_vm5, %v6530_v18, %v3503_v19  ;;  %v741_v48 = vshrl.u32 %v677_v39, 16  ;;  %v6503_v18 = vld [vmem:[%s8096_s26 + $0x78] sm:$0xe]  ;;  %v7913_v19 = vld [vmem:[%s9249_s1 + $0x1a8] sm:$0xff]   ;;  %v763_v21 = vrot.slane %v761_v8, 5 }
  0x4b   : > { %7324 = vmatprep.mubr.bf16.mxu0 %v6558_v53  ;;  %7353 = vmatpush3.bf16.msra.mxu0 %v7899_v36  ;;  %v6562_v36 = vcombine.low %v3504_v23, %v3507_v31  ;;  %v730_v53 = vrot.slane %v728_v43, 4  ;;  %v6533_v28 = vrot.slane %v6503_v18, 9  ;;  %v3526_v39 = vrot.slane %v3524_v29, 4  ;;  %v687_v1 = vld [vmem:[%s8096_s26 + $0x2c] sm:$0x1] }
  0x4c   : > { %7354 = vmatprep.subr.bf16.mxu0 %v7903_v10  ;;  %v743_v59 = vrot.slane %v741_v48, 4 }
  0x4d   : > { %v734_v63 = vor.u32 %v733_v54, %v730_v53  ;;  %v8357_v38 = vsel %vm8219_vm5, %v6533_v28, %v3524_v29  ;;  %v6508_v53 = vld [vmem:[%s8096_s26 + $0x8c] sm:$0x1] }
  0x4e   : > { %v7910_v54 = vld [vmem:[%s9249_s1 + $0x88] sm:$0xff]   ;;  %v3534_v7 = vrot.slane %v6508_v53, 5 }
  0x4f   : > { %7101 = vmatmul.mubr.bf16.gmra.mrb[20].mxu1 %v7897_v42  ;;  %7355 = vmatpush3.bf16.msra.mxu0 %v7903_v10  ;;  %v3512_v42 = vrot.slane %v3510_v32, 4  ;;  %v735_v10 = vrot.slane %v734_v63, 4  ;;  %v768_v32 = vor.u32 %v767_v22, %v763_v21  ;;  %v791_v63 = vrot.slane %v789_v50, 4  ;;  %v6513_v50 = vld [vmem:[%s8096_s26 + $0xa0] sm:$0xf] }
  0x50   : > { %7104 = vmatprep.mubr.bf16.mxu1 %v7900_v52  ;;  %7356 = vmatprep.subr.bf16.mxu0 %v7907_v30 }
  0x51   : > { %v8322_v52 = vsel %vm8219_vm5, %v3512_v42, %v3513_v34  ;;  %v740_v20 = vsel %vm8119_vm2, %v735_v10, %v739_v58  ;;  %v3527_v34 = vrot.slane %v6505_v27, 5  ;;  %v769_v42 = vrot.slane %v768_v32, 4  ;;  %v7914_v32 = vld [vmem:[%s9249_s1 + $0x98] sm:$0xff]  }
  0x52   : > { %7325 = vmatmul.mubr.bf16.gmra.mrb[4].mxu0 %v6559_v11  ;;  %v6563_v62 = vcombine.low %v8311_v41, %v8322_v52  ;;  %v3518_v11 = vsel %vm8219_vm5, %v6532_v51, %v3517_v56  ;;  %v684_v41 = vld [vmem:[%s8096_s26 + $0x20] sm:$0x1]  ;;  %v6507_v52 = vld [vmem:[%s8096_s26 + $0x88] sm:$0xf] }
  0x53   : > { %7328 = vmatprep.mubr.bf16.mxu0 %v6560_v16  ;;  %7357 = vmatpush3.bf16.msra.mxu0 %v7907_v30  ;;  %v754_v16 = vrot.slane %v752_v6, 4  ;;  %v6564_v31 = vcombine.low %v3518_v11, %v3521_v15  ;;  %v3528_v49 = vsel %vm8219_vm5, %v3526_v39, %v3527_v34  ;;  %v795_v51 = vshll.u32 %v684_v41, 16  ;;  %v690_v39 = vld [vmem:[%s8096_s26 + $0x38] sm:$0x1] }
  0x54   : > { %7358 = vmatprep.subr.bf16.mxu0 %v7909_v57  ;;  %v6565_v56 = vcombine.low %v8357_v38, %v3528_v49  ;;  %v3531_v6 = vrot.slane %v6507_v52, 5  ;;  %v689_v38 = vld [vmem:[%s8096_s26 + $0x34] sm:$0xf] }
  0x55   : > { %v758_v26 = vor.u32 %v757_v17, %v754_v16  ;;  %v797_v0 = vrot.slane %v795_v51, 5  ;;  %v6509_v16 = vld [vmem:[%s8096_s26 + $0x90] sm:$0xe]  ;;  %v833_v49 = vshll.u32 %v689_v38, 16 }
  0x56   : > { %v7912_v17 = vld [vmem:[%s9249_s1 + $0x90] sm:$0xff]  }
  0x57   : > { %7105 = vmatmul.mubr.bf16.gmra.mrb[24].mxu1 %v7901_v5  ;;  %v744_v5 = vor.u32 %v743_v59, %v739_v58  ;;  %7359 = vmatpush3.bf16.msra.mxu0 %v7909_v57  ;;  %v685_v59 = vld [vmem:[%s8096_s26 + $0x24] sm:$0xf] }
  0x58   : > { %7108 = vmatprep.mubr.bf16.mxu1 %v7904_v13  ;;  %v771_v13 = vshll.u32 %v681_v3, 16  ;;  %7360 = vmatprep.subr.bf16.mxu0 %v7911_v9  ;;  %v803_v10 = vshll.u32 %v685_v59, 16 }
  0x59   : > { %v745_v14 = vrot.slane %v744_v5, 4  ;;  %v6534_v5 = vrot.slane %v6506_v47, 9 }
  0x5a   : > { %7329 = vmatmul.mubr.bf16.gmra.mrb[8].mxu0 %v6561_v35  ;;  %v773_v23 = vrot.slane %v771_v13, 5  ;;  %v682_v35 = vld [vmem:[%s8096_s26 + $0x18] sm:$0xf] }
  0x5b   : > { %7332 = vmatprep.mubr.bf16.mxu0 %v6562_v36  ;;  %v750_v25 = vsel %vm8119_vm2, %v745_v14, %v749_v60  ;;  %7361 = vmatpush3.bf16.msra.mxu0 %v7911_v9  ;;  %v7915_v36 = vld [vmem:[%s9249_s1 + $0x1b0] sm:$0xff]   ;;  %v776_v43 = vshrl.u32 %v682_v35, 16  ;;  %v779_v44 = vshll.u32 %v682_v35, 16  ;;  %v686_v60 = vld [vmem:[%s8096_s26 + $0x28] sm:$0xf]  ;;  %v800_v9 = vshrl.u32 %v685_v59, 16 }
  0x5c   : > { %v6236_v30 = vcombine.low %v740_v20, %v750_v25  ;;  %7362 = vmatprep.subr.bf16.mxu0 %v7913_v19  ;;  %v774_v55 = vsel %vm8119_vm2, %v769_v42, %v773_v23  ;;  %v809_v11 = vshll.u32 %v686_v60, 16  ;;  %v3532_v13 = vsel %vm8219_vm5, %v6534_v5, %v3531_v6  ;;  %v8421_v5 = vld [vmem:[%s9249_s1 + $0x1c0] sm:$0xff]  }
  0x5d   : > { %v778_v57 = vrot.slane %v776_v43, 4  ;;  %v781_v58 = vrot.slane %v779_v44, 5  ;;  %v3533_v14 = vrot.slane %v3531_v6, 4  ;;  %v813_v15 = vshrl.u32 %v686_v60, 16  ;;  %v6512_v44 = vld [vmem:[%s8096_s26 + $0x9c] sm:$0xe] }
  0x5e   : > { %v805_v20 = vrot.slane %v803_v10, 5  ;;  %v819_v25 = vshll.u32 %v687_v1, 16  ;;  %v835_v59 = vrot.slane %v833_v49, 5  ;;  %v843_v60 = vshll.u32 %v690_v39, 16 }
  0x5f   : > { %7109 = vmatmul.mubr.bf16.gmra.mrb[28].mxu1 %v7905_v37  ;;  %v759_v37 = vrot.slane %v758_v26, 4  ;;  %7363 = vmatpush3.bf16.msra.mxu0 %v7913_v19  ;;  %v782_v3 = vor.u32 %v781_v58, %v778_v57  ;;  %v802_v19 = vrot.slane %v800_v9, 4  ;;  %v3535_v23 = vsel %vm8219_vm5, %v3533_v14, %v3534_v7  ;;  %v6511_v26 = vld [vmem:[%s8096_s26 + $0x98] sm:$0x1]  ;;  %v6515_v14 = vld [vmem:[%s8096_s26 + $0xa8] sm:$0xe] }
  0x60   : > { %7128 = vmatprep.mubr.bf16.mxu1 %v6236_v30  ;;  %7364 = vmatprep.subr.bf16.mxu0 %v7915_v36  ;;  %v815_v24 = vrot.slane %v813_v15, 4  ;;  %v6566_v28 = vcombine.low %v3532_v13, %v3535_v23  ;;  %v6535_v30 = vrot.slane %v6509_v16, 9  ;;  %v3541_v41 = vrot.slane %v6511_v26, 5  ;;  %v6517_v23 = vld [vmem:[%s8096_s26 + $0xb0] sm:$0x1] }
  0x61   : > { %v764_v48 = vsel %vm8119_vm2, %v759_v37, %v763_v21  ;;  %v783_v12 = vrot.slane %v782_v3, 4  ;;  %v811_v21 = vrot.slane %v809_v11, 5  ;;  %v806_v29 = vor.u32 %v805_v20, %v802_v19  ;;  %v693_v3 = vld [vmem:[%s8096_s26 + $0x44] sm:$0x1]  ;;  %v6516_v19 = vld [vmem:[%s8096_s26 + $0xac] sm:$0xf] }
  0x62   : > { %7333 = vmatmul.mubr.bf16.gmra.mrb[12].mxu0 %v6563_v62  ;;  %v6237_v61 = vcombine.low %v764_v48, %v774_v55  ;;  %v787_v62 = vrot.slane %v785_v45, 5  ;;  %v6514_v55 = vld [vmem:[%s8096_s26 + $0xa4] sm:$0x1]  ;;  %v845_v6 = vrot.slane %v843_v60, 5  ;;  %v6536_v7 = vrot.slane %v6512_v44, 9 }
  0x63   : > { %7336 = vmatprep.mubr.bf16.mxu0 %v6564_v31  ;;  %7365 = vmatpush3.bf16.msra.mxu0 %v7915_v36  ;;  %v688_v31 = vld [vmem:[%s8096_s26 + $0x30] sm:$0xf]  ;;  %v816_v35 = vor.u32 %v815_v24, %v811_v21  ;;  %v821_v36 = vrot.slane %v819_v25, 5  ;;  %v807_v40 = vrot.slane %v806_v29, 4  ;;  %v3548_v9 = vrot.slane %v6514_v55, 5  ;;  %v7921_v24 = vld [vmem:[%s9249_s1 + $0xa8] sm:$0xff]  }
  0x64   : > { %v792_v8 = vor.u32 %v791_v63, %v787_v62  ;;  %7366 = vmatprep.subr.bf16.mxu0 %v7916_v2  ;;  %v788_v22 = vsel %vm8119_vm2, %v783_v12, %v787_v62  ;;  %v824_v42 = vshrl.u32 %v688_v31, 16  ;;  %v827_v43 = vshll.u32 %v688_v31, 16  ;;  %v692_v62 = vld [vmem:[%s8096_s26 + $0x40] sm:$0xf] }
  0x65   : > { %v817_v45 = vrot.slane %v816_v35, 4  ;;  %v812_v51 = vsel %vm8119_vm2, %v807_v40, %v811_v21  ;;  %v7925_v35 = vld [vmem:[%s9249_s1 + $0xb0] sm:$0xff]   ;;  %v3552_v39 = vrot.slane %v6516_v19, 5  ;;  %v695_v40 = vld [vmem:[%s8096_s26 + $0x4c] sm:$0xf] }
  0x66   : > { %v793_v18 = vrot.slane %v792_v8, 4  ;;  %v826_v52 = vrot.slane %v824_v42, 4  ;;  %v829_v53 = vrot.slane %v827_v43, 5  ;;  %v3545_v8 = vrot.slane %v6513_v50, 5 }
  0x67   : > { %7129 = vmatmul.mubr.bf16.vlgmr.msra.gmra.mrb[0].mxu1 %v6237_v61  ;;  %7367 = vmatpush3.bf16.msra.mxu0 %v7916_v2  ;;  %v822_v57 = vsel %vm8119_vm2, %v817_v45, %v821_v36  ;;  %v691_v61 = vld [vmem:[%s8096_s26 + $0x3c] sm:$0xf]  ;;  %v3555_v43 = vrot.slane %v6517_v23, 5  ;;  %v3554_v50 = vrot.slane %v3552_v39, 4 }
  0x68   : > { %7161 = vmatpush3.bf16.msra.mxu1 %v8317_v46  ;;  %v6510_v46 = vld [vmem:[%s8096_s26 + $0x94] sm:$0xf]  ;;  %v798_v27 = vsel %vm8119_vm2, %v793_v18, %v797_v0  ;;  %v6239_v63 = vcombine.low %v812_v51, %v822_v57  ;;  %v830_v1 = vor.u32 %v829_v53, %v826_v52  ;;  %v848_v12 = vshrl.u32 %v691_v61, 16  ;;  %7400 = vmatprep.subr.bf16.mxu0 %v8421_v5  ;;  %v6519_v52 = vld [vmem:[%s8096_s26 + $0xb8] sm:$0xf] }
  0x69   : > { %7162 = vmatprep.subr.bf16.mxu1 %v7910_v54  ;;  %v6238_v34 = vcombine.low %v788_v22, %v798_v27  ;;  %v3538_v37 = vrot.slane %v6510_v46, 5  ;;  %v851_v13 = vshll.u32 %v691_v61, 16  ;;  %v3546_v15 = vsel %vm8219_vm5, %v6536_v7, %v3545_v8  ;;  %v6520_v57 = vld [vmem:[%s8096_s26 + $0xbc] sm:$0x1] }
  0x6a   : > { %7337 = vmatmul.mubr.bf16.gmra.mrb[16].mxu0 %v6565_v56  ;;  %v7918_v56 = vld [vmem:[%s9249_s1 + $0xa0] sm:$0xff]   ;;  %v831_v10 = vrot.slane %v830_v1, 4  ;;  %v3547_v16 = vrot.slane %v3545_v8, 4  ;;  %v861_v18 = vshrl.u32 %v692_v62, 16  ;;  %v850_v46 = vrot.slane %v848_v12, 4  ;;  %v7929_v7 = vld [vmem:[%s9249_s1 + $0xb8] sm:$0xff]  }
  0x6b   : > { %7340 = vmatprep.mubr.bf16.mxu0 %v6566_v28  ;;  %7132 = vmatprep.mubr.bf16.mxu1 %v6238_v34  ;;  %v3539_v47 = vsel %vm8219_vm5, %v6535_v30, %v3538_v37  ;;  %v3540_v48 = vrot.slane %v3538_v37, 4  ;;  %v853_v22 = vrot.slane %v851_v13, 5  ;;  %v867_v28 = vshll.u32 %v693_v3, 16  ;;  %v694_v34 = vld [vmem:[%s8096_s26 + $0x48] sm:$0xf] }
  0x6c   : > { %7163 = vmatpush3.bf16.msra.mxu1 %v7910_v54  ;;  %v837_v54 = vshrl.u32 %v689_v38, 16  ;;  %v836_v20 = vsel %vm8119_vm2, %v831_v10, %v835_v59  ;;  %v3549_v25 = vsel %vm8219_vm5, %v3547_v16, %v3548_v9  ;;  %v863_v27 = vrot.slane %v861_v18, 4  ;;  %v6521_v16 = vld [vmem:[%s8096_s26 + $0xc0] sm:$0xe] }
  0x6d   : > { %7164 = vmatprep.subr.bf16.mxu1 %v7912_v17  ;;  %v3542_v58 = vsel %vm8219_vm5, %v3540_v48, %v3541_v41  ;;  %v6568_v30 = vcombine.low %v3546_v15, %v3549_v25  ;;  %v854_v31 = vor.u32 %v853_v22, %v850_v46  ;;  %v869_v38 = vrot.slane %v867_v28, 5  ;;  %v696_v41 = vld [vmem:[%s8096_s26 + $0x50] sm:$0x1]  ;;  %v6523_v25 = vld [vmem:[%s8096_s26 + $0xc8] sm:$0x1] }
  0x6e   : > { %v6567_v0 = vcombine.low %v3539_v47, %v3542_v58  ;;  %v839_v2 = vrot.slane %v837_v54, 4  ;;  %v872_v44 = vshrl.u32 %v694_v34, 16  ;;  %v875_v45 = vshll.u32 %v694_v34, 16  ;;  %v6518_v47 = vld [vmem:[%s8096_s26 + $0xb4] sm:$0xe] }
  0x6f   : > { %7133 = vmatmul.mubr.bf16.gmra.mrb[4].mxu1 %v6239_v63  ;;  %v855_v42 = vrot.slane %v854_v31, 4  ;;  %v881_v51 = vshll.u32 %v695_v40, 16  ;;  %v891_v61 = vshll.u32 %v696_v41, 16  ;;  %v698_v63 = vld [vmem:[%s8096_s26 + $0x58] sm:$0xf]  ;;  %v6538_v9 = vrot.slane %v6518_v47, 9 }
  0x70   : > { %7165 = vmatpush3.bf16.msra.mxu1 %v7912_v17  ;;  %v840_v11 = vor.u32 %v839_v2, %v835_v59  ;;  %v857_v17 = vshll.u32 %v692_v62, 16  ;;  %v874_v54 = vrot.slane %v872_v44, 4  ;;  %v877_v55 = vrot.slane %v875_v45, 5  ;;  %v697_v62 = vld [vmem:[%s8096_s26 + $0x54] sm:$0xf] }
  0x71   : > { %7166 = vmatprep.subr.bf16.mxu1 %v7914_v32  ;;  %v3556_v59 = vsel %vm8219_vm5, %v3554_v50, %v3555_v43  ;;  %v883_v60 = vrot.slane %v881_v51, 5  ;;  %v893_v8 = vrot.slane %v891_v61, 5  ;;  %v3559_v10 = vrot.slane %v6519_v52, 5  ;;  %v701_v43 = vld [vmem:[%s8096_s26 + $0x64] sm:$0xf] }
  0x72   : > { %7341 = vmatmul.mubr.bf16.gmra.mrb[20].mxu0 %v6567_v0  ;;  %v841_v21 = vrot.slane %v840_v11, 4  ;;  %v859_v26 = vrot.slane %v857_v17, 5  ;;  %v878_v2 = vor.u32 %v877_v55, %v874_v54  ;;  %v3562_v11 = vrot.slane %v6520_v57, 5  ;;  %v702_v44 = vld [vmem:[%s8096_s26 + $0x68] sm:$0x1]  ;;  %v7917_v54 = vld [vmem:[%s8096_s26 + $0x18] sm:$0xff]  }
  0x73   : > { %7344 = vmatprep.mubr.bf16.mxu0 %v6568_v30  ;;  %v899_v15 = vshll.u32 %v697_v62, 16  ;;  %v3560_v17 = vsel %vm8219_vm5, %v6538_v9, %v3559_v10  ;;  %v3561_v18 = vrot.slane %v3559_v10, 4  ;;  %v905_v19 = vshll.u32 %v698_v63, 16 }
  0x74   : > { %7167 = vmatpush3.bf16.msra.mxu1 %v7914_v32  ;;  %v846_v29 = vsel %vm8119_vm2, %v841_v21, %v845_v6  ;;  %v6537_v32 = vrot.slane %v6515_v14, 9  ;;  %v864_v37 = vor.u32 %v863_v27, %v859_v26  ;;  %v860_v53 = vsel %vm8119_vm2, %v855_v42, %v859_v26  ;;  %v699_v6 = vld [vmem:[%s8096_s26 + $0x5c] sm:$0x1]  ;;  %v6522_v21 = vld [vmem:[%s8096_s26 + $0xc4] sm:$0xf] }
  0x75   : > { %7168 = vmatprep.subr.bf16.mxu1 %v7918_v56  ;;  %v6240_v36 = vcombine.low %v836_v20, %v846_v29  ;;  %v879_v12 = vrot.slane %v878_v2, 4  ;;  %v896_v14 = vshrl.u32 %v697_v62, 16  ;;  %v909_v20 = vshrl.u32 %v698_v63, 16  ;;  %v8471_v26 = vld [vmem:[%s9249_s1 + $0xc0] sm:$0xff]  }
  0x76   : > { %v865_v48 = vrot.slane %v864_v37, 4  ;;  %v3553_v49 = vsel %vm8219_vm5, %v6537_v32, %v3552_v39  ;;  %v3563_v27 = vsel %vm8219_vm5, %v3561_v18, %v3562_v11  ;;  %v907_v28 = vrot.slane %v905_v19, 5 }
  0x77   : > { %7136 = vmatprep.mubr.bf16.mxu1 %v6240_v36  ;;  %v6569_v1 = vcombine.low %v3553_v49, %v3556_v59  ;;  %v884_v46 = vsel %vm8119_vm2, %v879_v12, %v883_v60  ;;  %v898_v23 = vrot.slane %v896_v14, 4  ;;  %v911_v29 = vrot.slane %v909_v20, 4  ;;  %v703_v59 = vld [vmem:[%s8096_s26 + $0x6c] sm:$0xf]  ;;  %v707_v20 = vld [vmem:[%s8096_s26 + $0x7c] sm:$0xf] }
  0x78   : > { %7169 = vmatpush3.bf16.msra.mxu1 %v7918_v56  ;;  %v885_v56 = vshrl.u32 %v695_v40, 16  ;;  %v870_v58 = vsel %vm8119_vm2, %v865_v48, %v869_v38  ;;  %v915_v30 = vshll.u32 %v699_v6, 16  ;;  %v6570_v32 = vcombine.low %v3560_v17, %v3563_v27  ;;  %v700_v40 = vld [vmem:[%s8096_s26 + $0x60] sm:$0xf] }
  0x79   : > { %7170 = vmatprep.subr.bf16.mxu1 %v7921_v24  ;;  %v6241_v0 = vcombine.low %v860_v53, %v870_v58  ;;  %v912_v37 = vor.u32 %v911_v29, %v907_v28  ;;  %v3566_v39 = vrot.slane %v6522_v21, 5  ;;  %v3569_v42 = vrot.slane %v6523_v25, 5 }
  0x7a   : > { %v887_v3 = vrot.slane %v885_v56, 4  ;;  %7345 = vmatmul.mubr.bf16.gmra.mrb[24].mxu0 %v6569_v1  ;;  %v917_v38 = vrot.slane %v915_v30, 5  ;;  %v920_v49 = vshrl.u32 %v700_v40, 16  ;;  %v923_v51 = vshll.u32 %v700_v40, 16  ;;  %v705_v1 = vld [vmem:[%s8096_s26 + $0x74] sm:$0x1] }
  0x7b   : > { %7137 = vmatmul.mubr.bf16.gmra.mrb[8].mxu1 %v6241_v0  ;;  %7348 = vmatprep.mubr.bf16.mxu0 %v6570_v32  ;;  %v913_v45 = vrot.slane %v912_v37, 4  ;;  %v3568_v48 = vrot.slane %v3566_v39, 4  ;;  %v929_v52 = vshll.u32 %v701_v43, 16  ;;  %v933_v53 = vshrl.u32 %v701_v43, 16  ;;  %v709_v37 = vld [vmem:[%s8096_s26 + $0x84] sm:$0xf] }
  0x7c   : > { %7171 = vmatpush3.bf16.msra.mxu1 %v7921_v24  ;;  %v888_v13 = vor.u32 %v887_v3, %v883_v60  ;;  %v901_v24 = vrot.slane %v899_v15, 5  ;;  %v922_v57 = vrot.slane %v920_v49, 4  ;;  %v939_v58 = vshll.u32 %v702_v44, 16  ;;  %v704_v60 = vld [vmem:[%s8096_s26 + $0x70] sm:$0xf]  ;;  %v7927_v43 = vld [vmem:[%s9249_s1 + $0x1c8] sm:$0xff]  }
  0x7d   : > { %7172 = vmatprep.subr.bf16.mxu1 %v7925_v35  ;;  %v918_v55 = vsel %vm8119_vm2, %v913_v45, %v917_v38  ;;  %v3570_v56 = vsel %vm8219_vm5, %v3568_v48, %v3569_v42  ;;  %v925_v63 = vrot.slane %v923_v51, 5  ;;  %v931_v0 = vrot.slane %v929_v52, 5  ;;  %v706_v15 = vld [vmem:[%s8096_s26 + $0x78] sm:$0xf]  ;;  %v710_v42 = vld [vmem:[%s8096_s26 + $0x88] sm:$0xf] }
  0x7e   : > { %v889_v22 = vrot.slane %v888_v13, 4  ;;  %v902_v34 = vor.u32 %v901_v24, %v898_v23  ;;  %v935_v2 = vrot.slane %v933_v53, 4  ;;  %v941_v3 = vrot.slane %v939_v58, 5  ;;  %v708_v23 = vld [vmem:[%s8096_s26 + $0x80] sm:$0x1]  ;;  %v7931_v58 = vld [vmem:[%s9249_s1 + $0x1d0] sm:$0xff]  }
  0x7f   : > { %v944_v6 = vshrl.u32 %v703_v59, 16  ;;  %v953_v9 = vshll.u32 %v704_v60, 16  ;;  %v957_v10 = vshrl.u32 %v704_v60, 16  ;;  %v963_v11 = vshll.u32 %v705_v1, 16  ;;  %v711_v48 = vld [vmem:[%s8096_s26 + $0x8c] sm:$0x1] }
  0x80   : > { %7173 = vmatpush3.bf16.msra.mxu1 %v7925_v35  ;;  %v894_v31 = vsel %vm8119_vm2, %v889_v22, %v893_v8  ;;  %v6539_v35 = vrot.slane %v6521_v16, 9  ;;  %v903_v41 = vrot.slane %v902_v34, 4  ;;  %v926_v8 = vor.u32 %v925_v63, %v922_v57  ;;  %v7919_v22 = vld [vmem:[%s8096_s26 + $0x24] sm:$0xff]   ;;  %v7922_v1 = vld [vmem:[%s8096_s26 + $0x3c] sm:$0xff]  }
  0x81   : > { %7174 = vmatprep.subr.bf16.mxu1 %v7929_v7  ;;  %v6242_v36 = vcombine.low %v884_v46, %v894_v31  ;;  %v936_v12 = vor.u32 %v935_v2, %v931_v0  ;;  %v946_v13 = vrot.slane %v944_v6, 4  ;;  %v955_v17 = vrot.slane %v953_v9, 5  ;;  %v712_v2 = vld [vmem:[%s8096_s26 + $0x90] sm:$0xf] }
  0x82   : > { %v3567_v47 = vsel %vm8219_vm5, %v6539_v35, %v3566_v39  ;;  %v908_v50 = vsel %vm8119_vm2, %v903_v41, %v907_v28  ;;  %v927_v16 = vrot.slane %v926_v8, 4  ;;  %v959_v18 = vrot.slane %v957_v10, 4  ;;  %v714_v8 = vld [vmem:[%s8096_s26 + $0x98] sm:$0x1] }
  0x83   : > { %7140 = vmatprep.mubr.bf16.mxu1 %v6242_v36  ;;  %v6243_v61 = vcombine.low %v908_v50, %v918_v55  ;;  %v6571_v62 = vcombine.low %v3567_v47, %v3570_v56  ;;  %v965_v19 = vrot.slane %v963_v11, 5  ;;  %v937_v21 = vrot.slane %v936_v12, 4  ;;  %v7920_v36 = vld [vmem:[%s8096_s26 + $0x30] sm:$0xff]  }
  0x84   : > { %7175 = vmatpush3.bf16.msra.mxu1 %v7929_v7  ;;  %v947_v7 = vshll.u32 %v703_v59, 16  ;;  %v968_v24 = vshrl.u32 %v706_v15, 16  ;;  %v971_v25 = vshll.u32 %v706_v15, 16  ;;  %v932_v27 = vsel %vm8119_vm2, %v927_v16, %v931_v0 }
  0x85   : > { %7208 = vmatprep.subr.bf16.mxu1 %v8471_v26  ;;  %7141 = vmatmul.mubr.bf16.gmra.mrb[12].mxu1 %v6243_v61  ;;  %v960_v28 = vor.u32 %v959_v18, %v955_v17  ;;  %v977_v29 = vshll.u32 %v707_v20, 16  ;;  %v981_v30 = vshrl.u32 %v707_v20, 16  ;;  %v942_v31 = vsel %vm8119_vm2, %v937_v21, %v941_v3 }
  0x86   : > { %7349 = vmatmul.mubr.bf16.gmra.mrb[28].mxu0 %v6571_v62  ;;  %v949_v14 = vrot.slane %v947_v7, 5  ;;  %v970_v34 = vrot.slane %v968_v24, 4  ;;  %v973_v35 = vrot.slane %v971_v25, 5  ;;  %v6244_v38 = vcombine.low %v932_v27, %v942_v31  ;;  %v713_v7 = vld [vmem:[%s8096_s26 + $0x94] sm:$0xf] }
  0x87   : > { %7368 = vmatprep.mubr.bf16.mxu0 %v7917_v54  ;;  %v961_v39 = vrot.slane %v960_v28, 4  ;;  %v979_v40 = vrot.slane %v977_v29, 5  ;;  %v983_v41 = vrot.slane %v981_v30, 4  ;;  %v987_v47 = vshll.u32 %v708_v23, 16  ;;  %v716_v27 = vld [vmem:[%s8096_s26 + $0xa0] sm:$0xf] }
  0x88   : > { %v950_v46 = vor.u32 %v949_v14, %v946_v13  ;;  %v974_v45 = vor.u32 %v973_v35, %v970_v34  ;;  %v992_v49 = vshrl.u32 %v709_v37, 16  ;;  %7144 = vmatprep.mubr.bf16.mxu1 %v6244_v38  ;;  %v995_v52 = vshll.u32 %v709_v37, 16  ;;  %v7924_v14 = vld [vmem:[%s8096_s26 + $0x48] sm:$0xff]   ;;  %v717_v28 = vld [vmem:[%s8096_s26 + $0xa4] sm:$0x1] }
  0x89   : > { %v966_v50 = vsel %vm8119_vm2, %v961_v39, %v965_v19  ;;  %v984_v51 = vor.u32 %v983_v41, %v979_v40  ;;  %v1001_v53 = vshll.u32 %v710_v42, 16  ;;  %v989_v56 = vrot.slane %v987_v47, 5  ;;  %v7935_v19 = vld [vmem:[%s9249_s1 + $0x1d8] sm:$0xff]   ;;  %v7939_v34 = vld [vmem:[%s9249_s1 + $0x1e0] sm:$0xff]  }
  0x8a   : > { %v951_v32 = vrot.slane %v950_v46, 4  ;;  %v975_v55 = vrot.slane %v974_v45, 4  ;;  %v994_v57 = vrot.slane %v992_v49, 4  ;;  %v997_v60 = vrot.slane %v995_v52, 5  ;;  %v7926_v39 = vld [vmem:[%s8096_s26 + $0x54] sm:$0xff]  }
  0x8b   : > { %v985_v59 = vrot.slane %v984_v51, 4  ;;  %v1003_v61 = vrot.slane %v1001_v53, 5  ;;  %v1005_v62 = vshrl.u32 %v710_v42, 16  ;;  %v1011_v0 = vshll.u32 %v711_v48, 16  ;;  %v718_v52 = vld [vmem:[%s8096_s26 + $0xa8] sm:$0xf] }
  0x8c   : > { %v956_v44 = vsel %vm8119_vm2, %v951_v32, %v955_v17  ;;  %v980_v63 = vsel %vm8119_vm2, %v975_v55, %v979_v40  ;;  %v998_v3 = vor.u32 %v997_v60, %v994_v57  ;;  %v1016_v9 = vshrl.u32 %v712_v2, 16  ;;  %v719_v53 = vld [vmem:[%s8096_s26 + $0xac] sm:$0xf]  ;;  %v720_v57 = vld [vmem:[%s8096_s26 + $0xb0] sm:$0x1] }
  0x8d   : > { %v6245_v54 = vcombine.low %v956_v44, %v966_v50  ;;  %v1007_v6 = vrot.slane %v1005_v62, 4  ;;  %v1013_v11 = vrot.slane %v1011_v0, 5  ;;  %v1019_v12 = vshll.u32 %v712_v2, 16  ;;  %v7928_v44 = vld [vmem:[%s8096_s26 + $0x60] sm:$0xff]  }
  0x8e   : > { %7369 = vmatmul.mubr.bf16.vlgmr.msra.gmra.mrb[0].mxu0 %v7919_v22  ;;  %v1025_v13 = vshll.u32 %v713_v7, 16  ;;  %v999_v15 = vrot.slane %v998_v3, 4  ;;  %v1018_v17 = vrot.slane %v1016_v9, 4  ;;  %v1029_v18 = vshrl.u32 %v713_v7, 16  ;;  %v715_v22 = vld [vmem:[%s8096_s26 + $0x9c] sm:$0xf] }
  0x8f   : > { %7372 = vmatprep.mubr.bf16.mxu0 %v7920_v36  ;;  %7401 = vmatpush3.bf16.msra.mxu0 %v8421_v5  ;;  %v990_v5 = vsel %vm8119_vm2, %v985_v59, %v989_v56  ;;  %v1008_v16 = vor.u32 %v1007_v6, %v1003_v61  ;;  %v1021_v20 = vrot.slane %v1019_v12, 5  ;;  %v1035_v46 = vshll.u32 %v714_v8, 16  ;;  %v721_v3 = vld [vmem:[%s8096_s26 + $0xb4] sm:$0xf]  ;;  %v722_v9 = vld [vmem:[%s8096_s26 + $0xb8] sm:$0xf] }
  0x90   : > { %7402 = vmatprep.subr.bf16.mxu0 %v7927_v43  ;;  %7145 = vmatmul.mubr.bf16.gmra.mrb[16].mxu1 %v6245_v54  ;;  %v6246_v10 = vcombine.low %v980_v63, %v990_v5  ;;  %v1027_v21 = vrot.slane %v1025_v13, 5  ;;  %v1004_v23 = vsel %vm8119_vm2, %v999_v15, %v1003_v61  ;;  %v1031_v25 = vrot.slane %v1029_v18, 4  ;;  %v7943_v63 = vld [vmem:[%s9249_s1 + $0x1e8] sm:$0xff]   ;;  %v7947_v15 = vld [vmem:[%s9249_s1 + $0x1f0] sm:$0xff]  }
  0x91   : > { %v1009_v24 = vrot.slane %v1008_v16, 4  ;;  %v1022_v29 = vor.u32 %v1021_v20, %v1018_v17  ;;  %v1037_v30 = vrot.slane %v1035_v46, 5  ;;  %v1040_v31 = vshrl.u32 %v715_v22, 16 }
  0x92   : > { %7148 = vmatprep.mubr.bf16.mxu1 %v6246_v10  ;;  %v1043_v32 = vshll.u32 %v715_v22, 16  ;;  %v1032_v36 = vor.u32 %v1031_v25, %v1027_v21  ;;  %v1049_v37 = vshll.u32 %v716_v27, 16  ;;  %v1053_v38 = vshrl.u32 %v716_v27, 16  ;;  %v723_v10 = vld [vmem:[%s8096_s26 + $0xbc] sm:$0x1] }
  0x93   : > { %7403 = vmatpush3.bf16.msra.mxu0 %v7927_v43  ;;  %v1014_v35 = vsel %vm8119_vm2, %v1009_v24, %v1013_v11  ;;  %v1023_v41 = vrot.slane %v1022_v29, 4  ;;  %v1042_v42 = vrot.slane %v1040_v31, 4  ;;  %v1059_v49 = vshll.u32 %v717_v28, 16  ;;  %v7932_v28 = vld [vmem:[%s8096_s26 + $0x78] sm:$0xff]  }
  0x94   : > { %7404 = vmatprep.subr.bf16.mxu0 %v7931_v58  ;;  %v6247_v40 = vcombine.low %v1004_v23, %v1014_v35  ;;  %v1045_v43 = vrot.slane %v1043_v32, 5  ;;  %v1033_v45 = vrot.slane %v1032_v36, 4  ;;  %v1051_v47 = vrot.slane %v1049_v37, 5  ;;  %v7930_v23 = vld [vmem:[%s8096_s26 + $0x6c] sm:$0xff]   ;;  %v7948_v32 = vld [vmem:[%s9249_s1 + $0x1f8] sm:$0xff]  }
  0x95   : > { %v1055_v48 = vrot.slane %v1053_v38, 4  ;;  %v1028_v50 = vsel %vm8119_vm2, %v1023_v41, %v1027_v21  ;;  %v1061_v56 = vrot.slane %v1059_v49, 5  ;;  %v1067_v61 = vshll.u32 %v718_v52, 16  ;;  %v1497_v36 = vld [vmem:[%s8096_s26] sm:$0xe] }
  0x96   : > { %7373 = vmatmul.mubr.bf16.gmra.mrb[4].mxu0 %v7922_v1  ;;  %v1046_v51 = vor.u32 %v1045_v43, %v1042_v42  ;;  %v1038_v54 = vsel %vm8119_vm2, %v1033_v45, %v1037_v30  ;;  %v1073_v62 = vshll.u32 %v719_v53, 16  ;;  %v1077_v2 = vshrl.u32 %v719_v53, 16  ;;  %v1498_v37 = vld [vmem:[%s8096_s26 + $0x4] sm:$0xf]  ;;  %v1499_v38 = vld [vmem:[%s8096_s26 + $0x8] sm:$0x1] }
  0x97   : > { %7376 = vmatprep.mubr.bf16.mxu0 %v7924_v14  ;;  %7405 = vmatpush3.bf16.msra.mxu0 %v7931_v58  ;;  %v1056_v55 = vor.u32 %v1055_v48, %v1051_v47  ;;  %v1064_v58 = vshrl.u32 %v718_v52, 16  ;;  %v6248_v59 = vcombine.low %v1028_v50, %v1038_v54  ;;  %v1083_v5 = vshll.u32 %v720_v57, 16  ;;  %v1501_v48 = vld [vmem:[%s8096_s26 + $0x10] sm:$0xf]  ;;  %v1502_v52 = vld [vmem:[%s8096_s26 + $0x14] sm:$0x1] }
  0x98   : > { %7406 = vmatprep.subr.bf16.mxu0 %v7935_v19  ;;  %7149 = vmatmul.mubr.bf16.gmra.mrb[20].mxu1 %v6247_v40  ;;  %v1047_v60 = vrot.slane %v1046_v51, 4  ;;  %v1069_v7 = vrot.slane %v1067_v61, 5  ;;  %v1075_v8 = vrot.slane %v1073_v62, 5  ;;  %v1079_v12 = vrot.slane %v1077_v2, 4  ;;  %v7934_v54 = vld [vmem:[%s8096_s26 + $0x84] sm:$0xff]  }
  0x99   : > { %v1057_v0 = vrot.slane %v1056_v55, 4  ;;  %v1066_v1 = vrot.slane %v1064_v58, 4  ;;  %7152 = vmatprep.mubr.bf16.mxu1 %v6248_v59  ;;  %v1085_v13 = vrot.slane %v1083_v5, 5  ;;  %v1088_v14 = vshrl.u32 %v721_v3, 16  ;;  %v8581_v55 = vld [vmem:[%s9249_s1 + $0x200] sm:$0xff]  }
  0x9a   : > { %v1052_v6 = vsel %vm8119_vm2, %v1047_v60, %v1051_v47  ;;  %v1091_v18 = vshll.u32 %v721_v3, 16  ;;  %v1080_v20 = vor.u32 %v1079_v12, %v1075_v8  ;;  %v1101_v46 = vshrl.u32 %v722_v9, 16  ;;  %v1500_v47 = vld [vmem:[%s8096_s26 + $0xc] sm:$0xe]  ;;  %v1504_v2 = vld [vmem:[%s8096_s26 + $0x1c] sm:$0xf] }
  0x9b   : > { %7407 = vmatpush3.bf16.msra.mxu0 %v7935_v19  ;;  %v1062_v11 = vsel %vm8119_vm2, %v1057_v0, %v1061_v56  ;;  %v1070_v17 = vor.u32 %v1069_v7, %v1066_v1  ;;  %v1097_v19 = vshll.u32 %v722_v9, 16  ;;  %v1090_v21 = vrot.slane %v1088_v14, 4  ;;  %v1503_v0 = vld [vmem:[%s8096_s26 + $0x18] sm:$0xe]  ;;  %v7936_v1 = vld [vmem:[%s8096_s26 + $0x90] sm:$0xff]  }
  0x9c   : > { %7408 = vmatprep.subr.bf16.mxu0 %v7939_v34  ;;  %v6249_v16 = vcombine.low %v1052_v6, %v1062_v11  ;;  %v1107_v22 = vshll.u32 %v723_v10, 16  ;;  %v1093_v25 = vrot.slane %v1091_v18, 5  ;;  %v1081_v29 = vrot.slane %v1080_v20, 4  ;;  %v1505_v5 = vld [vmem:[%s8096_s26 + $0x20] sm:$0x1] }
  0x9d   : > { %v1071_v24 = vrot.slane %v1070_v17, 4  ;;  %v1099_v27 = vrot.slane %v1097_v19, 5  ;;  %v1103_v30 = vrot.slane %v1101_v46, 4  ;;  %v6260_v41 = vrot.slane %v1497_v36, 9  ;;  %v1506_v10 = vld [vmem:[%s8096_s26 + $0x24] sm:$0xe] }
  0x9e   : > { %7377 = vmatmul.mubr.bf16.gmra.mrb[8].mxu0 %v7926_v39  ;;  %v1109_v31 = vrot.slane %v1107_v22, 5  ;;  %v1094_v35 = vor.u32 %v1093_v25, %v1090_v21  ;;  %v1086_v39 = vsel %vm8119_vm2, %v1081_v29, %v1085_v13  ;;  %v1598_v42 = vrot.slane %v1498_v37, 5  ;;  %v1507_v11 = vld [vmem:[%s8096_s26 + $0x28] sm:$0xf]  ;;  %v1508_v12 = vld [vmem:[%s8096_s26 + $0x2c] sm:$0x1] }
  0x9f   : > { %7380 = vmatprep.mubr.bf16.mxu0 %v7928_v44  ;;  %7409 = vmatpush3.bf16.msra.mxu0 %v7939_v34  ;;  %v1076_v34 = vsel %vm8119_vm2, %v1071_v24, %v1075_v8  ;;  %v1104_v40 = vor.u32 %v1103_v30, %v1099_v27  ;;  %v1601_v45 = vrot.slane %v1499_v38, 5  ;;  %v6261_v53 = vrot.slane %v1500_v47, 9  ;;  %v7937_v21 = vld [vmem:[%s9249_s1 + $0xc8] sm:$0xff]   ;;  %v7938_v46 = vld [vmem:[%s8096_s26 + $0x9c] sm:$0xff]   ;;  %v1510_v24 = vld [vmem:[%s8096_s26 + $0x34] sm:$0xf] }
  0xa0   : > { %7410 = vmatprep.subr.bf16.mxu0 %v7943_v63  ;;  %7153 = vmatmul.mubr.bf16.gmra.mrb[24].mxu1 %v6249_v16  ;;  %v6250_v43 = vcombine.low %v1076_v34, %v1086_v39  ;;  %v1095_v44 = vrot.slane %v1094_v35, 4  ;;  %v1599_v50 = vsel %vm8219_vm5, %v6260_v41, %v1598_v42  ;;  %v1600_v51 = vrot.slane %v1598_v42, 4  ;;  %v1511_v25 = vld [vmem:[%s8096_s26 + $0x38] sm:$0x1]  ;;  %v7940_v30 = vld [vmem:[%s8096_s26 + $0xa8] sm:$0xff]   ;;  %v7941_v39 = vld [vmem:[%s9249_s1 + $0xd0] sm:$0xff]  }
  0xa1   : > { %v1105_v49 = vrot.slane %v1104_v40, 4  ;;  %v1605_v57 = vrot.slane %v1501_v48, 5  ;;  %v1608_v58 = vrot.slane %v1502_v52, 5  ;;  %v6262_v3 = vrot.slane %v1503_v0, 9  ;;  %v1513_v34 = vld [vmem:[%s8096_s26 + $0x40] sm:$0xf] }
  0xa2   : > { %7156 = vmatprep.mubr.bf16.mxu1 %v6250_v43  ;;  %v1100_v56 = vsel %vm8119_vm2, %v1095_v44, %v1099_v27  ;;  %v1602_v60 = vsel %vm8219_vm5, %v1600_v51, %v1601_v45  ;;  %v1612_v6 = vrot.slane %v1504_v2, 5  ;;  %v1615_v7 = vrot.slane %v1505_v5, 5  ;;  %v1514_v35 = vld [vmem:[%s8096_s26 + $0x44] sm:$0x1]  ;;  %v1515_v43 = vld [vmem:[%s8096_s26 + $0x48] sm:$0xe] }
  0xa3   : > { %7411 = vmatpush3.bf16.msra.mxu0 %v7943_v63  ;;  %v1110_v59 = vsel %vm8119_vm2, %v1105_v49, %v1109_v31  ;;  %v6292_v62 = vcombine.low %v1599_v50, %v1602_v60  ;;  %v1607_v63 = vrot.slane %v1605_v57, 4  ;;  %v1606_v8 = vsel %vm8219_vm5, %v6261_v53, %v1605_v57  ;;  %v1512_v31 = vld [vmem:[%s8096_s26 + $0x3c] sm:$0xe]  ;;  %v7942_v47 = vld [vmem:[%s8096_s26 + $0xb4] sm:$0xff]   ;;  %v1516_v48 = vld [vmem:[%s8096_s26 + $0x4c] sm:$0xf] }
  0xa4   : > { %7412 = vmatprep.subr.bf16.mxu0 %v7947_v15  ;;  %v6251_v61 = vcombine.low %v1100_v56, %v1110_v59  ;;  %v1613_v13 = vsel %vm8219_vm5, %v6262_v3, %v1612_v6  ;;  %v1614_v14 = vrot.slane %v1612_v6, 4  ;;  %v6263_v16 = vrot.slane %v1506_v10, 9  ;;  %v1517_v49 = vld [vmem:[%s8096_s26 + $0x50] sm:$0x1]  ;;  %v7945_v51 = vld [vmem:[%s9249_s1 + $0xd8] sm:$0xff]   ;;  %v7944_v60 = vld [vmem:[%s8096_s26 + $0xc0] sm:$0xff]  }
  0xa5   : > { %v1609_v9 = vsel %vm8219_vm5, %v1607_v63, %v1608_v58  ;;  %v1622_v20 = vrot.slane %v1508_v12, 5  ;;  %v1629_v29 = vrot.slane %v1511_v25, 5  ;;  %v1633_v38 = vrot.slane %v1513_v34, 5  ;;  %v1518_v56 = vld [vmem:[%s8096_s26 + $0x54] sm:$0xe]  ;;  %v7946_v12 = vld [vmem:[%s8096_s26 + $0xcc] sm:$0xff]  }
  0xa6   : > { %7381 = vmatmul.mubr.bf16.gmra.mrb[12].mxu0 %v7930_v23  ;;  %v6293_v17 = vcombine.low %v1606_v8, %v1609_v9  ;;  %v1616_v18 = vsel %vm8219_vm5, %v1614_v14, %v1615_v7  ;;  %v1509_v23 = vld [vmem:[%s8096_s26 + $0x30] sm:$0xe]  ;;  %v6265_v41 = vrot.slane %v1512_v31, 9  ;;  %v1636_v42 = vrot.slane %v1514_v35, 5  ;;  %v1519_v57 = vld [vmem:[%s8096_s26 + $0x58] sm:$0xf] }
  0xa7   : > { %7384 = vmatprep.mubr.bf16.mxu0 %v7932_v28  ;;  %7413 = vmatpush3.bf16.msra.mxu0 %v7947_v15  ;;  %v1619_v15 = vrot.slane %v1507_v11, 5  ;;  %v6294_v22 = vcombine.low %v1613_v13, %v1616_v18  ;;  %v6264_v27 = vrot.slane %v1509_v23, 9  ;;  %v1626_v28 = vrot.slane %v1510_v24, 5  ;;  %v1520_v58 = vld [vmem:[%s8096_s26 + $0x5c] sm:$0x1] }
  0xa8   : > { %7414 = vmatprep.subr.bf16.mxu0 %v7948_v32  ;;  %7157 = vmatmul.mubr.bf16.gmra.mrb[28].mxu1 %v6251_v61  ;;  %v1635_v45 = vrot.slane %v1633_v38, 4  ;;  %v6266_v50 = vrot.slane %v1515_v43, 9  ;;  %v1640_v53 = vrot.slane %v1516_v48, 5  ;;  %v1647_v61 = vrot.slane %v1519_v57, 5  ;;  %v1521_v8 = vld [vmem:[%s8096_s26 + $0x60] sm:$0xe] }
  0xa9   : > { %7176 = vmatprep.mubr.bf16.mxu1 %v6292_v62  ;;  %v1621_v19 = vrot.slane %v1619_v15, 4  ;;  %v1620_v36 = vsel %vm8219_vm5, %v6263_v16, %v1619_v15  ;;  %v1634_v62 = vsel %vm8219_vm5, %v6265_v41, %v1633_v38  ;;  %v6267_v0 = vrot.slane %v1518_v56, 9  ;;  %v1522_v9 = vld [vmem:[%s8096_s26 + $0x64] sm:$0xf]  ;;  %v1523_v10 = vld [vmem:[%s8096_s26 + $0x68] sm:$0x1] }
  0xaa   : > { %v1642_v59 = vrot.slane %v1640_v53, 4  ;;  %v1637_v63 = vsel %vm8219_vm5, %v1635_v45, %v1636_v42  ;;  %v1649_v2 = vrot.slane %v1647_v61, 4  ;;  %v1650_v5 = vrot.slane %v1520_v58, 5  ;;  %v6652_v16 = vld [vmem:[%s8096_s26 + $0x18] sm:$0xf]  ;;  %v7952_v43 = vld [vmem:[%s9249_s1 + $0xf0] sm:$0xff]  }
  0xab   : > { %7415 = vmatpush3.bf16.msra.mxu0 %v7948_v32  ;;  %v1628_v32 = vrot.slane %v1626_v28, 4  ;;  %v1623_v37 = vsel %vm8219_vm5, %v1621_v19, %v1622_v20  ;;  %v1641_v3 = vsel %vm8219_vm5, %v6266_v50, %v1640_v53  ;;  %v6297_v7 = vcombine.low %v1634_v62, %v1637_v63  ;;  %v6653_v19 = vld [vmem:[%s8096_s26 + $0x1c] sm:$0xf]  ;;  %v6654_v20 = vld [vmem:[%s8096_s26 + $0x20] sm:$0x1] }
  0xac   : > { %7448 = vmatprep.subr.bf16.mxu0 %v8581_v55  ;;  %v6295_v44 = vcombine.low %v1620_v36, %v1623_v37  ;;  %v8655_v11 = vsel %vm8219_vm5, %v6267_v0, %v1647_v61  ;;  %v6268_v13 = vrot.slane %v1521_v8, 9  ;;  %v1654_v14 = vrot.slane %v1522_v9, 5  ;;  %v1526_v38 = vld [vmem:[%s8096_s26 + $0x74] sm:$0x1]  ;;  %v6656_v50 = vld [vmem:[%s8096_s26 + $0x28] sm:$0xf] }
  0xad   : > { %v1630_v40 = vsel %vm8219_vm5, %v1628_v32, %v1629_v29  ;;  %v1657_v15 = vrot.slane %v1523_v10, 5  ;;  %v8661_v18 = vsel %vm8219_vm5, %v1649_v2, %v1650_v5  ;;  %v4466_v24 = vshll.u32 %v6653_v19, 16  ;;  %v1525_v32 = vld [vmem:[%s8096_s26 + $0x70] sm:$0xf]  ;;  %v1527_v61 = vld [vmem:[%s8096_s26 + $0x78] sm:$0xe] }
  0xae   : > { %7385 = vmatmul.mubr.bf16.gmra.mrb[16].mxu0 %v7934_v54  ;;  %v1643_v54 = vrot.slane %v1517_v49, 5  ;;  %v1656_v23 = vrot.slane %v1654_v14, 4  ;;  %v4470_v25 = vshrl.u32 %v6653_v19, 16  ;;  %v4476_v31 = vshll.u32 %v6654_v20, 16  ;;  %v6655_v49 = vld [vmem:[%s8096_s26 + $0x24] sm:$0xf] }
  0xaf   : > { %7388 = vmatprep.mubr.bf16.mxu0 %v7936_v1  ;;  %v7949_v1 = vld [vmem:[%s9249_s1 + $0xe0] sm:$0xff]   ;;  %v4468_v36 = vrot.slane %v4466_v24, 5  ;;  %v1664_v42 = vrot.slane %v1526_v38, 5  ;;  %v4481_v53 = vshrl.u32 %v6655_v49, 16  ;;  %v4490_v56 = vshll.u32 %v6656_v50, 16  ;;  %v7954_v10 = vld [vmem:[%s9249_s1 + $0xf8] sm:$0xff]  }
  0xb0   : > { %7177 = vmatmul.mubr.bf16.vlgmr.msra.gmra.mrb[0].mxu1 %v6293_v17  ;;  %v1644_v6 = vsel %vm8219_vm5, %v1642_v59, %v1643_v54  ;;  %v1658_v35 = vsel %vm8219_vm5, %v1656_v23, %v1657_v15  ;;  %v4472_v37 = vrot.slane %v4470_v25, 4  ;;  %v4478_v45 = vrot.slane %v4476_v31, 5  ;;  %v1528_v2 = vld [vmem:[%s8096_s26 + $0x7c] sm:$0xf]  ;;  %v1529_v5 = vld [vmem:[%s8096_s26 + $0x80] sm:$0x1] }
  0xb1   : > { %7209 = vmatpush3.bf16.msra.mxu1 %v8471_v26  ;;  %7180 = vmatprep.mubr.bf16.mxu1 %v6294_v22  ;;  %v1627_v26 = vsel %vm8219_vm5, %v6264_v27, %v1626_v28  ;;  %v6298_v17 = vcombine.low %v1641_v3, %v1644_v6  ;;  %v8667_v22 = vsel %vm8219_vm5, %v6268_v13, %v1654_v14  ;;  %v1524_v27 = vld [vmem:[%s8096_s26 + $0x6c] sm:$0xe]  ;;  %v4484_v54 = vshll.u32 %v6655_v49, 16  ;;  %v6658_v9 = vld [vmem:[%s8096_s26 + $0x30] sm:$0xf] }
  0xb2   : > { %7210 = vmatprep.subr.bf16.mxu1 %v7937_v21  ;;  %v6296_v52 = vcombine.low %v1627_v26, %v1630_v40  ;;  %v7950_v28 = vld [vmem:[%s9249_s1 + $0xe8] sm:$0xff]   ;;  %v6269_v34 = vrot.slane %v1524_v27, 9  ;;  %v6299_v26 = vcombine.low %v8655_v11, %v8661_v18  ;;  %v6300_v40 = vcombine.low %v8667_v22, %v1658_v35  ;;  %v6659_v15 = vld [vmem:[%s8096_s26 + $0x34] sm:$0xf] }
  0xb3   : > { %v4494_v59 = vshrl.u32 %v6656_v50, 16  ;;  %v4483_v0 = vrot.slane %v4481_v53, 4  ;;  %v4492_v6 = vrot.slane %v4490_v56, 5  ;;  %v6270_v13 = vrot.slane %v1527_v61, 9  ;;  %v1531_v25 = vld [vmem:[%s8096_s26 + $0x88] sm:$0xf] }
  0xb4   : > { %v1668_v14 = vrot.slane %v1528_v2, 5  ;;  %v1671_v18 = vrot.slane %v1529_v5, 5  ;;  %v4505_v19 = vshrl.u32 %v6658_v9, 16  ;;  %v4508_v20 = vshll.u32 %v6658_v9, 16  ;;  %v1532_v31 = vld [vmem:[%s8096_s26 + $0x8c] sm:$0x1] }
  0xb5   : > { %7211 = vmatpush3.bf16.msra.mxu1 %v7937_v21  ;;  %v4457_v21 = vshrl.u32 %v6652_v16, 16  ;;  %v4514_v24 = vshll.u32 %v6659_v15, 16  ;;  %v7953_v49 = vld [vmem:[%s9249_s1 + $0x208] sm:$0xff]   ;;  %v1533_v2 = vld [vmem:[%s8096_s26 + $0x90] sm:$0xe] }
  0xb6   : > { %7389 = vmatmul.mubr.bf16.gmra.mrb[20].mxu0 %v7938_v46  ;;  %7212 = vmatprep.subr.bf16.mxu1 %v7941_v39  ;;  %v4460_v46 = vshll.u32 %v6652_v16, 16  ;;  %v6660_v16 = vld [vmem:[%s8096_s26 + $0x38] sm:$0x1]  ;;  %v1669_v22 = vsel %vm8219_vm5, %v6270_v13, %v1668_v14  ;;  %v1670_v23 = vrot.slane %v1668_v14, 4 }
  0xb7   : > { %7392 = vmatprep.mubr.bf16.mxu0 %v7940_v30  ;;  %v4459_v29 = vrot.slane %v4457_v21, 4  ;;  %v1530_v21 = vld [vmem:[%s8096_s26 + $0x84] sm:$0xe]  ;;  %v4516_v35 = vrot.slane %v4514_v24, 5  ;;  %v1535_v9 = vld [vmem:[%s8096_s26 + $0x98] sm:$0x1] }
  0xb8   : > { %7181 = vmatmul.mubr.bf16.gmra.mrb[4].mxu1 %v6295_v44  ;;  %v4462_v30 = vrot.slane %v4460_v46, 5  ;;  %v4473_v44 = vor.u32 %v4472_v37, %v4468_v36 }
  0xb9   : > { %7184 = vmatprep.mubr.bf16.mxu1 %v6296_v52  ;;  %7213 = vmatpush3.bf16.msra.mxu1 %v7941_v39  ;;  %v1661_v39 = vrot.slane %v1525_v32, 5  ;;  %v6657_v52 = vld [vmem:[%s8096_s26 + $0x2c] sm:$0x1] }
  0xba   : > { %7214 = vmatprep.subr.bf16.mxu1 %v7945_v51  ;;  %v4463_v41 = vor.u32 %v4462_v30, %v4459_v29  ;;  %v4474_v57 = vrot.slane %v4473_v44, 4  ;;  %v4510_v29 = vrot.slane %v4508_v20, 5  ;;  %v4518_v30 = vshrl.u32 %v6659_v15, 16 }
  0xbb   : > { %v1663_v48 = vrot.slane %v1661_v39, 4  ;;  %v6271_v44 = vrot.slane %v1530_v21, 9 }
  0xbc   : > { %v4479_v3 = vsel %vm8119_vm2, %v4474_v57, %v4478_v45  ;;  %v1675_v45 = vrot.slane %v1531_v25, 5 }
  0xbd   : > { %7215 = vmatpush3.bf16.msra.mxu1 %v7945_v51  ;;  %v4464_v51 = vrot.slane %v4463_v41, 4  ;;  %v8692_v58 = vsel %vm8219_vm5, %v1663_v48, %v1664_v42  ;;  %v6662_v41 = vld [vmem:[%s8096_s26 + $0x40] sm:$0xf]  ;;  %v6663_v48 = vld [vmem:[%s8096_s26 + $0x44] sm:$0x1] }
  0xbe   : > { %7393 = vmatmul.mubr.bf16.gmra.mrb[24].mxu0 %v7942_v47  ;;  %7216 = vmatprep.subr.bf16.mxu1 %v7949_v1  ;;  %v8685_v47 = vsel %vm8219_vm5, %v6269_v34, %v1661_v39  ;;  %v1672_v34 = vsel %vm8219_vm5, %v1670_v23, %v1671_v18  ;;  %v1677_v56 = vrot.slane %v1675_v45, 4 }
  0xbf   : > { %7396 = vmatprep.mubr.bf16.mxu0 %v7944_v60  ;;  %v4500_v60 = vshll.u32 %v6657_v52, 16  ;;  %v4469_v62 = vsel %vm8119_vm2, %v4464_v51, %v4468_v36  ;;  %v6301_v63 = vcombine.low %v8685_v47, %v8692_v58  ;;  %v4524_v36 = vshll.u32 %v6660_v16, 16  ;;  %v1534_v58 = vld [vmem:[%s8096_s26 + $0x94] sm:$0xf]  ;;  %v6665_v16 = vld [vmem:[%s8096_s26 + $0x4c] sm:$0xf] }
  0xc0   : > { %7185 = vmatmul.mubr.bf16.gmra.mrb[8].mxu1 %v6297_v7  ;;  %v4496_v7 = vrot.slane %v4494_v59, 4  ;;  %v6716_v11 = vcombine.low %v4469_v62, %v4479_v3  ;;  %v6302_v38 = vcombine.low %v1669_v22, %v1672_v34  ;;  %v1678_v52 = vrot.slane %v1532_v31, 5  ;;  %v1538_v34 = vld [vmem:[%s8096_s26 + $0xa4] sm:$0x1] }
  0xc1   : > { %7188 = vmatprep.mubr.bf16.mxu1 %v6298_v17  ;;  %7217 = vmatpush3.bf16.msra.mxu1 %v7949_v1  ;;  %v4486_v1 = vrot.slane %v4484_v54, 5  ;;  %v4502_v8 = vrot.slane %v4500_v60, 5  ;;  %v1676_v54 = vsel %vm8219_vm5, %v6271_v44, %v1675_v45  ;;  %v4538_v59 = vshll.u32 %v6662_v41, 16  ;;  %v8731_v60 = vld [vmem:[%s9249_s1 + $0x100] sm:$0xff]  }
  0xc2   : > { %7218 = vmatprep.subr.bf16.mxu1 %v7950_v28  ;;  %v4497_v17 = vor.u32 %v4496_v7, %v4492_v6  ;;  %v1679_v5 = vsel %vm8219_vm5, %v1677_v56, %v1678_v52  ;;  %v4548_v47 = vshll.u32 %v6663_v48, 16  ;;  %v1682_v15 = vrot.slane %v1534_v58, 5 }
  0xc3   : > { %v4562_v25 = vshll.u32 %v6665_v16, 16 }
  0xc4   : > { %v4498_v27 = vrot.slane %v4497_v17, 4  ;;  %v4550_v14 = vrot.slane %v4548_v47, 5  ;;  %v6666_v17 = vld [vmem:[%s8096_s26 + $0x50] sm:$0x1]  ;;  %v1684_v24 = vrot.slane %v1682_v15, 4 }
  0xc5   : > { %7219 = vmatpush3.bf16.msra.mxu1 %v7950_v28  ;;  %v4507_v28 = vrot.slane %v4505_v19, 4  ;;  %v1685_v19 = vrot.slane %v1535_v9, 5 }
  0xc6   : > { %7397 = vmatmul.mubr.bf16.gmra.mrb[28].mxu0 %v7946_v12  ;;  %7220 = vmatprep.subr.bf16.mxu1 %v7952_v43  ;;  %v4487_v12 = vor.u32 %v4486_v1, %v4483_v0  ;;  %v4503_v37 = vsel %vm8119_vm2, %v4498_v27, %v4502_v8  ;;  %v4542_v1 = vshrl.u32 %v6662_v41, 16  ;;  %v1537_v27 = vld [vmem:[%s8096_s26 + $0xa0] sm:$0xf] }
  0xc7   : > { %7416 = vmatprep.mubr.bf16.mxu0 %v6716_v11  ;;  %v4511_v39 = vor.u32 %v4510_v29, %v4507_v28  ;;  %v6664_v11 = vld [vmem:[%s8096_s26 + $0x48] sm:$0xf]  ;;  %v7958_v28 = vld [vmem:[%s9249_s1 + $0x218] sm:$0xff]  }
  0xc8   : > { %7189 = vmatmul.mubr.bf16.gmra.mrb[12].mxu1 %v6299_v26  ;;  %v4488_v46 = vrot.slane %v4487_v12, 4  ;;  %v4520_v26 = vrot.slane %v4518_v30, 4  ;;  %v4544_v8 = vrot.slane %v4542_v1, 4  ;;  %v4553_v20 = vshrl.u32 %v6664_v11, 16 }
  0xc9   : > { %7192 = vmatprep.mubr.bf16.mxu1 %v6300_v40  ;;  %7221 = vmatpush3.bf16.msra.mxu1 %v7952_v43  ;;  %v6661_v40 = vld [vmem:[%s8096_s26 + $0x3c] sm:$0xf]  ;;  %v4526_v43 = vrot.slane %v4524_v36, 5  ;;  %v4512_v50 = vrot.slane %v4511_v39, 4  ;;  %v4556_v21 = vshll.u32 %v6664_v11, 16  ;;  %v1686_v36 = vsel %vm8219_vm5, %v1684_v24, %v1685_v19 }
  0xca   : > { %v4493_v32 = vsel %vm8119_vm2, %v4488_v46, %v4492_v6  ;;  %7222 = vmatprep.subr.bf16.mxu1 %v7954_v10  ;;  %v4521_v51 = vor.u32 %v4520_v26, %v4516_v35  ;;  %v4529_v53 = vshrl.u32 %v6661_v40, 16  ;;  %v4532_v57 = vshll.u32 %v6661_v40, 16  ;;  %v1536_v46 = vld [vmem:[%s8096_s26 + $0x9c] sm:$0xe]  ;;  %v1541_v11 = vld [vmem:[%s8096_s26 + $0xb0] sm:$0x1] }
  0xcb   : > { %v6717_v42 = vcombine.low %v4493_v32, %v4503_v37  ;;  %v4517_v61 = vsel %vm8119_vm2, %v4512_v50, %v4516_v35  ;;  %v4540_v6 = vrot.slane %v4538_v59, 5  ;;  %v4555_v30 = vrot.slane %v4553_v20, 4  ;;  %v6669_v50 = vld [vmem:[%s8096_s26 + $0x5c] sm:$0x1]  ;;  %v6672_v19 = vld [vmem:[%s8096_s26 + $0x68] sm:$0x1] }
  0xcc   : > { %v4522_v62 = vrot.slane %v4521_v51, 4  ;;  %v4531_v0 = vrot.slane %v4529_v53, 4  ;;  %v4534_v3 = vrot.slane %v4532_v57, 5  ;;  %v4558_v31 = vrot.slane %v4556_v21, 5  ;;  %v7961_v51 = vld [vmem:[%s9249_s1 + $0x220] sm:$0xff]  }
  0xcd   : > { %7223 = vmatpush3.bf16.msra.mxu1 %v7954_v10  ;;  %v6272_v10 = vrot.slane %v1533_v2, 9  ;;  %v4545_v18 = vor.u32 %v4544_v8, %v4540_v6  ;;  %v4566_v32 = vshrl.u32 %v6665_v16, 16  ;;  %v4564_v37 = vrot.slane %v4562_v25, 5 }
  0xce   : > { %7417 = vmatmul.mubr.bf16.vlgmr.msra.gmra.mrb[0].mxu0 %v6717_v42  ;;  %7496 = vmatprep.subr.bf16.mxu1 %v8731_v60  ;;  %v4527_v7 = vsel %vm8119_vm2, %v4522_v62, %v4526_v43  ;;  %v4535_v13 = vor.u32 %v4534_v3, %v4531_v0  ;;  %v4559_v40 = vor.u32 %v4558_v31, %v4555_v30  ;;  %v6667_v42 = vld [vmem:[%s8096_s26 + $0x54] sm:$0xf]  ;;  %v6668_v43 = vld [vmem:[%s8096_s26 + $0x58] sm:$0xf]  ;;  %v6273_v48 = vrot.slane %v1536_v46, 9 }
  0xcf   : > { %7449 = vmatpush3.bf16.msra.mxu0 %v8581_v55  ;;  %v6303_v55 = vcombine.low %v1676_v54, %v1679_v5  ;;  %v6718_v12 = vcombine.low %v4517_v61, %v4527_v7  ;;  %v1683_v23 = vsel %vm8219_vm5, %v6272_v10, %v1682_v15  ;;  %v4546_v29 = vrot.slane %v4545_v18, 4  ;;  %v1539_v3 = vld [vmem:[%s8096_s26 + $0xa8] sm:$0xe]  ;;  %v1540_v7 = vld [vmem:[%s8096_s26 + $0xac] sm:$0xf]  ;;  %v7967_v30 = vld [vmem:[%s9249_s1 + $0x230] sm:$0xff]  }
  0xd0   : > { %7193 = vmatmul.mubr.bf16.gmra.mrb[16].mxu1 %v6301_v63  ;;  %7450 = vmatprep.subr.bf16.mxu0 %v7953_v49  ;;  %v7955_v63 = vld [vmem:[%s9249_s1 + $0x210] sm:$0xff]   ;;  %v4536_v22 = vrot.slane %v4535_v13, 4  ;;  %v6304_v26 = vcombine.low %v1683_v23, %v1686_v36  ;;  %v4568_v41 = vrot.slane %v4566_v32, 4  ;;  %v4560_v52 = vrot.slane %v4559_v40, 4  ;;  %v6670_v13 = vld [vmem:[%s8096_s26 + $0x60] sm:$0xf] }
  0xd1   : > { %7196 = vmatprep.mubr.bf16.mxu1 %v6302_v38  ;;  %7420 = vmatprep.mubr.bf16.mxu0 %v6718_v12  ;;  %v4572_v38 = vshll.u32 %v6666_v17, 16  ;;  %v4551_v39 = vsel %vm8119_vm2, %v4546_v29, %v4550_v14  ;;  %v1692_v54 = vrot.slane %v1538_v34, 5  ;;  %v4577_v56 = vshrl.u32 %v6667_v42, 16  ;;  %v6671_v18 = vld [vmem:[%s8096_s26 + $0x64] sm:$0xf] }
  0xd2   : > { %v4541_v35 = vsel %vm8119_vm2, %v4536_v22, %v4540_v6  ;;  %v4569_v53 = vor.u32 %v4568_v41, %v4564_v37  ;;  %v4580_v61 = vshll.u32 %v6667_v42, 16  ;;  %v4586_v62 = vshll.u32 %v6668_v43, 16  ;;  %v1542_v23 = vld [vmem:[%s8096_s26 + $0xb4] sm:$0xe]  ;;  %v1543_v29 = vld [vmem:[%s8096_s26 + $0xb8] sm:$0xf] }
  0xd3   : > { %7451 = vmatpush3.bf16.msra.mxu0 %v7953_v49  ;;  %v6719_v44 = vcombine.low %v4541_v35, %v4551_v39  ;;  %v4574_v45 = vrot.slane %v4572_v38, 5  ;;  %v1689_v49 = vrot.slane %v1537_v27, 5  ;;  %v4565_v0 = vsel %vm8119_vm2, %v4560_v52, %v4564_v37  ;;  %v1544_v36 = vld [vmem:[%s8096_s26 + $0xbc] sm:$0x1]  ;;  %v6675_v52 = vld [vmem:[%s8096_s26 + $0x74] sm:$0x1] }
  0xd4   : > { %7452 = vmatprep.subr.bf16.mxu0 %v7955_v63  ;;  %v4570_v1 = vrot.slane %v4569_v53, 4  ;;  %v4579_v2 = vrot.slane %v4577_v56, 4  ;;  %v4590_v5 = vshrl.u32 %v6668_v43, 16  ;;  %v4582_v47 = vrot.slane %v4580_v61, 5  ;;  %v7968_v53 = vld [vmem:[%s9249_s1 + $0x238] sm:$0xff]  }
  0xd5   : > { %v1690_v57 = vsel %vm8219_vm5, %v6273_v48, %v1689_v49  ;;  %v1691_v59 = vrot.slane %v1689_v49, 4  ;;  %v4588_v58 = vrot.slane %v4586_v62, 5  ;;  %v6274_v12 = vrot.slane %v1539_v3, 9 }
  0xd6   : > { %7421 = vmatmul.mubr.bf16.gmra.mrb[4].mxu0 %v6719_v44  ;;  %v4575_v8 = vsel %vm8119_vm2, %v4570_v1, %v4574_v45  ;;  %v4592_v10 = vrot.slane %v4590_v5, 4  ;;  %v4583_v15 = vor.u32 %v4582_v47, %v4579_v2  ;;  %v1696_v17 = vrot.slane %v1540_v7, 5  ;;  %v6673_v44 = vld [vmem:[%s8096_s26 + $0x6c] sm:$0xf]  ;;  %v6674_v45 = vld [vmem:[%s8096_s26 + $0x70] sm:$0xf] }
  0xd7   : > { %7453 = vmatpush3.bf16.msra.mxu0 %v7955_v63  ;;  %v1693_v6 = vsel %vm8219_vm5, %v1691_v59, %v1692_v54  ;;  %v4596_v63 = vshll.u32 %v6669_v50, 16  ;;  %v6720_v14 = vcombine.low %v4565_v0, %v4575_v8  ;;  %v1699_v21 = vrot.slane %v1541_v11, 5  ;;  %v6676_v11 = vld [vmem:[%s8096_s26 + $0x78] sm:$0xf] }
  0xd8   : > { %7197 = vmatmul.mubr.bf16.gmra.mrb[20].mxu1 %v6303_v55  ;;  %7454 = vmatprep.subr.bf16.mxu0 %v7958_v28  ;;  %v7964_v55 = vld [vmem:[%s9249_s1 + $0x228] sm:$0xff]   ;;  %v6305_v9 = vcombine.low %v1690_v57, %v1693_v6  ;;  %v4593_v20 = vor.u32 %v4592_v10, %v4588_v58  ;;  %v4601_v46 = vshrl.u32 %v6670_v13, 16  ;;  %v4604_v22 = vshll.u32 %v6670_v13, 16 }
  0xd9   : > { %7200 = vmatprep.mubr.bf16.mxu1 %v6304_v26  ;;  %v4598_v16 = vrot.slane %v4596_v63, 5  ;;  %7424 = vmatprep.mubr.bf16.mxu0 %v6720_v14  ;;  %v4584_v24 = vrot.slane %v4583_v15, 4  ;;  %v1697_v25 = vsel %vm8219_vm5, %v6274_v12, %v1696_v17  ;;  %v1698_v27 = vrot.slane %v1696_v17, 4  ;;  %v6677_v12 = vld [vmem:[%s8096_s26 + $0x7c] sm:$0xf] }
  0xda   : > { %v4594_v31 = vrot.slane %v4593_v20, 4  ;;  %v4603_v32 = vrot.slane %v4601_v46, 4  ;;  %v4606_v34 = vrot.slane %v4604_v22, 5  ;;  %v4614_v35 = vshrl.u32 %v6671_v18, 16 }
  0xdb   : > { %7455 = vmatpush3.bf16.msra.mxu0 %v7958_v28  ;;  %v4610_v28 = vshll.u32 %v6671_v18, 16  ;;  %v4589_v37 = vsel %vm8119_vm2, %v4584_v24, %v4588_v58  ;;  %v1700_v38 = vsel %vm8219_vm5, %v1698_v27, %v1699_v21  ;;  %v4620_v26 = vshll.u32 %v6672_v19, 16  ;;  %v6679_v24 = vld [vmem:[%s8096_s26 + $0x84] sm:$0xf] }
  0xdc   : > { %7456 = vmatprep.subr.bf16.mxu0 %v7961_v51  ;;  %v4599_v40 = vsel %vm8119_vm2, %v4594_v31, %v4598_v16  ;;  %v6306_v41 = vcombine.low %v1697_v25, %v1700_v38  ;;  %v4607_v42 = vor.u32 %v4606_v34, %v4603_v32  ;;  %v4616_v43 = vrot.slane %v4614_v35, 4  ;;  %v6678_v16 = vld [vmem:[%s8096_s26 + $0x80] sm:$0x1]  ;;  %v6681_v34 = vld [vmem:[%s8096_s26 + $0x8c] sm:$0x1] }
  0xdd   : > { %v4612_v39 = vrot.slane %v4610_v28, 5  ;;  %v6721_v48 = vcombine.low %v4589_v37, %v4599_v40  ;;  %v4622_v49 = vrot.slane %v4620_v26, 5  ;;  %v6275_v50 = vrot.slane %v1542_v23, 9  ;;  %v7957_v26 = vld [vmem:[%s8096_s26 + $0x18] sm:$0xff]  }
  0xde   : > { %v4608_v54 = vrot.slane %v4607_v42, 4  ;;  %v1706_v57 = vrot.slane %v1544_v36, 5  ;;  %v4625_v59 = vshrl.u32 %v6673_v44, 16  ;;  %v4628_v0 = vshll.u32 %v6673_v44, 16 }
  0xdf   : > { %7457 = vmatpush3.bf16.msra.mxu0 %v7961_v51  ;;  %v1703_v51 = vrot.slane %v1543_v29, 5  ;;  %v4617_v56 = vor.u32 %v4616_v43, %v4612_v39  ;;  %v4634_v1 = vshll.u32 %v6674_v45, 16  ;;  %v4638_v6 = vshrl.u32 %v6674_v45, 16  ;;  %v7959_v45 = vld [vmem:[%s8096_s26 + $0x24] sm:$0xff]  }
  0xe0   : > { %7201 = vmatmul.mubr.bf16.gmra.mrb[24].mxu1 %v6305_v9  ;;  %7458 = vmatprep.subr.bf16.mxu0 %v7964_v55  ;;  %v4613_v2 = vsel %vm8119_vm2, %v4608_v54, %v4612_v39  ;;  %v4627_v3 = vrot.slane %v4625_v59, 4  ;;  %v4630_v58 = vrot.slane %v4628_v0, 5  ;;  %v4644_v7 = vshll.u32 %v6675_v52, 16  ;;  %v6682_v54 = vld [vmem:[%s8096_s26 + $0x90] sm:$0xf] }
  0xe1   : > { %7204 = vmatprep.mubr.bf16.mxu1 %v6306_v41  ;;  %7425 = vmatmul.mubr.bf16.gmra.mrb[8].mxu0 %v6721_v48  ;;  %v1704_v61 = vsel %vm8219_vm5, %v6275_v50, %v1703_v51  ;;  %v1705_v62 = vrot.slane %v1703_v51, 4  ;;  %v4618_v5 = vrot.slane %v4617_v56, 4  ;;  %v4636_v63 = vrot.slane %v4634_v1, 5  ;;  %v6683_v56 = vld [vmem:[%s8096_s26 + $0x94] sm:$0xf] }
  0xe2   : > { %v4640_v10 = vrot.slane %v4638_v6, 4  ;;  %v4631_v14 = vor.u32 %v4630_v58, %v4627_v3  ;;  %v4646_v15 = vrot.slane %v4644_v7, 5  ;;  %v4649_v17 = vshrl.u32 %v6676_v11, 16  ;;  %v6685_v6 = vld [vmem:[%s8096_s26 + $0x9c] sm:$0xf] }
  0xe3   : > { %7459 = vmatpush3.bf16.msra.mxu0 %v7964_v55  ;;  %v1707_v47 = vsel %vm8219_vm5, %v1705_v62, %v1706_v57  ;;  %v7956_v55 = vld [vmem:[%s8096_s26 + $0xc] sm:$0xff]   ;;  %v4623_v8 = vsel %vm8119_vm2, %v4618_v5, %v4622_v49  ;;  %v4652_v19 = vshll.u32 %v6676_v11, 16  ;;  %v4658_v20 = vshll.u32 %v6677_v12, 16  ;;  %v6684_v62 = vld [vmem:[%s8096_s26 + $0x98] sm:$0x1] }
  0xe4   : > { %7460 = vmatprep.subr.bf16.mxu0 %v7967_v30  ;;  %v6307_v9 = vcombine.low %v1704_v61, %v1707_v47  ;;  %v6722_v13 = vcombine.low %v4613_v2, %v4623_v8  ;;  %v4641_v18 = vor.u32 %v4640_v10, %v4636_v63  ;;  %v4662_v21 = vshrl.u32 %v6677_v12, 16  ;;  %v7978_v8 = vld [vmem:[%s9249_s1 + $0x108] sm:$0xff]   ;;  %v6687_v12 = vld [vmem:[%s8096_s26 + $0xa4] sm:$0x1] }
  0xe5   : > { %v4632_v46 = vrot.slane %v4631_v14, 4  ;;  %v4651_v22 = vrot.slane %v4649_v17, 4  ;;  %v4668_v23 = vshll.u32 %v6678_v16, 16  ;;  %v4654_v27 = vrot.slane %v4652_v19, 5  ;;  %v7962_v14 = vld [vmem:[%s8096_s26 + $0x3c] sm:$0xff]  }
  0xe6   : > { %7428 = vmatprep.mubr.bf16.mxu0 %v6722_v13  ;;  %v4642_v25 = vrot.slane %v4641_v18, 4  ;;  %v4660_v28 = vrot.slane %v4658_v20, 5  ;;  %v4664_v29 = vrot.slane %v4662_v21, 4  ;;  %v4673_v35 = vshrl.u32 %v6679_v24, 16 }
  0xe7   : > { %7461 = vmatpush3.bf16.msra.mxu0 %v7967_v30  ;;  %v6680_v30 = vld [vmem:[%s8096_s26 + $0x88] sm:$0xf]  ;;  %v4637_v31 = vsel %vm8119_vm2, %v4632_v46, %v4636_v63  ;;  %v4670_v32 = vrot.slane %v4668_v23, 5  ;;  %v4676_v36 = vshll.u32 %v6679_v24, 16  ;;  %v4655_v38 = vor.u32 %v4654_v27, %v4651_v22 }
  0xe8   : > { %7462 = vmatprep.subr.bf16.mxu0 %v7968_v53  ;;  %7205 = vmatmul.mubr.bf16.gmra.mrb[28].mxu1 %v6307_v9  ;;  %v4647_v37 = vsel %vm8119_vm2, %v4642_v25, %v4646_v15  ;;  %v4665_v39 = vor.u32 %v4664_v29, %v4660_v28  ;;  %v4682_v40 = vshll.u32 %v6680_v30, 16  ;;  %v4675_v42 = vrot.slane %v4673_v35, 4  ;;  %v6686_v9 = vld [vmem:[%s8096_s26 + $0xa0] sm:$0xf]  ;;  %v6688_v27 = vld [vmem:[%s8096_s26 + $0xa8] sm:$0xf] }
  0xe9   : > { %7224 = vmatprep.mubr.bf16.mxu1 %v7956_v55  ;;  %v6723_v41 = vcombine.low %v4637_v31, %v4647_v37  ;;  %v4678_v43 = vrot.slane %v4676_v36, 5  ;;  %v4686_v44 = vshrl.u32 %v6680_v30, 16  ;;  %v4656_v48 = vrot.slane %v4655_v38, 4  ;;  %v7960_v55 = vld [vmem:[%s8096_s26 + $0x30] sm:$0xff]  }
  0xea   : > { %v4666_v49 = vrot.slane %v4665_v39, 4  ;;  %v4684_v50 = vrot.slane %v4682_v40, 5  ;;  %v4692_v51 = vshll.u32 %v6681_v34, 16  ;;  %v4697_v0 = vshrl.u32 %v6682_v54, 16  ;;  %v6690_v38 = vld [vmem:[%s8096_s26 + $0xb0] sm:$0x1] }
  0xeb   : > { %7463 = vmatpush3.bf16.msra.mxu0 %v7968_v53  ;;  %v4679_v52 = vor.u32 %v4678_v43, %v4675_v42  ;;  %v4688_v53 = vrot.slane %v4686_v44, 4  ;;  %v4661_v57 = vsel %vm8119_vm2, %v4656_v48, %v4660_v28  ;;  %v4700_v3 = vshll.u32 %v6682_v54, 16  ;;  %v7979_v28 = vld [vmem:[%s9249_s1 + $0x110] sm:$0xff]  }
  0xec   : > { %7429 = vmatmul.mubr.bf16.gmra.mrb[12].mxu0 %v6723_v41  ;;  %v4671_v59 = vsel %vm8119_vm2, %v4666_v49, %v4670_v32  ;;  %v4694_v61 = vrot.slane %v4692_v51, 5  ;;  %v4699_v47 = vrot.slane %v4697_v0, 4  ;;  %v4706_v58 = vshll.u32 %v6683_v56, 16  ;;  %v6689_v32 = vld [vmem:[%s8096_s26 + $0xac] sm:$0xf]  ;;  %v7980_v51 = vld [vmem:[%s9249_s1 + $0x118] sm:$0xff]  }
  0xed   : > { %v6724_v1 = vcombine.low %v4661_v57, %v4671_v59  ;;  %v4680_v2 = vrot.slane %v4679_v52, 4  ;;  %v4689_v5 = vor.u32 %v4688_v53, %v4684_v50  ;;  %v4710_v63 = vshrl.u32 %v6683_v56, 16  ;;  %v7963_v49 = vld [vmem:[%s8096_s26 + $0x48] sm:$0xff]   ;;  %v6692_v57 = vld [vmem:[%s8096_s26 + $0xb8] sm:$0xf] }
  0xee   : > { %v4716_v7 = vshll.u32 %v6684_v62, 16  ;;  %v4702_v11 = vrot.slane %v4700_v3, 5  ;;  %v4721_v13 = vshrl.u32 %v6685_v6, 16  ;;  %v4708_v15 = vrot.slane %v4706_v58, 5  ;;  %v7965_v59 = vld [vmem:[%s8096_s26 + $0x54] sm:$0xff]  }
  0xef   : > { %7432 = vmatprep.mubr.bf16.mxu0 %v6724_v1  ;;  %v4690_v10 = vrot.slane %v4689_v5, 4  ;;  %v4712_v16 = vrot.slane %v4710_v63, 4  ;;  %v4724_v18 = vshll.u32 %v6685_v6, 16  ;;  %v4730_v46 = vshll.u32 %v6686_v9, 16  ;;  %v6693_v1 = vld [vmem:[%s8096_s26 + $0xbc] sm:$0x1] }
  0xf0   : > { %7225 = vmatmul.mubr.bf16.vlgmr.msra.gmra.mrb[0].mxu1 %v7957_v26  ;;  %v4718_v17 = vrot.slane %v4716_v7, 5  ;;  %v4703_v20 = vor.u32 %v4702_v11, %v4699_v47  ;;  %v4723_v21 = vrot.slane %v4721_v13, 4  ;;  %v4734_v25 = vshrl.u32 %v6686_v9, 16 }
  0xf1   : > { %7504 = vmatpush3.bf16.msra.mxu1 %v8731_v60  ;;  %7228 = vmatprep.mubr.bf16.mxu1 %v7959_v45  ;;  %v4685_v60 = vsel %vm8119_vm2, %v4680_v2, %v4684_v50  ;;  %v4695_v19 = vsel %vm8119_vm2, %v4690_v10, %v4694_v61  ;;  %v4713_v23 = vor.u32 %v4712_v16, %v4708_v15  ;;  %v4726_v24 = vrot.slane %v4724_v18, 5  ;;  %v6691_v50 = vld [vmem:[%s8096_s26 + $0xb4] sm:$0xf]  ;;  %v6695_v16 = vld [vmem:[%s8096_s26 + $0xc4] sm:$0xf] }
  0xf2   : > { %7497 = vmatprep.subr.bf16.mxu1 %v7978_v8  ;;  %v6725_v22 = vcombine.low %v4685_v60, %v4695_v19  ;;  %v4704_v29 = vrot.slane %v4703_v20, 4  ;;  %v4732_v30 = vrot.slane %v4730_v46, 5  ;;  %v4740_v31 = vshll.u32 %v6687_v12, 16  ;;  %v6694_v12 = vld [vmem:[%s8096_s26 + $0xc0] sm:$0xf] }
  0xf3   : > { %v4745_v34 = vshrl.u32 %v6688_v27, 16  ;;  %v4714_v35 = vrot.slane %v4713_v23, 4  ;;  %v4727_v36 = vor.u32 %v4726_v24, %v4723_v21  ;;  %v4736_v37 = vrot.slane %v4734_v25, 4 }
  0xf4   : > { %7433 = vmatmul.mubr.bf16.gmra.mrb[16].mxu0 %v6725_v22  ;;  %v4748_v39 = vshll.u32 %v6688_v27, 16  ;;  %v4709_v26 = vsel %vm8119_vm2, %v4704_v29, %v4708_v15  ;;  %v4742_v40 = vrot.slane %v4740_v31, 5  ;;  %v4754_v42 = vshll.u32 %v6689_v32, 16  ;;  %v6697_v31 = vld [vmem:[%s8096_s26 + $0xcc] sm:$0xf] }
  0xf5   : > { %7505 = vmatpush3.bf16.msra.mxu1 %v7978_v8  ;;  %v4747_v41 = vrot.slane %v4745_v34, 4  ;;  %v4719_v43 = vsel %vm8119_vm2, %v4714_v35, %v4718_v17  ;;  %v4728_v44 = vrot.slane %v4727_v36, 4  ;;  %v4737_v45 = vor.u32 %v4736_v37, %v4732_v30  ;;  %v7981_v8 = vld [vmem:[%s9249_s1 + $0x120] sm:$0xff]   ;;  %v6696_v17 = vld [vmem:[%s8096_s26 + $0xc8] sm:$0x1] }
  0xf6   : > { %7498 = vmatprep.subr.bf16.mxu1 %v7979_v28  ;;  %v4750_v48 = vrot.slane %v4748_v39, 5  ;;  %v6726_v52 = vcombine.low %v4709_v26, %v4719_v43  ;;  %v4756_v53 = vrot.slane %v4754_v42, 5  ;;  %v4758_v54 = vshrl.u32 %v6689_v32, 16  ;;  %v7982_v32 = vld [vmem:[%s9249_s1 + $0x128] sm:$0xff]   ;;  %v6699_v42 = vld [vmem:[%s8096_s26 + $0xd4] sm:$0x1] }
  0xf7   : > { %v4764_v56 = vshll.u32 %v6690_v38, 16  ;;  %v4733_v61 = vsel %vm8119_vm2, %v4728_v44, %v4732_v30  ;;  %v4738_v62 = vrot.slane %v4737_v45, 4  ;;  %v4769_v2 = vshrl.u32 %v6691_v50, 16  ;;  %v7966_v30 = vld [vmem:[%s8096_s26 + $0x60] sm:$0xff]   ;;  %v6698_v38 = vld [vmem:[%s8096_s26 + $0xd0] sm:$0xf] }
  0xf8   : > { %7229 = vmatmul.mubr.bf16.gmra.mrb[4].mxu1 %v7960_v55  ;;  %v4751_v0 = vor.u32 %v4750_v48, %v4747_v41  ;;  %7436 = vmatprep.mubr.bf16.mxu0 %v6726_v52  ;;  %v4760_v5 = vrot.slane %v4758_v54, 4  ;;  %v4772_v6 = vshll.u32 %v6691_v50, 16  ;;  %v4778_v47 = vshll.u32 %v6692_v57, 16  ;;  %v7969_v39 = vld [vmem:[%s8096_s26 + $0x6c] sm:$0xff]  }
  0xf9   : > { %7232 = vmatprep.mubr.bf16.mxu1 %v7962_v14  ;;  %7506 = vmatpush3.bf16.msra.mxu1 %v7979_v28  ;;  %v4766_v3 = vrot.slane %v4764_v56, 5  ;;  %v4743_v58 = vsel %vm8119_vm2, %v4738_v62, %v4742_v40  ;;  %v4771_v7 = vrot.slane %v4769_v2, 4  ;;  %v4782_v55 = vshrl.u32 %v6692_v57, 16  ;;  %v7983_v54 = vld [vmem:[%s9249_s1 + $0x130] sm:$0xff]  }
  0xfa   : > { %7499 = vmatprep.subr.bf16.mxu1 %v7980_v51  ;;  %v4752_v63 = vrot.slane %v4751_v0, 4  ;;  %v6727_v9 = vcombine.low %v4733_v61, %v4743_v58  ;;  %v4761_v60 = vor.u32 %v4760_v5, %v4756_v53  ;;  %v4774_v10 = vrot.slane %v4772_v6, 5  ;;  %v6741_v6 = vld [vmem:[%s8096_s26 + $0x1c] sm:$0xf] }
  0xfb   : > { %v4780_v11 = vrot.slane %v4778_v47, 5  ;;  %v4784_v14 = vrot.slane %v4782_v55, 4  ;;  %v4788_v15 = vshll.u32 %v6693_v1, 16  ;;  %v4793_v20 = vshrl.u32 %v6694_v12, 16  ;;  %v6740_v1 = vld [vmem:[%s8096_s26 + $0x18] sm:$0xe] }
  0xfc   : > { %v4757_v13 = vsel %vm8119_vm2, %v4752_v63, %v4756_v53  ;;  %7437 = vmatmul.mubr.bf16.gmra.mrb[20].mxu0 %v6727_v9  ;;  %v4762_v18 = vrot.slane %v4761_v60, 4  ;;  %v4775_v19 = vor.u32 %v4774_v10, %v4771_v7  ;;  %v4796_v21 = vshll.u32 %v6694_v12, 16  ;;  %v6742_v47 = vld [vmem:[%s8096_s26 + $0x20] sm:$0x1]  ;;  %v7984_v9 = vld [vmem:[%s9249_s1 + $0x138] sm:$0xff]  }
  0xfd   : > { %7507 = vmatpush3.bf16.msra.mxu1 %v7980_v51  ;;  %v4785_v46 = vor.u32 %v4784_v14, %v4780_v11  ;;  %v4790_v22 = vrot.slane %v4788_v15, 5  ;;  %v4802_v23 = vshll.u32 %v6695_v16, 16  ;;  %v4806_v24 = vshrl.u32 %v6695_v16, 16  ;;  %v6743_v12 = vld [vmem:[%s8096_s26 + $0x24] sm:$0xe] }
  0xfe   : > { %7500 = vmatprep.subr.bf16.mxu1 %v7981_v8  ;;  %v4767_v25 = vsel %vm8119_vm2, %v4762_v18, %v4766_v3  ;;  %v4776_v27 = vrot.slane %v4775_v19, 4  ;;  %v4795_v28 = vrot.slane %v4793_v20, 4  ;;  %v4798_v29 = vrot.slane %v4796_v21, 5  ;;  %v6744_v15 = vld [vmem:[%s8096_s26 + $0x28] sm:$0xf] }
  0xff   : > { %v6728_v34 = vcombine.low %v4757_v13, %v4767_v25  ;;  %v4786_v35 = vrot.slane %v4785_v46, 4  ;;  %v4804_v36 = vrot.slane %v4802_v23, 5  ;;  %v4808_v37 = vrot.slane %v4806_v24, 4  ;;  %v6745_v16 = vld [vmem:[%s8096_s26 + $0x2c] sm:$0x1] }
 0x100   : > { %7233 = vmatmul.mubr.bf16.gmra.mrb[8].mxu1 %v7963_v49  ;;  %v4781_v26 = vsel %vm8119_vm2, %v4776_v27, %v4780_v11  ;;  %v4799_v40 = vor.u32 %v4798_v29, %v4795_v28  ;;  %v4812_v41 = vshll.u32 %v6696_v17, 16  ;;  %v4817_v43 = vshrl.u32 %v6697_v31, 16  ;;  %v7971_v17 = vld [vmem:[%s8096_s26 + $0x84] sm:$0xff]   ;;  %v6747_v23 = vld [vmem:[%s8096_s26 + $0x34] sm:$0xf] }
 0x101   : > { %7236 = vmatprep.mubr.bf16.mxu1 %v7965_v59  ;;  %7508 = vmatpush3.bf16.msra.mxu1 %v7981_v8  ;;  %v4791_v44 = vsel %vm8119_vm2, %v4786_v35, %v4790_v22  ;;  %v4809_v45 = vor.u32 %v4808_v37, %v4804_v36  ;;  %v4820_v48 = vshll.u32 %v6697_v31, 16  ;;  %v4826_v49 = vshll.u32 %v6698_v38, 16  ;;  %v7970_v8 = vld [vmem:[%s8096_s26 + $0x78] sm:$0xff]   ;;  %v6746_v22 = vld [vmem:[%s8096_s26 + $0x30] sm:$0xe] }
 0x102   : > { %7501 = vmatprep.subr.bf16.mxu1 %v7982_v32  ;;  %7440 = vmatprep.mubr.bf16.mxu0 %v6728_v34  ;;  %v6729_v50 = vcombine.low %v4781_v26, %v4791_v44  ;;  %v4800_v51 = vrot.slane %v4799_v40, 4  ;;  %v4814_v52 = vrot.slane %v4812_v41, 5  ;;  %v4819_v53 = vrot.slane %v4817_v43, 4  ;;  %v6748_v29 = vld [vmem:[%s8096_s26 + $0x38] sm:$0x1]  ;;  %v7972_v35 = vld [vmem:[%s8096_s26 + $0x90] sm:$0xff]  }
 0x103   : > { %v4810_v56 = vrot.slane %v4809_v45, 4  ;;  %v4822_v57 = vrot.slane %v4820_v48, 5  ;;  %v4828_v59 = vrot.slane %v4826_v49, 5  ;;  %v4830_v61 = vshrl.u32 %v6698_v38, 16  ;;  %v6750_v37 = vld [vmem:[%s8096_s26 + $0x40] sm:$0xf] }
 0x104   : > { %7441 = vmatmul.mubr.bf16.gmra.mrb[24].mxu0 %v6729_v50  ;;  %v4805_v62 = vsel %vm8119_vm2, %v4800_v51, %v4804_v36  ;;  %v4836_v0 = vshll.u32 %v6699_v42, 16  ;;  %v6788_v58 = vrot.slane %v6740_v1, 9  ;;  %v5324_v7 = vrot.slane %v6741_v6, 5  ;;  %v6749_v36 = vld [vmem:[%s8096_s26 + $0x3c] sm:$0xe] }
 0x105   : > { %7509 = vmatpush3.bf16.msra.mxu1 %v7982_v32  ;;  %v4815_v2 = vsel %vm8119_vm2, %v4810_v56, %v4814_v52  ;;  %v4823_v5 = vor.u32 %v4822_v57, %v4819_v53  ;;  %v4832_v3 = vrot.slane %v4830_v61, 4  ;;  %v5327_v55 = vrot.slane %v6742_v47, 5  ;;  %v6751_v38 = vld [vmem:[%s8096_s26 + $0x44] sm:$0x1]  ;;  %v7973_v41 = vld [vmem:[%s8096_s26 + $0x9c] sm:$0xff]  }
 0x106   : > { %7502 = vmatprep.subr.bf16.mxu1 %v7983_v54  ;;  %v6730_v63 = vcombine.low %v4805_v62, %v4815_v2  ;;  %v4838_v11 = vrot.slane %v4836_v0, 5  ;;  %v5325_v13 = vsel %vm8219_vm5, %v6788_v58, %v5324_v7  ;;  %v5326_v14 = vrot.slane %v5324_v7, 4  ;;  %v6752_v48 = vld [vmem:[%s8096_s26 + $0x48] sm:$0xe]  ;;  %v6753_v49 = vld [vmem:[%s8096_s26 + $0x4c] sm:$0xf] }
 0x107   : > { %v4824_v60 = vrot.slane %v4823_v5, 4  ;;  %v4833_v10 = vor.u32 %v4832_v3, %v4828_v59  ;;  %v6789_v20 = vrot.slane %v6743_v12, 9  ;;  %v5331_v21 = vrot.slane %v6744_v15, 5  ;;  %v6754_v51 = vld [vmem:[%s8096_s26 + $0x50] sm:$0x1] }
 0x108   : > { %7237 = vmatmul.mubr.bf16.gmra.mrb[12].mxu1 %v7966_v30  ;;  %7444 = vmatprep.mubr.bf16.mxu0 %v6730_v63  ;;  %v5328_v46 = vsel %vm8219_vm5, %v5326_v14, %v5327_v55  ;;  %v5334_v28 = vrot.slane %v6745_v16, 5  ;;  %v6790_v31 = vrot.slane %v6746_v22, 9  ;;  %v5338_v32 = vrot.slane %v6747_v23, 5  ;;  %v6755_v57 = vld [vmem:[%s8096_s26 + $0x54] sm:$0xe] }
 0x109   : > { %7240 = vmatprep.mubr.bf16.mxu1 %v7969_v39  ;;  %7510 = vmatpush3.bf16.msra.mxu1 %v7983_v54  ;;  %v4829_v18 = vsel %vm8119_vm2, %v4824_v60, %v4828_v59  ;;  %v4834_v19 = vrot.slane %v4833_v10, 4  ;;  %v6820_v25 = vcombine.low %v5325_v13, %v5328_v46  ;;  %v5333_v27 = vrot.slane %v5331_v21, 4  ;;  %v6756_v0 = vld [vmem:[%s8096_s26 + $0x58] sm:$0xf]  ;;  %v6757_v1 = vld [vmem:[%s8096_s26 + $0x5c] sm:$0x1] }
 0x10a   : > { %7503 = vmatprep.subr.bf16.mxu1 %v7984_v9  ;;  %v5341_v34 = vrot.slane %v6748_v29, 5  ;;  %v5332_v39 = vsel %vm8219_vm5, %v6789_v20, %v5331_v21  ;;  %v5340_v26 = vrot.slane %v5338_v32, 4  ;;  %v6791_v40 = vrot.slane %v6749_v36, 9  ;;  %v6758_v7 = vld [vmem:[%s8096_s26 + $0x60] sm:$0xe]  ;;  %v7975_v13 = vld [vmem:[%s8096_s26 + $0xb4] sm:$0xff]  }
 0x10b   : > { %v4839_v24 = vsel %vm8119_vm2, %v4834_v19, %v4838_v11  ;;  %v5335_v42 = vsel %vm8219_vm5, %v5333_v27, %v5334_v28  ;;  %v5339_v43 = vsel %vm8219_vm5, %v6790_v31, %v5338_v32  ;;  %v5345_v44 = vrot.slane %v6750_v37, 5  ;;  %v6759_v55 = vld [vmem:[%s8096_s26 + $0x64] sm:$0xf]  ;;  %v6761_v16 = vld [vmem:[%s8096_s26 + $0x6c] sm:$0xe] }
 0x10c   : > { %v6731_v30 = vcombine.low %v4829_v18, %v4839_v24  ;;  %v5348_v45 = vrot.slane %v6751_v38, 5  ;;  %v5342_v50 = vsel %vm8219_vm5, %v5340_v26, %v5341_v34  ;;  %v6792_v52 = vrot.slane %v6752_v48, 9  ;;  %v6763_v20 = vld [vmem:[%s8096_s26 + $0x74] sm:$0x1]  ;;  %v6412_v22 = vld [vmem:[%s8096_s26 + $0x6c] sm:$0xf] }
 0x10d   : > { %7511 = vmatpush3.bf16.msra.mxu1 %v7984_v9  ;;  %v5352_v53 = vrot.slane %v6753_v49, 5  ;;  %v5347_v54 = vrot.slane %v5345_v44, 4  ;;  %v5355_v56 = vrot.slane %v6754_v51, 5  ;;  %v6821_v59 = vcombine.low %v5332_v39, %v5335_v42  ;;  %v7974_v9 = vld [vmem:[%s8096_s26 + $0xa8] sm:$0xff]   ;;  %v6413_v28 = vld [vmem:[%s8096_s26 + $0x70] sm:$0xf] }
 0x10e   : > { %7445 = vmatmul.mubr.bf16.gmra.mrb[28].mxu0 %v6731_v30  ;;  %v6822_v61 = vcombine.low %v5339_v43, %v5342_v50  ;;  %v6793_v2 = vrot.slane %v6755_v57, 9  ;;  %v5346_v5 = vsel %vm8219_vm5, %v6791_v40, %v5345_v44  ;;  %v5359_v6 = vrot.slane %v6756_v0, 5  ;;  %v6414_v29 = vld [vmem:[%s8096_s26 + $0x74] sm:$0x1]  ;;  %v6765_v26 = vld [vmem:[%s8096_s26 + $0x7c] sm:$0xf] }
 0x10f   : > { %7464 = vmatprep.mubr.bf16.mxu0 %v6820_v25  ;;  %v5354_v62 = vrot.slane %v5352_v53, 4  ;;  %v5349_v3 = vsel %vm8219_vm5, %v5347_v54, %v5348_v45  ;;  %v5362_v47 = vrot.slane %v6757_v1, 5  ;;  %v5353_v58 = vsel %vm8219_vm5, %v6792_v52, %v5352_v53  ;;  %v6766_v44 = vld [vmem:[%s8096_s26 + $0x80] sm:$0x1]  ;;  %v6415_v45 = vld [vmem:[%s8096_s26 + $0x78] sm:$0xf] }
 0x110   : > { %7241 = vmatmul.mubr.bf16.gmra.mrb[16].mxu1 %v7970_v8  ;;  %v6760_v8 = vld [vmem:[%s8096_s26 + $0x68] sm:$0x1]  ;;  %v8957_v60 = vsel %vm8219_vm5, %v6793_v2, %v5359_v6  ;;  %v5361_v10 = vrot.slane %v5359_v6, 4  ;;  %v6794_v11 = vrot.slane %v6758_v7, 9  ;;  %v6823_v12 = vcombine.low %v5346_v5, %v5349_v3  ;;  %v6416_v52 = vld [vmem:[%s8096_s26 + $0x7c] sm:$0xf] }
 0x111   : > { %7244 = vmatprep.mubr.bf16.mxu1 %v7971_v17  ;;  %v5356_v63 = vsel %vm8219_vm5, %v5354_v62, %v5355_v56  ;;  %v5366_v14 = vrot.slane %v6759_v55, 5  ;;  %v5369_v15 = vrot.slane %v6760_v8, 5  ;;  %v6762_v17 = vld [vmem:[%s8096_s26 + $0x70] sm:$0xf]  ;;  %v6795_v21 = vrot.slane %v6761_v16, 9  ;;  %v7976_v2 = vld [vmem:[%s8096_s26 + $0xc0] sm:$0xff]  }
 0x112   : > { %v6824_v18 = vcombine.low %v5353_v58, %v5356_v63  ;;  %v8964_v19 = vsel %vm8219_vm5, %v5361_v10, %v5362_v47  ;;  %v5373_v46 = vrot.slane %v6762_v17, 5  ;;  %v5376_v27 = vrot.slane %v6763_v20, 5  ;;  %v6767_v58 = vld [vmem:[%s8096_s26 + $0x84] sm:$0xe] }
 0x113   : > { %v6825_v23 = vcombine.low %v8957_v60, %v8964_v19  ;;  %v8972_v24 = vsel %vm8219_vm5, %v6794_v11, %v5366_v14  ;;  %v5368_v25 = vrot.slane %v5366_v14, 4  ;;  %v2786_v32 = vshrl.u32 %v6412_v22, 16  ;;  %v6769_v14 = vld [vmem:[%s8096_s26 + $0x8c] sm:$0x1] }
 0x114   : > { %v8978_v30 = vsel %vm8219_vm5, %v6795_v21, %v5373_v46  ;;  %v5375_v31 = vrot.slane %v5373_v46, 4  ;;  %v2789_v34 = vshll.u32 %v6412_v22, 16  ;;  %v2795_v37 = vshll.u32 %v6413_v28, 16  ;;  %v6419_v21 = vld [vmem:[%s8096_s26 + $0x88] sm:$0xf] }
 0x115   : > { %v8983_v36 = vsel %vm8219_vm5, %v5368_v25, %v5369_v15  ;;  %v2799_v38 = vshrl.u32 %v6413_v28, 16  ;;  %v2805_v39 = vshll.u32 %v6414_v29, 16  ;;  %v2788_v42 = vrot.slane %v2786_v32, 4  ;;  %v6418_v15 = vld [vmem:[%s8096_s26 + $0x84] sm:$0xf] }
 0x116   : > { %7465 = vmatmul.mubr.bf16.vlgmr.msra.gmra.mrb[0].mxu0 %v6821_v59  ;;  %v6826_v40 = vcombine.low %v8972_v24, %v8983_v36  ;;  %v2791_v43 = vrot.slane %v2789_v34, 5  ;;  %v2797_v49 = vrot.slane %v2795_v37, 5  ;;  %v5380_v56 = vrot.slane %v6765_v26, 5  ;;  %v6420_v28 = vld [vmem:[%s8096_s26 + $0x8c] sm:$0x1] }
 0x117   : > { %7468 = vmatprep.mubr.bf16.mxu0 %v6822_v61  ;;  %v2801_v50 = vrot.slane %v2799_v38, 4  ;;  %v2807_v51 = vrot.slane %v2805_v39, 5  ;;  %v5383_v57 = vrot.slane %v6766_v44, 5  ;;  %v6417_v61 = vld [vmem:[%s8096_s26 + $0x80] sm:$0x1]  ;;  %v2810_v62 = vshrl.u32 %v6415_v45, 16 }
 0x118   : > { %7245 = vmatmul.mubr.bf16.gmra.mrb[20].mxu1 %v7972_v35  ;;  %v6764_v35 = vld [vmem:[%s8096_s26 + $0x78] sm:$0xe]  ;;  %v2792_v53 = vor.u32 %v2791_v43, %v2788_v42  ;;  %v2813_v0 = vshll.u32 %v6415_v45, 16  ;;  %v2819_v1 = vshll.u32 %v6416_v52, 16  ;;  %v5382_v6 = vrot.slane %v5380_v56, 4 }
 0x119   : > { %7248 = vmatprep.mubr.bf16.mxu1 %v7973_v41  ;;  %v8990_v41 = vsel %vm8219_vm5, %v5375_v31, %v5376_v27  ;;  %v6796_v54 = vrot.slane %v6764_v35, 9  ;;  %v2802_v59 = vor.u32 %v2801_v50, %v2797_v49  ;;  %v2823_v47 = vshrl.u32 %v6416_v52, 16  ;;  %v6770_v35 = vld [vmem:[%s8096_s26 + $0x90] sm:$0xe]  ;;  %v6771_v42 = vld [vmem:[%s8096_s26 + $0x94] sm:$0xf] }
 0x11a   : > { %v6827_v48 = vcombine.low %v8978_v30, %v8990_v41  ;;  %v2793_v5 = vrot.slane %v2792_v53, 4  ;;  %v2812_v7 = vrot.slane %v2810_v62, 4  ;;  %v2815_v55 = vrot.slane %v2813_v0, 5  ;;  %v6772_v50 = vld [vmem:[%s8096_s26 + $0x98] sm:$0x1] }
 0x11b   : > { %v9001_v3 = vsel %vm8219_vm5, %v6796_v54, %v5380_v56  ;;  %v2803_v63 = vrot.slane %v2802_v59, 4  ;;  %v2821_v8 = vrot.slane %v2819_v1, 5  ;;  %v9009_v11 = vsel %vm8219_vm5, %v5382_v6, %v5383_v57  ;;  %v6421_v52 = vld [vmem:[%s8096_s26 + $0x90] sm:$0xf]  ;;  %v6422_v24 = vld [vmem:[%s8096_s26 + $0x94] sm:$0xf] }
 0x11c   : > { %v2798_v10 = vsel %vm8119_vm2, %v2793_v5, %v2797_v49  ;;  %v6828_v17 = vcombine.low %v9001_v3, %v9009_v11  ;;  %v6797_v20 = vrot.slane %v6767_v58, 9  ;;  %v5390_v31 = vrot.slane %v6769_v14, 5  ;;  %v6423_v62 = vld [vmem:[%s8096_s26 + $0x98] sm:$0x1]  ;;  %v6773_v6 = vld [vmem:[%s8096_s26 + $0x9c] sm:$0xe] }
 0x11d   : > { %v2808_v16 = vsel %vm8119_vm2, %v2803_v63, %v2807_v51  ;;  %v2834_v32 = vshrl.u32 %v6418_v15, 16  ;;  %v2837_v34 = vshll.u32 %v6418_v15, 16  ;;  %v2843_v26 = vshll.u32 %v6419_v21, 16  ;;  %v6426_v30 = vld [vmem:[%s8096_s26 + $0xa4] sm:$0x1] }
 0x11e   : > { %7469 = vmatmul.mubr.bf16.gmra.mrb[4].mxu0 %v6823_v12  ;;  %v2825_v12 = vrot.slane %v2823_v47, 4  ;;  %v6460_v46 = vcombine.low %v2798_v10, %v2808_v16  ;;  %v2847_v49 = vshrl.u32 %v6419_v21, 16  ;;  %v5394_v59 = vrot.slane %v6771_v42, 5 }
 0x11f   : > { %7472 = vmatprep.mubr.bf16.mxu0 %v6824_v18  ;;  %v2816_v18 = vor.u32 %v2815_v55, %v2812_v7  ;;  %v2836_v44 = vrot.slane %v2834_v32, 4  ;;  %v2839_v45 = vrot.slane %v2837_v34, 5  ;;  %v2845_v19 = vrot.slane %v2843_v26, 5  ;;  %v6774_v55 = vld [vmem:[%s8096_s26 + $0xa0] sm:$0xf] }
 0x120   : > { %7249 = vmatmul.mubr.bf16.gmra.mrb[24].mxu1 %v7974_v9  ;;  %v6768_v9 = vld [vmem:[%s8096_s26 + $0x88] sm:$0xf]  ;;  %v2826_v22 = vor.u32 %v2825_v12, %v2821_v8  ;;  %v2849_v57 = vrot.slane %v2847_v49, 4  ;;  %v2861_v5 = vshll.u32 %v6421_v52, 16  ;;  %v5396_v58 = vrot.slane %v5394_v59, 4 }
 0x121   : > { %7252 = vmatprep.mubr.bf16.mxu1 %v7975_v13  ;;  %v2829_v13 = vshll.u32 %v6417_v61, 16  ;;  %v5387_v27 = vrot.slane %v6768_v9, 5  ;;  %v2817_v29 = vrot.slane %v2816_v18, 4  ;;  %v2840_v56 = vor.u32 %v2839_v45, %v2836_v44  ;;  %v6778_v49 = vld [vmem:[%s8096_s26 + $0xb0] sm:$0x1] }
 0x122   : > { %v2827_v37 = vrot.slane %v2826_v22, 4  ;;  %v5397_v61 = vrot.slane %v6772_v50, 5  ;;  %v2850_v1 = vor.u32 %v2849_v57, %v2845_v19  ;;  %v2867_v63 = vshll.u32 %v6422_v24, 16 }
 0x123   : > { %v2831_v25 = vrot.slane %v2829_v13, 5  ;;  %v9022_v38 = vsel %vm8219_vm5, %v6797_v20, %v5387_v27  ;;  %v5389_v39 = vrot.slane %v5387_v27, 4  ;;  %v2822_v43 = vsel %vm8119_vm2, %v2817_v29, %v2821_v8  ;;  %v6775_v13 = vld [vmem:[%s8096_s26 + $0xa4] sm:$0x1]  ;;  %v6424_v20 = vld [vmem:[%s8096_s26 + $0x9c] sm:$0xf] }
 0x124   : > { %v2841_v0 = vrot.slane %v2840_v56, 4  ;;  %v2871_v7 = vshrl.u32 %v6422_v24, 16  ;;  %v2851_v9 = vrot.slane %v2850_v1, 4  ;;  %v2863_v12 = vrot.slane %v2861_v5, 5  ;;  %v6425_v27 = vld [vmem:[%s8096_s26 + $0xa0] sm:$0xf] }
 0x125   : > { %v2832_v51 = vsel %vm8119_vm2, %v2827_v37, %v2831_v25  ;;  %v9038_v60 = vsel %vm8219_vm5, %v5389_v39, %v5390_v31  ;;  %v5398_v14 = vsel %vm8219_vm5, %v5396_v58, %v5397_v61  ;;  %v2869_v15 = vrot.slane %v2867_v63, 5  ;;  %v6776_v37 = vld [vmem:[%s8096_s26 + $0xa8] sm:$0xe] }
 0x126   : > { %7473 = vmatmul.mubr.bf16.gmra.mrb[8].mxu0 %v6825_v23  ;;  %v2853_v23 = vshll.u32 %v6420_v28, 16  ;;  %v6461_v53 = vcombine.low %v2822_v43, %v2832_v51  ;;  %v6829_v54 = vcombine.low %v9022_v38, %v9038_v60  ;;  %v2846_v8 = vsel %vm8119_vm2, %v2841_v0, %v2845_v19  ;;  %v6429_v0 = vld [vmem:[%s8096_s26 + $0xb0] sm:$0x1] }
 0x127   : > { %7476 = vmatprep.mubr.bf16.mxu0 %v6826_v40  ;;  %v6798_v40 = vrot.slane %v6770_v35, 9  ;;  %v2873_v16 = vrot.slane %v2871_v7, 4  ;;  %v2877_v18 = vshll.u32 %v6423_v62, 16  ;;  %v6799_v25 = vrot.slane %v6773_v6, 9 }
 0x128   : > { %7253 = vmatmul.mubr.bf16.gmra.mrb[28].mxu1 %v7976_v2  ;;  %v2855_v36 = vrot.slane %v2853_v23, 5  ;;  %v2858_v2 = vshrl.u32 %v6421_v52, 16  ;;  %v5401_v32 = vrot.slane %v6774_v55, 5  ;;  %v2882_v34 = vshrl.u32 %v6424_v20, 16  ;;  %v6427_v52 = vld [vmem:[%s8096_s26 + $0xa8] sm:$0xf] }
 0x129   : > { %7288 = vmatprep.mubr.bf16.mxu1 %v6460_v46  ;;  %v9048_v47 = vsel %vm8219_vm5, %v6798_v40, %v5394_v59  ;;  %v2874_v29 = vor.u32 %v2873_v16, %v2869_v15  ;;  %v2879_v31 = vrot.slane %v2877_v18, 5  ;;  %v2885_v35 = vshll.u32 %v6424_v20, 16  ;;  %v6430_v16 = vld [vmem:[%s8096_s26 + $0xb4] sm:$0xf] }
 0x12a   : > { %v2860_v10 = vrot.slane %v2858_v2, 4  ;;  %v2856_v21 = vsel %vm8119_vm2, %v2851_v9, %v2855_v36  ;;  %v6830_v46 = vcombine.low %v9048_v47, %v5398_v14  ;;  %v9071_v26 = vsel %vm8219_vm5, %v6799_v25, %v5401_v32  ;;  %v6428_v36 = vld [vmem:[%s8096_s26 + $0xac] sm:$0xf]  ;;  %v6779_v47 = vld [vmem:[%s8096_s26 + $0xb4] sm:$0xe] }
 0x12b   : > { %v6462_v28 = vcombine.low %v2846_v8, %v2856_v21  ;;  %v2875_v39 = vrot.slane %v2874_v29, 4  ;;  %v5403_v3 = vrot.slane %v5401_v32, 4  ;;  %v2891_v11 = vshll.u32 %v6425_v27, 16  ;;  %v6780_v8 = vld [vmem:[%s8096_s26 + $0xb8] sm:$0xf] }
 0x12c   : > { %v2864_v22 = vor.u32 %v2863_v12, %v2860_v10  ;;  %v2884_v43 = vrot.slane %v2882_v34, 4  ;;  %v2887_v44 = vrot.slane %v2885_v35, 5  ;;  %v2895_v45 = vshrl.u32 %v6425_v27, 16  ;;  %v6781_v10 = vld [vmem:[%s8096_s26 + $0xbc] sm:$0x1] }
 0x12d   : > { %v2880_v50 = vsel %vm8119_vm2, %v2875_v39, %v2879_v31  ;;  %v2893_v19 = vrot.slane %v2891_v11, 5  ;;  %v2901_v23 = vshll.u32 %v6426_v30, 16  ;;  %v6800_v59 = vrot.slane %v6776_v37, 9  ;;  %v6432_v31 = vld [vmem:[%s8096_s26 + $0xbc] sm:$0x1] }
 0x12e   : > { %7477 = vmatmul.mubr.bf16.gmra.mrb[12].mxu0 %v6827_v48  ;;  %v2865_v41 = vrot.slane %v2864_v22, 4  ;;  %v5404_v48 = vrot.slane %v6775_v13, 5  ;;  %v2888_v57 = vor.u32 %v2887_v44, %v2884_v43  ;;  %v2897_v24 = vrot.slane %v2895_v45, 4  ;;  %v6431_v22 = vld [vmem:[%s8096_s26 + $0xb8] sm:$0xf] }
 0x12f   : > { %7480 = vmatprep.mubr.bf16.mxu0 %v6828_v17  ;;  %v6777_v17 = vld [vmem:[%s8096_s26 + $0xac] sm:$0xf]  ;;  %v2903_v40 = vrot.slane %v2901_v23, 5  ;;  %v5411_v62 = vrot.slane %v6778_v49, 5  ;;  %v2906_v5 = vshrl.u32 %v6427_v52, 16  ;;  %v2909_v6 = vshll.u32 %v6427_v52, 16 }
 0x130   : > { %7289 = vmatmul.mubr.bf16.vlgmr.msra.gmra.mrb[16].mxu1 %v6461_v53  ;;  %v2870_v42 = vsel %vm8119_vm2, %v2865_v41, %v2869_v15  ;;  %v5405_v51 = vsel %vm8219_vm5, %v5403_v3, %v5404_v48  ;;  %v5408_v61 = vrot.slane %v6777_v17, 5  ;;  %v2889_v1 = vrot.slane %v2888_v57, 4  ;;  %v6782_v34 = vld [vmem:[%s8096_s26 + $0xc0] sm:$0xe]  ;;  %v6783_v3 = vld [vmem:[%s8096_s26 + $0xc4] sm:$0xf] }
 0x131   : > { %7292 = vmatprep.mubr.bf16.mxu1 %v6462_v28  ;;  %v6463_v53 = vcombine.low %v2870_v42, %v2880_v50  ;;  %v6831_v56 = vcombine.low %v9071_v26, %v5405_v51  ;;  %v2898_v2 = vor.u32 %v2897_v24, %v2893_v19  ;;  %v2915_v7 = vshll.u32 %v6428_v36, 16  ;;  %v6784_v44 = vld [vmem:[%s8096_s26 + $0xc8] sm:$0x1]  ;;  %v6434_v57 = vld [vmem:[%s8096_s26 + $0xc4] sm:$0xf] }
 0x132   : > { %v5409_v58 = vsel %vm8219_vm5, %v6800_v59, %v5408_v61  ;;  %v5410_v63 = vrot.slane %v5408_v61, 4  ;;  %v2919_v55 = vshrl.u32 %v6428_v36, 16  ;;  %v2894_v38 = vsel %vm8119_vm2, %v2889_v1, %v2893_v19  ;;  %v6433_v19 = vld [vmem:[%s8096_s26 + $0xc0] sm:$0xf] }
 0x133   : > { %v2899_v60 = vrot.slane %v2898_v2, 4  ;;  %v2911_v9 = vrot.slane %v2909_v6, 5  ;;  %v2917_v13 = vrot.slane %v2915_v7, 5  ;;  %v2925_v15 = vshll.u32 %v6429_v0, 16  ;;  %v6435_v0 = vld [vmem:[%s8096_s26 + $0xc8] sm:$0x1] }
 0x134   : > { %v5412_v12 = vsel %vm8219_vm5, %v5410_v63, %v5411_v62  ;;  %v2921_v14 = vrot.slane %v2919_v55, 4  ;;  %v5415_v29 = vrot.slane %v6780_v8, 5  ;;  %v5418_v30 = vrot.slane %v6781_v10, 5  ;;  %v6785_v63 = vld [vmem:[%s8096_s26 + $0xcc] sm:$0xe] }
 0x135   : > { %v2904_v18 = vsel %vm8119_vm2, %v2899_v60, %v2903_v40  ;;  %v6832_v20 = vcombine.low %v5409_v58, %v5412_v12  ;;  %v2927_v28 = vrot.slane %v2925_v15, 5  ;;  %v2930_v41 = vshrl.u32 %v6430_v16, 16  ;;  %v6786_v60 = vld [vmem:[%s8096_s26 + $0xd0] sm:$0xf] }
 0x136   : > { %7481 = vmatmul.mubr.bf16.gmra.mrb[16].mxu0 %v6829_v54  ;;  %v2908_v54 = vrot.slane %v2906_v5, 4  ;;  %v6464_v25 = vcombine.low %v2894_v38, %v2904_v18  ;;  %v2922_v27 = vor.u32 %v2921_v14, %v2917_v13  ;;  %v2933_v48 = vshll.u32 %v6430_v16, 16 }
 0x137   : > { %7484 = vmatprep.mubr.bf16.mxu0 %v6830_v46  ;;  %v6801_v46 = vrot.slane %v6779_v47, 9  ;;  %v5417_v39 = vrot.slane %v5415_v29, 4  ;;  %v2939_v26 = vshll.u32 %v6431_v22, 16  ;;  %v2932_v17 = vrot.slane %v2930_v41, 4 }
 0x138   : > { %7293 = vmatmul.mubr.bf16.gmra.mrb[20].mxu1 %v6463_v53  ;;  %v2912_v21 = vor.u32 %v2911_v9, %v2908_v54  ;;  %v2923_v35 = vrot.slane %v2922_v27, 4  ;;  %v2935_v42 = vrot.slane %v2933_v48, 5  ;;  %v2943_v43 = vshrl.u32 %v6431_v22, 16 }
 0x139   : > { %7296 = vmatprep.mubr.bf16.mxu1 %v6464_v25  ;;  %v5416_v37 = vsel %vm8219_vm5, %v6801_v46, %v5415_v29  ;;  %v5419_v49 = vsel %vm8219_vm5, %v5417_v39, %v5418_v30  ;;  %v2941_v50 = vrot.slane %v2939_v26, 5  ;;  %v2949_v51 = vshll.u32 %v6432_v31, 16 }
 0x13a   : > { %v2913_v32 = vrot.slane %v2912_v21, 4  ;;  %v2928_v45 = vsel %vm8119_vm2, %v2923_v35, %v2927_v28  ;;  %v6833_v52 = vcombine.low %v5416_v37, %v5419_v49  ;;  %v2936_v53 = vor.u32 %v2935_v42, %v2932_v17 }
 0x13b   : > { %v2951_v24 = vrot.slane %v2949_v51, 5  ;;  %v6802_v36 = vrot.slane %v6782_v34, 9  ;;  %v5422_v40 = vrot.slane %v6783_v3, 5  ;;  %v5425_v59 = vrot.slane %v6784_v44, 5 }
 0x13c   : > { %v2918_v11 = vsel %vm8119_vm2, %v2913_v32, %v2917_v13  ;;  %v2937_v61 = vrot.slane %v2936_v53, 4  ;;  %v2954_v1 = vshrl.u32 %v6433_v19, 16  ;;  %v2957_v2 = vshll.u32 %v6433_v19, 16  ;;  %v6787_v13 = vld [vmem:[%s8096_s26 + $0xd4] sm:$0x1]  ;;  %s6847_s26 = sshll.u32 %s9263_s18, 8 }
 0x13d   : > { %v6465_v23 = vcombine.low %v2918_v11, %v2928_v45  ;;  %v5423_v5 = vsel %vm8219_vm5, %v6802_v36, %v5422_v40  ;;  %v5424_v6 = vrot.slane %v5422_v40, 4  ;;  %v2963_v47 = vshll.u32 %v6434_v57, 16  ;;  %s9158_s29 = scalar_lea.vmem %s9251_s3, %s6847_s26 }
 0x13e   : > { %7485 = vmatmul.mubr.bf16.gmra.mrb[20].mxu0 %v6831_v56  ;;  %v2945_v56 = vrot.slane %v2943_v43, 4  ;;  %v2967_v58 = vshrl.u32 %v6434_v57, 16  ;;  %v2942_v7 = vsel %vm8119_vm2, %v2937_v61, %v2941_v50  ;;  %v2956_v8 = vrot.slane %v2954_v1, 4 }
 0x13f   : > { %7488 = vmatprep.mubr.bf16.mxu0 %v6832_v20  ;;  %v2959_v38 = vrot.slane %v2957_v2, 5  ;;  %v5426_v54 = vsel %vm8219_vm5, %v5424_v6, %v5425_v59  ;;  %v2965_v9 = vrot.slane %v2963_v47, 5  ;;  %v2973_v12 = vshll.u32 %v6435_v0, 16 }
 0x140   : > { %7297 = vmatmul.mubr.bf16.gmra.mrb[24].mxu1 %v6465_v23  ;;  %v2946_v62 = vor.u32 %v2945_v56, %v2941_v50  ;;  %v2969_v10 = vrot.slane %v2967_v58, 4  ;;  %v6834_v15 = vcombine.low %v5423_v5, %v5426_v54  ;;  %v6803_v18 = vrot.slane %v6785_v63, 9  ;;  %v9153_v23 = vld [vmem:[%s9250_s2] ss:$0 sm:$0xff] }
 0x141   : > { %v2960_v16 = vor.u32 %v2959_v38, %v2956_v8  ;;  %v2975_v46 = vrot.slane %v2973_v12, 5  ;;  %v5429_v22 = vrot.slane %v6786_v60, 5  ;;  %v5432_v27 = vrot.slane %v6787_v13, 5 }
 0x142   : > { %v2947_v55 = vrot.slane %v2946_v62, 4  ;;  %v2970_v21 = vor.u32 %v2969_v10, %v2965_v9 }
 0x143   : > { %v2961_v25 = vrot.slane %v2960_v16, 4  ;;  %v5430_v29 = vsel %vm8219_vm5, %v6803_v18, %v5429_v22  ;;  %v5431_v31 = vrot.slane %v5429_v22, 4 }
 0x144   : > { %v2952_v14 = vsel %vm8119_vm2, %v2947_v55, %v2951_v24  ;;  %v2971_v28 = vrot.slane %v2970_v21, 4 }
 0x145   : > { %v6466_v20 = vcombine.low %v2942_v7, %v2952_v14  ;;  %v2966_v32 = vsel %vm8119_vm2, %v2961_v25, %v2965_v9  ;;  %v5433_v41 = vsel %vm8219_vm5, %v5431_v31, %v5432_v27 }
 0x146   : > { %7489 = vmatmul.mubr.bf16.gmra.mrb[24].mxu0 %v6833_v52  ;;  %v2976_v30 = vsel %vm8119_vm2, %v2971_v28, %v2975_v46  ;;  %v6835_v34 = vcombine.low %v5430_v29, %v5433_v41 }
 0x147   : > { %7492 = vmatprep.mubr.bf16.mxu0 %v6834_v15  ;;  %7300 = vmatprep.mubr.bf16.mxu1 %v6466_v20  ;;  %v6467_v48 = vcombine.low %v2966_v32, %v2976_v30 }
 0x149   : > { %7301 = vmatmul.mubr.bf16.gmra.mrb[28].mxu1 %v6467_v48 }
 0x14e   : > { %7493 = vmatmul.mubr.bf16.gmra.mrb[28].mxu0 %v6835_v34 }
 0x1c3   : > { %v7226_v35 = vpop.f32.mrb[0].mxu1 }
 0x1c4   : > { %v2322_v37 = vpop.f32.mrb[1].mxu1 }
 0x1c5   : > { %v7227_v39 = vpop.f32.mrb[2].mxu1 }
 0x1c6   : > { %v2325_v26 = vpop.f32.mrb[3].mxu1 }
 0x1cb   : > { %v7230_v3 = vpop.f32.mrb[4].mxu1 }
 0x1cc   : > { %v2338_v11 = vpop.f32.mrb[5].mxu1 }
 0x1cd   : > { %v7231_v17 = vpop.f32.mrb[6].mxu1 }
 0x1ce   : > { %v2341_v42 = vpop.f32.mrb[7].mxu1 }
 0x1d3   : > { %v7234_v43 = vpop.f32.mrb[8].mxu1 }
 0x1d4   : > { %v9135_v44 = vpop.f32.mrb[9].mxu1 }
 0x1d5   : > { %v9137_v33 = vpop.f32.mrb[10].mxu1 }
 0x1d6   : > { %v9139_v4 = vpop.f32.mrb[11].mxu1 }
 0x1db   : > { %v9141_v45 = vpop.f32.mrb[12].mxu1 }
 0x1dc   : > { %v9143_v49 = vpop.f32.mrb[13].mxu1 }
 0x1dd   : > { %v9145_v50 = vpop.f32.mrb[14].mxu1 }
 0x1de   : > { %v9147_v51 = vpop.f32.mrb[15].mxu1 }
 0x1e9   : > { %v7466_v19 = vpop.f32.mrb[0].mxu0 }
 0x1ea   : > { %v7514_v52 = vadd.f32 %v7466_v19, %v7226_v35  ;;  %v5597_v53 = vpop.f32.mrb[1].mxu0 }
 0x1eb   : > { %v7517_v56 = vadd.f32 %v5597_v53, %v2322_v37  ;;  %v7467_v57 = vpop.f32.mrb[2].mxu0 }
 0x1ec   : > { %v5861_v24 = vadd.f32 %v7514_v52, %v9153_v23  ;;  %v7520_v36 = vadd.f32 %v7467_v57, %v7227_v39  ;;  %v5600_v40 = vpop.f32.mrb[3].mxu0 }
 0x1ed   : > { %v5859_v59 = vadd.f32 %v7517_v56, %v9153_v23  ;;  %v7523_v61 = vadd.f32 %v5600_v40, %v2325_v26 }
 0x1ee   : > { %5893 = vst [vmem:[%s9158_s29 + $0x10] sm:$0xff] %v5861_v24  ;;  %v5862_v62 = vadd.f32 %v7520_v36, %v9153_v23  ;;  %v5963_v63 = vmul.f32 %v5861_v24, %v5861_v24 }
 0x1ef   : > { %5891 = vst [vmem:[%s9158_s29] sm:$0xff] %v5859_v59  ;;  %v5860_v0 = vadd.f32 %v7523_v61, %v9153_v23  ;;  %v5961_v1 = vmul.f32 %v5859_v59, %v5859_v59 }
 0x1f0   : > { %5894 = vst [vmem:[%s9158_s29 + $0x18] sm:$0xff] %v5862_v62  ;;  %v5964_v60 = vmul.f32 %v5862_v62, %v5862_v62 }
 0x1f1   : > { %5892 = vst [vmem:[%s9158_s29 + $0x8] sm:$0xff] %v5860_v0  ;;  %v5923_v2 = vadd.f32 %v5860_v0, %v5859_v59  ;;  %v5962_v5 = vmul.f32 %v5860_v0, %v5860_v0  ;;  %v7470_v6 = vpop.f32.mrb[4].mxu0 }
 0x1f2   : > { %v7526_v47 = vadd.f32 %v7470_v6, %v7230_v3  ;;  %v5613_v58 = vpop.f32.mrb[5].mxu0 }
 0x1f3   : > { %v5924_v7 = vadd.f32 %v5923_v2, %v5861_v24  ;;  %v5993_v55 = vadd.f32 %v5962_v5, %v5961_v1  ;;  %v7529_v8 = vadd.f32 %v5613_v58, %v2338_v11  ;;  %v7471_v38 = vpop.f32.mrb[6].mxu0 }
 0x1f4   : > { %v5865_v54 = vadd.f32 %v7526_v47, %v9153_v23  ;;  %v7532_v9 = vadd.f32 %v7471_v38, %v7231_v17  ;;  %v5616_v10 = vpop.f32.mrb[7].mxu0 }
 0x1f5   : > { %v5994_v12 = vadd.f32 %v5993_v55, %v5963_v63  ;;  %v5863_v13 = vadd.f32 %v7529_v8, %v9153_v23  ;;  %v5925_v14 = vadd.f32 %v5924_v7, %v5862_v62  ;;  %v7535_v15 = vadd.f32 %v5616_v10, %v2341_v42 }
 0x1f6   : > { %5897 = vst [vmem:[%s9158_s29 + $0x30] sm:$0xff] %v5865_v54  ;;  %v5866_v16 = vadd.f32 %v7532_v9, %v9153_v23  ;;  %v5967_v32 = vmul.f32 %v5865_v54, %v5865_v54 }
 0x1f7   : > { %5895 = vst [vmem:[%s9158_s29 + $0x20] sm:$0xff] %v5863_v13  ;;  %v5926_v18 = vadd.f32 %v5925_v14, %v5863_v13  ;;  %v5965_v20 = vmul.f32 %v5863_v13, %v5863_v13  ;;  %v5995_v21 = vadd.f32 %v5994_v12, %v5964_v60  ;;  %v5864_v46 = vadd.f32 %v7535_v15, %v9153_v23 }
 0x1f8   : > { %5898 = vst [vmem:[%s9158_s29 + $0x38] sm:$0xff] %v5866_v16  ;;  %v5968_v35 = vmul.f32 %v5866_v16, %v5866_v16 }
 0x1f9   : > { %v5996_v22 = vadd.f32 %v5995_v21, %v5965_v20  ;;  %5896 = vst [vmem:[%s9158_s29 + $0x28] sm:$0xff] %v5864_v46  ;;  %v5927_v25 = vadd.f32 %v5926_v18, %v5864_v46  ;;  %v5966_v27 = vmul.f32 %v5864_v46, %v5864_v46  ;;  %v7474_v28 = vpop.f32.mrb[8].mxu0 }
 0x1fa   : > { %v7538_v29 = vadd.f32 %v7474_v28, %v7234_v43  ;;  %v5629_v31 = vpop.f32.mrb[9].mxu0 }
 0x1fb   : > { %v5928_v30 = vadd.f32 %v5927_v25, %v5865_v54  ;;  %v5997_v41 = vadd.f32 %v5996_v22, %v5966_v27  ;;  %v7541_v48 = vadd.f32 %v5629_v31, %v9135_v44  ;;  %v7475_v34 = vpop.f32.mrb[10].mxu0 }
 0x1fc   : > { %v5869_v37 = vadd.f32 %v7538_v29, %v9153_v23  ;;  %v7544_v39 = vadd.f32 %v7475_v34, %v9137_v33  ;;  %v5632_v26 = vpop.f32.mrb[11].mxu0 }
 0x1fd   : > { %v5998_v3 = vadd.f32 %v5997_v41, %v5967_v32  ;;  %v5867_v11 = vadd.f32 %v7541_v48, %v9153_v23  ;;  %v5929_v17 = vadd.f32 %v5928_v30, %v5866_v16  ;;  %v7547_v42 = vadd.f32 %v5632_v26, %v9139_v4 }
 0x1fe   : > { %5901 = vst [vmem:[%s9158_s29 + $0x50] sm:$0xff] %v5869_v37  ;;  %v5870_v43 = vadd.f32 %v7544_v39, %v9153_v23  ;;  %v5971_v0 = vmul.f32 %v5869_v37, %v5869_v37 }
 0x1ff   : > { %5899 = vst [vmem:[%s9158_s29 + $0x40] sm:$0xff] %v5867_v11  ;;  %v5930_v44 = vadd.f32 %v5929_v17, %v5867_v11  ;;  %v5969_v52 = vmul.f32 %v5867_v11, %v5867_v11  ;;  %v5999_v53 = vadd.f32 %v5998_v3, %v5968_v35  ;;  %v5868_v56 = vadd.f32 %v7547_v42, %v9153_v23 }
 0x200   : > { %5902 = vst [vmem:[%s9158_s29 + $0x58] sm:$0xff] %v5870_v43  ;;  %v5972_v47 = vmul.f32 %v5870_v43, %v5870_v43 }
 0x201   : > { %v6000_v24 = vadd.f32 %v5999_v53, %v5969_v52  ;;  %5900 = vst [vmem:[%s9158_s29 + $0x48] sm:$0xff] %v5868_v56  ;;  %v5931_v36 = vadd.f32 %v5930_v44, %v5868_v56  ;;  %v5970_v40 = vmul.f32 %v5868_v56, %v5868_v56  ;;  %v7478_v59 = vpop.f32.mrb[12].mxu0 }
 0x202   : > { %v7550_v4 = vadd.f32 %v7478_v59, %v9141_v45  ;;  %v5645_v62 = vpop.f32.mrb[13].mxu0 }
 0x203   : > { %v7290_v19 = vpop.f32.mrb[16].mxu1  ;;  %v5932_v1 = vadd.f32 %v5931_v36, %v5869_v37  ;;  %v6001_v2 = vadd.f32 %v6000_v24, %v5970_v40  ;;  %v7553_v5 = vadd.f32 %v5645_v62, %v9143_v49  ;;  %v7479_v6 = vpop.f32.mrb[14].mxu0 }
 0x204   : > { %v3204_v57 = vpop.f32.mrb[17].mxu1  ;;  %v5873_v58 = vadd.f32 %v7550_v4, %v9153_v23  ;;  %v7556_v63 = vadd.f32 %v7479_v6, %v9145_v50  ;;  %v5648_v7 = vpop.f32.mrb[15].mxu0 }
 0x205   : > { %v7291_v33 = vpop.f32.mrb[18].mxu1  ;;  %v6002_v55 = vadd.f32 %v6001_v2, %v5971_v0  ;;  %v5871_v8 = vadd.f32 %v7553_v5, %v9153_v23  ;;  %v5933_v45 = vadd.f32 %v5932_v1, %v5870_v43  ;;  %v7559_v38 = vadd.f32 %v5648_v7, %v9147_v51 }
 0x206   : > { %v3207_v61 = vpop.f32.mrb[19].mxu1  ;;  %5905 = vst [vmem:[%s9158_s29 + $0x70] sm:$0xff] %v5873_v58  ;;  %v5874_v60 = vadd.f32 %v7556_v63, %v9153_v23  ;;  %v5975_v51 = vmul.f32 %v5873_v58, %v5873_v58 }
 0x207   : > { %5903 = vst [vmem:[%s9158_s29 + $0x60] sm:$0xff] %v5871_v8  ;;  %v5934_v49 = vadd.f32 %v5933_v45, %v5871_v8  ;;  %v5973_v54 = vmul.f32 %v5871_v8, %v5871_v8  ;;  %v6003_v9 = vadd.f32 %v6002_v55, %v5972_v47  ;;  %v5872_v10 = vadd.f32 %v7559_v38, %v9153_v23 }
 0x208   : > { %5906 = vst [vmem:[%s9158_s29 + $0x78] sm:$0xff] %v5874_v60  ;;  %v5976_v28 = vmul.f32 %v5874_v60, %v5874_v60 }
 0x209   : > { %v6004_v12 = vadd.f32 %v6003_v9, %v5973_v54  ;;  %5904 = vst [vmem:[%s9158_s29 + $0x68] sm:$0xff] %v5872_v10  ;;  %v5935_v50 = vadd.f32 %v5934_v49, %v5872_v10  ;;  %v5974_v13 = vmul.f32 %v5872_v10, %v5872_v10  ;;  %v7482_v14 = vpop.f32.mrb[16].mxu0 }
 0x20a   : > { %v7562_v16 = vadd.f32 %v7482_v14, %v7290_v19  ;;  %v5661_v18 = vpop.f32.mrb[17].mxu0 }
 0x20b   : > { %v7294_v15 = vpop.f32.mrb[20].mxu1  ;;  %v5936_v21 = vadd.f32 %v5935_v50, %v5873_v58  ;;  %v6005_v46 = vadd.f32 %v6004_v12, %v5974_v13  ;;  %v7565_v22 = vadd.f32 %v5661_v18, %v3204_v57  ;;  %v7483_v25 = vpop.f32.mrb[18].mxu0 }
 0x20c   : > { %v3220_v20 = vpop.f32.mrb[21].mxu1  ;;  %v5877_v29 = vadd.f32 %v7562_v16, %v9153_v23  ;;  %v7568_v31 = vadd.f32 %v7483_v25, %v7291_v33  ;;  %v5664_v32 = vpop.f32.mrb[19].mxu0 }
 0x20d   : > { %v7295_v27 = vpop.f32.mrb[22].mxu1  ;;  %v6006_v41 = vadd.f32 %v6005_v46, %v5975_v51  ;;  %v5875_v48 = vadd.f32 %v7565_v22, %v9153_v23  ;;  %v5937_v34 = vadd.f32 %v5936_v21, %v5874_v60  ;;  %v7571_v35 = vadd.f32 %v5664_v32, %v3207_v61 }
 0x20e   : > { %v3223_v30 = vpop.f32.mrb[23].mxu1  ;;  %5909 = vst [vmem:[%s9158_s29 + $0x90] sm:$0xff] %v5877_v29  ;;  %v5878_v37 = vadd.f32 %v7568_v31, %v9153_v23  ;;  %v5979_v53 = vmul.f32 %v5877_v29, %v5877_v29 }
 0x20f   : > { %5907 = vst [vmem:[%s9158_s29 + $0x80] sm:$0xff] %v5875_v48  ;;  %v5938_v39 = vadd.f32 %v5937_v34, %v5875_v48  ;;  %v5977_v26 = vmul.f32 %v5875_v48, %v5875_v48  ;;  %v6007_v3 = vadd.f32 %v6006_v41, %v5976_v28  ;;  %v5876_v11 = vadd.f32 %v7571_v35, %v9153_v23 }
 0x210   : > { %5910 = vst [vmem:[%s9158_s29 + $0x98] sm:$0xff] %v5878_v37  ;;  %v5980_v36 = vmul.f32 %v5878_v37, %v5878_v37 }
 0x211   : > { %v6008_v17 = vadd.f32 %v6007_v3, %v5977_v26  ;;  %5908 = vst [vmem:[%s9158_s29 + $0x88] sm:$0xff] %v5876_v11  ;;  %v5939_v42 = vadd.f32 %v5938_v39, %v5876_v11  ;;  %v5978_v43 = vmul.f32 %v5876_v11, %v5876_v11  ;;  %v7486_v19 = vpop.f32.mrb[20].mxu0 }
 0x212   : > { %v7574_v44 = vadd.f32 %v7486_v19, %v7294_v15  ;;  %v5677_v52 = vpop.f32.mrb[21].mxu0 }
 0x213   : > { %v5940_v56 = vadd.f32 %v5939_v42, %v5877_v29  ;;  %v6009_v57 = vadd.f32 %v6008_v17, %v5978_v43  ;;  %v7577_v33 = vadd.f32 %v5677_v52, %v3220_v20  ;;  %v7487_v24 = vpop.f32.mrb[22].mxu0  ;;  %v7298_v2 = vpop.f32.mrb[24].mxu1 }
 0x214   : > { %v5881_v40 = vadd.f32 %v7574_v44, %v9153_v23  ;;  %v7580_v59 = vadd.f32 %v7487_v24, %v7295_v27  ;;  %v5680_v61 = vpop.f32.mrb[23].mxu0  ;;  %v3236_v6 = vpop.f32.mrb[25].mxu1 }
 0x215   : > { %v6010_v4 = vadd.f32 %v6009_v57, %v5979_v53  ;;  %v5879_v62 = vadd.f32 %v7577_v33, %v9153_v23  ;;  %v5941_v0 = vadd.f32 %v5940_v56, %v5878_v37  ;;  %v7583_v1 = vadd.f32 %v5680_v61, %v3223_v30  ;;  %v7299_v55 = vpop.f32.mrb[26].mxu1 }
 0x216   : > { %5913 = vst [vmem:[%s9158_s29 + $0xb0] sm:$0xff] %v5881_v40  ;;  %v5882_v5 = vadd.f32 %v7580_v59, %v9153_v23  ;;  %v3239_v8 = vpop.f32.mrb[27].mxu1  ;;  %v5983_v10 = vmul.f32 %v5881_v40, %v5881_v40 }
 0x217   : > { %5911 = vst [vmem:[%s9158_s29 + $0xa0] sm:$0xff] %v5879_v62  ;;  %v5942_v47 = vadd.f32 %v5941_v0, %v5879_v62  ;;  %v5981_v58 = vmul.f32 %v5879_v62, %v5879_v62  ;;  %v6011_v63 = vadd.f32 %v6010_v4, %v5980_v36  ;;  %v5880_v7 = vadd.f32 %v7583_v1, %v9153_v23 }
 0x218   : > { %5914 = vst [vmem:[%s9158_s29 + $0xb8] sm:$0xff] %v5882_v5  ;;  %v5984_v15 = vmul.f32 %v5882_v5, %v5882_v5 }
 0x219   : > { %v6012_v45 = vadd.f32 %v6011_v63, %v5981_v58  ;;  %5912 = vst [vmem:[%s9158_s29 + $0xa8] sm:$0xff] %v5880_v7  ;;  %v5943_v38 = vadd.f32 %v5942_v47, %v5880_v7  ;;  %v5982_v60 = vmul.f32 %v5880_v7, %v5880_v7  ;;  %v7490_v49 = vpop.f32.mrb[24].mxu0 }
 0x21a   : > { %v7586_v54 = vadd.f32 %v7490_v49, %v7298_v2  ;;  %v5693_v9 = vpop.f32.mrb[25].mxu0 }
 0x21b   : > { %v5944_v12 = vadd.f32 %v5943_v38, %v5881_v40  ;;  %v6013_v50 = vadd.f32 %v6012_v45, %v5982_v60  ;;  %v7589_v13 = vadd.f32 %v5693_v9, %v3236_v6  ;;  %v7491_v14 = vpop.f32.mrb[26].mxu0 }
 0x21c   : > { %v5885_v16 = vadd.f32 %v7586_v54, %v9153_v23  ;;  %v7592_v18 = vadd.f32 %v7491_v14, %v7299_v55  ;;  %v5696_v20 = vpop.f32.mrb[27].mxu0  ;;  %v7302_v48 = vpop.f32.mrb[28].mxu1 }
 0x21d   : > { %v6014_v51 = vadd.f32 %v6013_v50, %v5983_v10  ;;  %v5883_v21 = vadd.f32 %v7589_v13, %v9153_v23  ;;  %v5945_v46 = vadd.f32 %v5944_v12, %v5882_v5  ;;  %v7595_v22 = vadd.f32 %v5696_v20, %v3239_v8  ;;  %v3252_v37 = vpop.f32.mrb[29].mxu1 }
 0x21e   : > { %5917 = vst [vmem:[%s9158_s29 + $0xd0] sm:$0xff] %v5885_v16  ;;  %v5886_v25 = vadd.f32 %v7592_v18, %v9153_v23  ;;  %v5987_v26 = vmul.f32 %v5885_v16, %v5885_v16  ;;  %v7303_v42 = vpop.f32.mrb[30].mxu1 }
 0x21f   : > { %5915 = vst [vmem:[%s9158_s29 + $0xc0] sm:$0xff] %v5883_v21  ;;  %v5946_v27 = vadd.f32 %v5945_v46, %v5883_v21  ;;  %v5985_v28 = vmul.f32 %v5883_v21, %v5883_v21  ;;  %v6015_v29 = vadd.f32 %v6014_v51, %v5984_v15  ;;  %v5884_v31 = vadd.f32 %v7595_v22, %v9153_v23  ;;  %v3255_v53 = vpop.f32.mrb[31].mxu1 }
 0x220   : > { %5918 = vst [vmem:[%s9158_s29 + $0xd8] sm:$0xff] %v5886_v25  ;;  %v5988_v19 = vmul.f32 %v5886_v25, %v5886_v25 }
 0x221   : > { %v6016_v32 = vadd.f32 %v6015_v29, %v5985_v28  ;;  %5916 = vst [vmem:[%s9158_s29 + $0xc8] sm:$0xff] %v5884_v31  ;;  %v5947_v30 = vadd.f32 %v5946_v27, %v5884_v31  ;;  %v5986_v41 = vmul.f32 %v5884_v31, %v5884_v31  ;;  %v7494_v34 = vpop.f32.mrb[28].mxu0 }
 0x222   : > { %v7598_v35 = vadd.f32 %v7494_v34, %v7302_v48  ;;  %v5709_v39 = vpop.f32.mrb[29].mxu0 }
 0x223   : > { %v5948_v3 = vadd.f32 %v5947_v30, %v5885_v16  ;;  %v6017_v11 = vadd.f32 %v6016_v32, %v5986_v41  ;;  %v7601_v17 = vadd.f32 %v5709_v39, %v3252_v37  ;;  %v7495_v43 = vpop.f32.mrb[30].mxu0 }
 0x224   : > { %v5889_v44 = vadd.f32 %v7598_v35, %v9153_v23  ;;  %v7604_v52 = vadd.f32 %v7495_v43, %v7303_v42  ;;  %v5712_v56 = vpop.f32.mrb[31].mxu0 }
 0x225   : > { %v6018_v57 = vadd.f32 %v6017_v11, %v5987_v26  ;;  %v5887_v33 = vadd.f32 %v7601_v17, %v9153_v23  ;;  %v5949_v24 = vadd.f32 %v5948_v3, %v5886_v25  ;;  %v7607_v36 = vadd.f32 %v5712_v56, %v3255_v53 }
 0x226   : > { %5921 = vst [vmem:[%s9158_s29 + $0xf0] sm:$0xff] %v5889_v44  ;;  %v5890_v40 = vadd.f32 %v7604_v52, %v9153_v23  ;;  %v5991_v5 = vmul.f32 %v5889_v44, %v5889_v44 }
 0x227   : > { %5919 = vst [vmem:[%s9158_s29 + $0xe0] sm:$0xff] %v5887_v33  ;;  %v5950_v59 = vadd.f32 %v5949_v24, %v5887_v33  ;;  %v5989_v61 = vmul.f32 %v5887_v33, %v5887_v33  ;;  %v6019_v4 = vadd.f32 %v6018_v57, %v5988_v19  ;;  %v5888_v62 = vadd.f32 %v7607_v36, %v9153_v23 }
 0x228   : > { %5922 = vst [vmem:[%s9158_s29 + $0xf8] sm:$0xff] %v5890_v40  ;;  %v5992_v58 = vmul.f32 %v5890_v40, %v5890_v40 }
 0x229   : > { %v6020_v0 = vadd.f32 %v6019_v4, %v5989_v61  ;;  %5920 = vst [vmem:[%s9158_s29 + $0xe8] sm:$0xff] %v5888_v62  ;;  %v5951_v1 = vadd.f32 %v5950_v59, %v5888_v62  ;;  %v5990_v2 = vmul.f32 %v5888_v62, %v5888_v62 }
 0x22b   : > { %v5952_v6 = vadd.f32 %v5951_v1, %v5889_v44  ;;  %v6021_v47 = vadd.f32 %v6020_v0, %v5990_v2 }
 0x22d   : > { %v5953_v63 = vadd.f32 %v5952_v6, %v5890_v40  ;;  %v6022_v7 = vadd.f32 %v6021_v47, %v5991_v5 }
 0x22f   : > { %v5954_v55 = vrot.slane %v5953_v63, 4  ;;  %v6023_v8 = vadd.f32 %v6022_v7, %v5992_v58 }
 0x231   : > { %v5955_v45 = vadd.f32 %v5954_v55, %v5953_v63  ;;  %v6024_v38 = vrot.slane %v6023_v8, 4 }
 0x233   : > { %v5956_v60 = vrot.slane %v5955_v45, 2  ;;  %v6025_v49 = vadd.f32 %v6024_v38, %v6023_v8 }
 0x235   : > { %v5957_v23 = vadd.f32 %v5956_v60, %v5955_v45  ;;  %v6026_v54 = vrot.slane %v6025_v49, 2 }
 0x237   : > { %v5958_v9 = vrot.slane %v5957_v23, 1  ;;  %v6027_v10 = vadd.f32 %v6026_v54, %v6025_v49 }
 0x239   : > { %v5959_v12 = vadd.f32 %v5958_v9, %v5957_v23  ;;  %v6028_v50 = vrot.slane %v6027_v10, 1 }
 0x23b   : > { %5960 = vst [vmem:[%s283_s7] sm:$0x1] %v5959_v12  ;;  %v6029_v13 = vadd.f32 %v6028_v50, %v6027_v10 }
 0x23d   : > { %6030 = vst [vmem:[%s289_s10] sm:$0x1] %v6029_v13 }
 0x23e PF: > { %s16_s20 = sadd.s32 1, %s8007_s20   ;;  %s9258_s18 = smov %s8003_s19 }
 0x23f   : > { %p13_p5 = scmp.ge.s32.totalorder %s16_s20, 4   ;;  %s9259_s19 = smov %s9261_s21 }
 0x241   :  { %15 = sbr.rel (!%p13_p5) target bundleno = 2 (0x2), region = 96 }

</bundles_post_ra>
